<compile_context>
chip_gen: v7x
topology: tpu7x:2x2x1
jax: 0.10.0
libtpu: 0.0.40
codegen_flags: <defaults>
</compile_context>

<pallas_src>
import functools

import jax
import jax.numpy as jnp
from jax.experimental import pallas as pl
from jax.experimental.pallas import tpu as pltpu


def _quantize_kernel(x_ref, embT_ref, halfesq_ref, idx_ref, min_sc, arg_sc,
                     *, bf16_matmul: bool):
    """One (row-tile, codebook-tile) grid step of the VQ nearest-neighbour search.

    x_ref:       (tm, Dp)   input rows (padded feature dim), constant along k
    embT_ref:    (Dp, tk)   codebook tile, pre-transposed (contract dim first)
    halfesq_ref: (1, tk)    0.5*||e||^2 for this tile (padded entries = 1e30)
    idx_ref:     (1, tm)    lane-dense int32 argmin indices (written at last k)
    min_sc:      (tm, 1)    running min of 0.5*dist  (VMEM scratch)
    arg_sc:      (tm, 1)    running argmin            (VMEM scratch)
    """
    k = pl.program_id(1)
    n_k = pl.num_programs(1)

    @pl.when(k == 0)
    def _init():
        min_sc[...] = jnp.full_like(min_sc, jnp.inf)
        arg_sc[...] = jnp.zeros_like(arg_sc)

    x = x_ref[...]
    eT = embT_ref[...]
    half_esq = halfesq_ref[...]                                   # (1, tk) f32

    tm = x.shape[0]
    tk = eT.shape[1]

    if bf16_matmul:
        xe = jnp.dot(x.astype(jnp.bfloat16), eT.astype(jnp.bfloat16),
                     preferred_element_type=jnp.float32)          # (tm, tk) MXU
    else:
        xe = jnp.dot(x.astype(jnp.float32), eT.astype(jnp.float32),
                     preferred_element_type=jnp.float32)          # (tm, tk) MXU

    # 0.5*dist = 0.5*||e||^2 - x.e  (||x||^2 dropped: argmin-invariant).
    dist = half_esq - xe                                          # one VPU pass

    # First-occurrence argmin within this codebook tile (torch.argmin tie rule).
    dmin = jnp.min(dist, axis=1, keepdims=True)                   # (tm, 1) XLU
    lane_iota = jax.lax.broadcasted_iota(jnp.int32, (1, tk), 1)   # (1, tk)
    masked = jnp.where(dist == dmin, lane_iota + k * tk,
                       jnp.iinfo(jnp.int32).max)                  # (tm, tk) i32
    arg_local = jnp.min(masked, axis=1, keepdims=True)            # (tm, 1) XLU

    # Cross-tile combine; strict `<` keeps the earlier tile's index on exact ties.
    better = dmin < min_sc[...]
    arg_sc[...] = jnp.where(better, arg_local, arg_sc[...])
    min_sc[...] = jnp.where(better, dmin, min_sc[...])

    @pl.when(k == n_k - 1)
    def _store():
        # One small (tm,) sublane->lane relayout per row tile; lane-dense store.
        idx_ref[...] = arg_sc[...][:, 0][None, :]


def _round_up(v, m):
    return ((v + m - 1) // m) * m


def quantize_forward(x, embedding_weight, *, bdt_flag=False, tm=256, tk=2048,
                     bf16_matmul=False):
    """Forward of Quantize (inference path; EMA/training buffer updates not run).

    x: (B, T, emb_dim) if bdt_flag is False, else (B, emb_dim, T).
    embedding_weight: (emb_size, emb_dim)
    Returns (embed_idx, embed_idx_qx, quantized_idx) matching the PyTorch module.
    """
    if bdt_flag:
        x = jnp.swapaxes(x, 1, 2)                 # -> (B, T, emb_dim)

    B, T, D = x.shape
    K, D2 = embedding_weight.shape
    assert D == D2

    N = B * T
    # Row tile: multiple of 128 (MXU rows / lane-dense idx store).  256 default;
    # raise to 512+ on v5e/v6e for small codebooks (HBM-bound), keep <=256 on v7x.
    tm = _round_up(max(128, int(tm)), 128)
    # Codebook tile: multiple of 128 lanes, capped at the (padded) codebook size.
    k_pad_min = _round_up(K, 128)
    tk = min(_round_up(max(128, int(tk)), 128), k_pad_min)

    n_pad = _round_up(N, tm)
    d_pad = _round_up(D, 128)
    k_pad = _round_up(K, tk)
    num_row_tiles = n_pad // tm
    num_k_tiles = k_pad // tk

    xf = x.reshape(N, D)
    xf = jnp.pad(xf, ((0, n_pad - N), (0, d_pad - D)))
    emb = jnp.pad(embedding_weight, ((0, k_pad - K), (0, d_pad - D)))
    embT = jnp.transpose(emb)                                        # (Dp, Kp)

    # Hoisted 0.5*||e||^2 (2x folded in); padded entries can never win the argmin.
    half_esq = 0.5 * jnp.sum(emb.astype(jnp.float32) ** 2, axis=1)
    half_esq = jnp.where(jnp.arange(k_pad) < K, half_esq, jnp.float32(1e30))
    half_esq = half_esq[None, :]                                     # (1, Kp) f32

    # VMEM budget: double-buffered x / codebook tiles + the (tm, tk) f32/i32
    # temporaries of the distance/argmin + small esq/idx/scratch buffers; clamped
    # below the physical per-core capacity (64 MiB on v7x).
    est = (2 * tm * d_pad * 4          # x tiles (double-buffered input)
           + 2 * d_pad * tk * 4        # codebook tiles (double-buffered input)
           + 2 * 8 * tk * 4            # 0.5*||e||^2 tiles
           + 2 * 8 * tm * 4            # index output tiles
           + 2 * tm * 128 * 4          # running min / argmin scratch (lane-padded)
           + 4 * tm * tk * 4)          # xe / dist / masked / select temporaries
    try:
        vmem_cap = int(pltpu.get_tpu_info().vmem_capacity_bytes)
    except Exception:
        vmem_cap = 64 * 1024 * 1024
    vmem_limit = int(min(max(est + est // 4, 16 * 1024 * 1024),
                         vmem_cap - 4 * 1024 * 1024))

    idx_tiles = pl.pallas_call(
        functools.partial(_quantize_kernel, bf16_matmul=bool(bf16_matmul)),
        out_shape=jax.ShapeDtypeStruct((num_row_tiles, tm), jnp.int32),
        grid_spec=pltpu.PrefetchScalarGridSpec(
            num_scalar_prefetch=0,
            grid=(num_row_tiles, num_k_tiles),
            in_specs=[
                pl.BlockSpec((tm, d_pad), lambda i, k: (i, 0)),   # x rows (const in k)
                pl.BlockSpec((d_pad, tk), lambda i, k: (0, k)),   # codebook tile
                pl.BlockSpec((1, tk), lambda i, k: (0, k)),       # 0.5*||e||^2 tile
            ],
            out_specs=pl.BlockSpec((1, tm), lambda i, k: (i, 0)),  # lane-dense idx
            scratch_shapes=[
                pltpu.VMEM((tm, 1), jnp.float32),                  # running min
                pltpu.VMEM((tm, 1), jnp.int32),                    # running argmin
            ],
        ),
        compiler_params=pltpu.CompilerParams(
            dimension_semantics=("parallel", "arbitrary"),
            vmem_limit_bytes=vmem_limit,
        ),
    )(xf, embT, half_esq)

    quantized_idx = idx_tiles.reshape(n_pad)[:N].reshape(B, T)

    # Row gather in the wrapper: exact codebook rows (== one_hot.float() @ weight).
    embed_idx = embedding_weight[quantized_idx]                      # (B, T, D)

    # Straight-through estimator: forward value == embed_idx; gradient flows to x.
    embed_idx_qx = x + jax.lax.stop_gradient(embed_idx - x)

    if bdt_flag:
        embed_idx_qx = jnp.swapaxes(embed_idx_qx, 1, 2)

    # TODO(synk): training-mode EMA codebook update (stateful buffers ema_size /
    # ema_w / embedding.weight copy_) is not implemented; inference forward only.
    return embed_idx, embed_idx_qx, quantized_idx


def _reference_dist(x, w):
    """Torch-formula distances in f32 at highest matmul precision."""
    flat = x.reshape(-1, w.shape[1]).astype(jnp.float32)
    wf = w.astype(jnp.float32)
    return (jnp.sum(wf ** 2, axis=1)[None, :]
            - 2.0 * jnp.matmul(flat, wf.T, precision=jax.lax.Precision.HIGHEST)
            + jnp.sum(flat ** 2, axis=1, keepdims=True))


if __name__ == "__main__":
    k1, k2, k3, k4 = jax.random.split(jax.random.PRNGKey(0), 4)

    # --- Test 1: small shapes consistent with the module (B=2, T=8, D=32, K=64).
    B, T, emb_dim, emb_size = 2, 8, 32, 64
    x = jax.random.normal(k1, (B, T, emb_dim), dtype=jnp.float32)
    # embedding.weight.data.uniform_(-1/emb_size, 1/emb_size)
    embedding_weight = jax.random.uniform(
        k2, (emb_size, emb_dim), dtype=jnp.float32,
        minval=-1.0 / emb_size, maxval=1.0 / emb_size)

    embed_idx, embed_idx_qx, quantized_idx = quantize_forward(
        x, embedding_weight, bdt_flag=False)
    jax.block_until_ready((embed_idx, embed_idx_qx, quantized_idx))

    dist = _reference_dist(x, embedding_weight)
    ref_idx = jnp.argmin(dist, axis=1).reshape(B, T)
    ref_embed = embedding_weight[ref_idx]
    assert quantized_idx.shape == (B, T)
    assert jnp.array_equal(quantized_idx, ref_idx)
    assert jnp.allclose(embed_idx, ref_embed, atol=1e-5)
    assert jnp.allclose(embed_idx_qx, ref_embed, atol=1e-5)

    # --- Test 2: bdt_flag path ((B, emb_dim, T) in / out) with the same kernel.
    x_bdt = jnp.swapaxes(x, 1, 2)
    e2, eqx2, qi2 = quantize_forward(x_bdt, embedding_weight, bdt_flag=True)
    jax.block_until_ready((e2, eqx2, qi2))
    assert jnp.array_equal(qi2, ref_idx)
    assert jnp.allclose(e2, ref_embed, atol=1e-5)
    assert eqx2.shape == x_bdt.shape
    assert jnp.allclose(jnp.swapaxes(eqx2, 1, 2), ref_embed, atol=1e-5)

    # --- Test 3: multi-tile path (several row tiles, several K tiles, padding on
    # N, D and K).  Tie-tolerant index check (chosen entry attains the min dist).
    B2, T2, D2, K2 = 2, 96, 24, 200
    x2 = jax.random.normal(k3, (B2, T2, D2), dtype=jnp.float32)
    w2 = jax.random.uniform(k4, (K2, D2), dtype=jnp.float32,
                            minval=-1.0 / K2, maxval=1.0 / K2)
    e3, eqx3, qi3 = quantize_forward(x2, w2, tm=128, tk=128)
    jax.block_until_ready((e3, eqx3, qi3))
    assert qi3.shape == (B2, T2)
    d2 = _reference_dist(x2, w2)
    kidx = qi3.reshape(-1)
    assert bool(jnp.all((kidx >= 0) & (kidx < K2)))
    chosen = jnp.take_along_axis(d2, kidx[:, None], axis=1)[:, 0]
    best = jnp.min(d2, axis=1)
    assert bool(jnp.all(chosen <= best + 1e-5 * jnp.maximum(1.0, jnp.abs(best))))
    assert jnp.allclose(e3.reshape(-1, D2), w2[kidx], atol=1e-6)
    assert jnp.allclose(eqx3.reshape(-1, D2), w2[kidx], atol=1e-5)

    print("KERNEL_OK")
</pallas_src>

<mosaic_0001>
module attributes {stable_mosaic.version = 11 : i64} {
  func.func @_quantize_kernel(%arg0: i32, %arg1: i32, %arg2: memref<256x128xf32, #tpu.memory_space<vmem>>, %arg3: memref<128x128xf32, #tpu.memory_space<vmem>>, %arg4: memref<1x128xf32, #tpu.memory_space<vmem>>, %arg5: memref<1x256xi32, #tpu.memory_space<vmem>>, %arg6: memref<256x1xf32, #tpu.memory_space<vmem>>, %arg7: memref<256x1xi32, #tpu.memory_space<vmem>>) attributes {dimension_semantics = [#tpu.dimension_semantics<parallel>, #tpu.dimension_semantics<arbitrary>], iteration_bounds = array<i64: 1, 1>, scalar_prefetch = 0 : i64, scratch_operands = 2 : i64, tpu.core_type = #tpu.core_type<tc>, window_params = [{transform_indices = @transform_0, window_bounds = array<i64: 256, 128>}, {transform_indices = @transform_1, window_bounds = array<i64: 128, 128>}, {transform_indices = @transform_2, window_bounds = array<i64: 1, 128>}, {transform_indices = @transform_3, window_bounds = array<i64: 1, 256>}]} {
    %c0_i32 = arith.constant 0 : i32
    %0 = arith.cmpi eq, %arg1, %c0_i32 : i32
    %1 = arith.extui %0 : i1 to i32
    %c0_i32_0 = arith.constant 0 : i32
    %2 = arith.cmpi ne, %1, %c0_i32_0 : i32
    scf.if %2 {
      %cst_20 = arith.constant 0x7F800000 : f32
      %34 = vector.broadcast %cst_20 : f32 to vector<256x1xf32>
      %c0_21 = arith.constant 0 : index
      %c0_22 = arith.constant 0 : index
      %35 = vector.load %arg6[%c0_21, %c0_22] : memref<256x1xf32, #tpu.memory_space<vmem>>, vector<256x1xf32>
      tpu.vector_store %arg6[%c0_21, %c0_22], %34 {strides = array<i32>} : memref<256x1xf32, #tpu.memory_space<vmem>>, vector<256x1xf32>,
      %c0_i32_23 = arith.constant 0 : i32
      %36 = vector.broadcast %c0_i32_23 : i32 to vector<256x1xi32>
      %c0_24 = arith.constant 0 : index
      %c0_25 = arith.constant 0 : index
      %37 = vector.load %arg7[%c0_24, %c0_25] : memref<256x1xi32, #tpu.memory_space<vmem>>, vector<256x1xi32>
      tpu.vector_store %arg7[%c0_24, %c0_25], %36 {strides = array<i32>} : memref<256x1xi32, #tpu.memory_space<vmem>>, vector<256x1xi32>,
    } else {
    }
    %c0 = arith.constant 0 : index
    %c0_1 = arith.constant 0 : index
    %3 = vector.load %arg2[%c0, %c0_1] : memref<256x128xf32, #tpu.memory_space<vmem>>, vector<256x128xf32>
    %c0_2 = arith.constant 0 : index
    %c0_3 = arith.constant 0 : index
    %4 = vector.load %arg3[%c0_2, %c0_3] : memref<128x128xf32, #tpu.memory_space<vmem>>, vector<128x128xf32>
    %c0_4 = arith.constant 0 : index
    %c0_5 = arith.constant 0 : index
    %5 = vector.load %arg4[%c0_4, %c0_5] : memref<1x128xf32, #tpu.memory_space<vmem>>, vector<1x128xf32>
    %cst = arith.constant dense<0.000000e+00> : vector<256x128xf32>
    %6 = tpu.matmul %3, %4, %cst {dimension_numbers = #tpu.dot_dimension_numbers<[1], [0], [0], [1], [0, 0, 1, 1], [], []>} : vector<256x128xf32>, vector<128x128xf32>, vector<256x128xf32> -> vector<256x128xf32>
    %7 = vector.broadcast %5 : vector<1x128xf32> to vector<256x128xf32>
    %8 = arith.subf %7, %6 : vector<256x128xf32>
    %cst_6 = arith.constant dense<0x7F800000> : vector<256xf32>
    %9 = vector.multi_reduction <minimumf>, %8, %cst_6 [1] : vector<256x128xf32> to vector<256xf32>
    %10 = vector.shape_cast %9 : vector<256xf32> to vector<256x1xf32>
    %11 = tpu.iota {dimensions = array<i32: 1>} : vector<1x128xi32>
    %12 = vector.broadcast %10 : vector<256x1xf32> to vector<256x128xf32>
    %13 = arith.cmpf oeq, %8, %12 : vector<256x128xf32>
    %c128_i32 = arith.constant 128 : i32
    %14 = arith.muli %arg1, %c128_i32 : i32
    %15 = vector.broadcast %14 : i32 to vector<1x128xi32>
    %16 = arith.addi %11, %15 : vector<1x128xi32>
    %c2147483647_i32 = arith.constant 2147483647 : i32
    %17 = vector.shape_cast %16 : vector<1x128xi32> to vector<1x128xi32>
    %18 = vector.broadcast %17 : vector<1x128xi32> to vector<256x128xi32>
    %19 = vector.broadcast %c2147483647_i32 : i32 to vector<256x128xi32>
    %20 = arith.select %13, %18, %19 : vector<256x128xi1>, vector<256x128xi32>
    %cst_7 = arith.constant dense<2147483647> : vector<256xi32>
    %21 = vector.multi_reduction <minsi>, %20, %cst_7 [1] : vector<256x128xi32> to vector<256xi32>
    %22 = vector.shape_cast %21 : vector<256xi32> to vector<256x1xi32>
    %c0_8 = arith.constant 0 : index
    %c0_9 = arith.constant 0 : index
    %23 = vector.load %arg6[%c0_8, %c0_9] : memref<256x1xf32, #tpu.memory_space<vmem>>, vector<256x1xf32>
    %24 = arith.cmpf olt, %10, %23 : vector<256x1xf32>
    %c0_10 = arith.constant 0 : index
    %c0_11 = arith.constant 0 : index
    %25 = vector.load %arg7[%c0_10, %c0_11] : memref<256x1xi32, #tpu.memory_space<vmem>>, vector<256x1xi32>
    %26 = arith.select %24, %22, %25 : vector<256x1xi1>, vector<256x1xi32>
    %c0_12 = arith.constant 0 : index
    %c0_13 = arith.constant 0 : index
    %27 = vector.load %arg7[%c0_12, %c0_13] : memref<256x1xi32, #tpu.memory_space<vmem>>, vector<256x1xi32>
    tpu.vector_store %arg7[%c0_12, %c0_13], %26 {strides = array<i32>} : memref<256x1xi32, #tpu.memory_space<vmem>>, vector<256x1xi32>,
    %c0_14 = arith.constant 0 : index
    %c0_15 = arith.constant 0 : index
    %28 = vector.load %arg6[%c0_14, %c0_15] : memref<256x1xf32, #tpu.memory_space<vmem>>, vector<256x1xf32>
    %29 = arith.select %24, %10, %28 : vector<256x1xi1>, vector<256x1xf32>
    %c0_16 = arith.constant 0 : index
    %c0_17 = arith.constant 0 : index
    %30 = vector.load %arg6[%c0_16, %c0_17] : memref<256x1xf32, #tpu.memory_space<vmem>>, vector<256x1xf32>
    tpu.vector_store %arg6[%c0_16, %c0_17], %29 {strides = array<i32>} : memref<256x1xf32, #tpu.memory_space<vmem>>, vector<256x1xf32>,
    %c0_i32_18 = arith.constant 0 : i32
    %31 = arith.cmpi eq, %arg1, %c0_i32_18 : i32
    %32 = arith.extui %31 : i1 to i32
    %c0_i32_19 = arith.constant 0 : i32
    %33 = arith.cmpi ne, %32, %c0_i32_19 : i32
    scf.if %33 {
      %c0_20 = arith.constant 0 : index
      %c0_21 = arith.constant 0 : index
      %34 = vector.load %arg7[%c0_20, %c0_21] : memref<256x1xi32, #tpu.memory_space<vmem>>, vector<256x1xi32>
      %35 = vector.shape_cast %34 : vector<256x1xi32> to vector<256xi32>
      %36 = vector.shape_cast %35 : vector<256xi32> to vector<1x256xi32>
      %c0_22 = arith.constant 0 : index
      %c0_23 = arith.constant 0 : index
      %37 = vector.load %arg5[%c0_22, %c0_23] : memref<1x256xi32, #tpu.memory_space<vmem>>, vector<1x256xi32>
      tpu.vector_store %arg5[%c0_22, %c0_23], %36 {strides = array<i32>} : memref<1x256xi32, #tpu.memory_space<vmem>>, vector<1x256xi32>,
    } else {
    }
    return
  }
  func.func @transform_0(%arg0: i32, %arg1: i32) -> (i32, i32) {
    %c0_i32 = arith.constant 0 : i32
    %c0_i32_0 = arith.constant 0 : i32
    return %arg0, %c0_i32 : i32, i32
  }
  func.func @transform_1(%arg0: i32, %arg1: i32) -> (i32, i32) {
    %c0_i32 = arith.constant 0 : i32
    %c0_i32_0 = arith.constant 0 : i32
    return %c0_i32, %arg1 : i32, i32
  }
  func.func @transform_2(%arg0: i32, %arg1: i32) -> (i32, i32) {
    %c0_i32 = arith.constant 0 : i32
    %c0_i32_0 = arith.constant 0 : i32
    return %c0_i32, %arg1 : i32, i32
  }
  func.func @transform_3(%arg0: i32, %arg1: i32) -> (i32, i32) {
    %c0_i32 = arith.constant 0 : i32
    %c0_i32_0 = arith.constant 0 : i32
    return %arg0, %c0_i32 : i32, i32
  }
}

</mosaic_0001>

<bundles_post_ra>
// kernel: tpu_custom_call.1
= control target key start
LH: loop header
LB: loop body
LE: loop exit
PB: predicated region body
PF: predicated region fallthrough
CT: control target
= control target key end

     0   :  { %8 = vsyncpa [#allocation5], 0  ;;  %s6941_s0 = inlined_call_operand.hbm [shape: f32[256,128], index: 0, kind: input, shape index: {}]   ;;  %s6942_s1 = inlined_call_operand.hbm [shape: f32[128,128], index: 1, kind: input, shape index: {}]   ;;  %s6943_s2 = inlined_call_operand.vmem [shape: f32[1,128], index: 2, kind: input, shape index: {}]   ;;  %s6944_s3 = inlined_call_operand.hbm [shape: s32[1,256], index: 3, kind: output, shape index: {}]  }
   0x1   :  { %9 = vsyncpa [#allocation8], 0 }
   0x2   :  { %10 = vsyncpa [#allocation6], 0  ;;  %s5108_s12 = smov [#allocation4]   ;;  %s5036_s16 = scalar_lea.hbm %s6941_s0, 4096 }
   0x3   :  { %s16_s13 = sshll.u32 %s5108_s12, 4  ;;  %p5037_p0 = scmp.ne.s32.totalorder %s6941_s0, %s5036_s16  ;;  %s17_s13 = int_to_ptr.vmem [resolvable:$true] %s16_s13 }
   0x4   :  { %p5040_p1 = scmp.lt.u32.totalorder %s5036_s16, %s6941_s0 }
   0x6   :  { %p5042_p2 = pnand %p5040_p1, %p5037_p0 }
   0x8   :  { %5045 = shalt.err (!%p5042_p2)
}
   0x9   :  { %s5046_s21 = scalar_lea.vmem %s17_s13, 4096  ;;  %p5051_p4 = scmp.lt.s32.totalorder %s17_s13, %s17_s13 }
   0xa   :  { %p5047_p3 = scmp.ne.s32.totalorder %s17_s13, %s5046_s21  ;;  %p5052_p5 = scmp.lt.s32.totalorder %s5046_s21, %s5046_s21 }
   0xc   :  { %p5053_p6 = por %p5052_p5, %p5051_p4 }
   0xe   :  { %p5054_p7 = pnand %p5053_p6, %p5047_p3 }
  0x10   :  { %5057 = shalt.err (!%p5054_p7)
}
  0x11   :  { %s5109_s22 = smov 128   ;;  %s5110_s23 = smov 8  }
  0x12   :  { %22 = dma.hbm_to_vmem [thread:$0]  %s6941_s0, 4096, %s17_s13, [#allocation5], %s5109_s22, %s5109_s22, %s5110_s23  }
  0x13   :  { %s5111_s26 = smov [#allocation7]   ;;  %s5058_s30 = scalar_lea.hbm %s6942_s1, 2048 }
  0x14   :  { %s28_s27 = sshll.u32 %s5111_s26, 4  ;;  %p5059_p8 = scmp.ne.s32.totalorder %s6942_s1, %s5058_s30  ;;  %s29_s27 = int_to_ptr.vmem [resolvable:$true] %s28_s27 }
  0x15   :  { %p5062_p9 = scmp.lt.u32.totalorder %s5058_s30, %s6942_s1 }
  0x17   :  { %p5064_p10 = pnand %p5062_p9, %p5059_p8 }
  0x19   :  { %5067 = shalt.err (!%p5064_p10)
}
  0x1a   :  { %s5068_s8 = scalar_lea.vmem %s29_s27, 2048  ;;  %p5073_p12 = scmp.lt.s32.totalorder %s29_s27, %s29_s27 }
  0x1b   :  { %p5069_p11 = scmp.ne.s32.totalorder %s29_s27, %s5068_s8  ;;  %p5074_p13 = scmp.lt.s32.totalorder %s5068_s8, %s5068_s8 }
  0x1d   :  { %p5075_p0 = por %p5074_p13, %p5073_p12 }
  0x1f   :  { %p5076_p1 = pnand %p5075_p0, %p5069_p11 }
  0x21   :  { %5079 = shalt.err (!%p5076_p1)
}
  0x22   :  { %34 = dma.hbm_to_vmem [thread:$0]  %s6942_s1, 2048, %s29_s27, [#allocation8], %s5109_s22, %s5109_s22, %s5110_s23  }
  0x23   :  { %5102 = dma.done.wait [#allocation5], 4096  }
  0x24   :  { %5103 = vsyncadd [#allocation5], 4294963200 }
  0x25   :  { %5104 = dma.done.wait [#allocation8], 2048  }
  0x26   :  { %5105 = vsyncadd [#allocation8], 4294965248  ;;  %v144_v0 = vld [vmem:[#allocation7] sm:$0xff]  ;;  %v145_v1 = vld [vmem:[#allocation7 + $0x8] sm:$0xff]  ;;  %vm47_vm0 = vcmask 7168   ;;  %v5112_v56 = vmov inf  }
  0x27   :  { %v146_v2 = vld [vmem:[#allocation7 + $0x10] sm:$0xff]  ;;  %v4946_v3 = vpack.c.bf16 %v145_v1, %v144_v0  ;;  %v147_v4 = vld [vmem:[#allocation7 + $0x18] sm:$0xff]  ;;  %v148_v6 = vld [vmem:[#allocation7 + $0x20] sm:$0xff]  ;;  %65 = vst.msk [vmem:[#allocation2 + $0x88] sm:$0xff] %vm47_vm0, %v5112_v56 }
  0x28   :  { %v4950_v5 = vpack.c.bf16 %v147_v4, %v146_v2  ;;  %v149_v7 = vld [vmem:[#allocation7 + $0x28] sm:$0xff]  ;;  %v112_v9 = vld [vmem:[#allocation4] sm:$0xff]  ;;  %v150_v11 = vld [vmem:[#allocation7 + $0x30] sm:$0xff]  ;;  %48 = vst.msk [vmem:[#allocation2] sm:$0xff] %vm47_vm0, %v5112_v56 }
  0x29   :  { %4947 = vmatprep.subr.bf16.mxu0 %v4946_v3  ;;  %4978 = vmatprep.subr.bf16.mxu1 %v4946_v3  ;;  %v4954_v8 = vpack.c.bf16 %v149_v7, %v148_v6  ;;  %v128_v10 = vld [vmem:[#allocation4 + $0x80] sm:$0xff]  ;;  %v151_v12 = vld [vmem:[#allocation7 + $0x38] sm:$0xff]  ;;  %v153_v15 = vld [vmem:[#allocation7 + $0x48] sm:$0xff]  ;;  %49 = vst.msk [vmem:[#allocation2 + $0x8] sm:$0xff] %vm47_vm0, %v5112_v56 }
  0x2a   :  { %4949 = vmatpush3.bf16.msra.mxu0 %v4946_v3  ;;  %4986 = vmatpush3.bf16.msra.mxu1 %v4946_v3  ;;  %v4958_v13 = vpack.c.bf16 %v151_v12, %v150_v11  ;;  %v152_v14 = vld [vmem:[#allocation7 + $0x40] sm:$0xff]  ;;  %v154_v17 = vld [vmem:[#allocation7 + $0x50] sm:$0xff]  ;;  %v155_v18 = vld [vmem:[#allocation7 + $0x58] sm:$0xff]  ;;  %50 = vst.msk [vmem:[#allocation2 + $0x10] sm:$0xff] %vm47_vm0, %v5112_v56 }
  0x2b   :  { %4951 = vmatprep.subr.bf16.mxu0 %v4950_v5  ;;  %4979 = vmatprep.subr.bf16.mxu1 %v4950_v5  ;;  %v4962_v16 = vpack.c.bf16 %v153_v15, %v152_v14  ;;  %v4966_v19 = vpack.c.bf16 %v155_v18, %v154_v17  ;;  %v156_v20 = vld [vmem:[#allocation7 + $0x60] sm:$0xff]  ;;  %v157_v21 = vld [vmem:[#allocation7 + $0x68] sm:$0xff]  ;;  %v158_v23 = vld [vmem:[#allocation7 + $0x70] sm:$0xff]  ;;  %51 = vst.msk [vmem:[#allocation2 + $0x18] sm:$0xff] %vm47_vm0, %v5112_v56 }
  0x2c   :  { %4898 = vmatprep.mubr.f32.mxu0 %v112_v9  ;;  %4922 = vmatprep.mubr.f32.mxu1 %v128_v10  ;;  %v4970_v22 = vpack.c.bf16 %v157_v21, %v156_v20  ;;  %v159_v24 = vld [vmem:[#allocation7 + $0x78] sm:$0xff]  ;;  %v113_v26 = vld [vmem:[#allocation4 + $0x8] sm:$0xff]  ;;  %v114_v28 = vld [vmem:[#allocation4 + $0x10] sm:$0xff]  ;;  %52 = vst.msk [vmem:[#allocation2 + $0x20] sm:$0xff] %vm47_vm0, %v5112_v56 }
  0x2d   :  { %v4974_v25 = vpack.c.bf16 %v159_v24, %v158_v23  ;;  %v129_v27 = vld [vmem:[#allocation4 + $0x88] sm:$0xff]  ;;  %v130_v29 = vld [vmem:[#allocation4 + $0x90] sm:$0xff]  ;;  %v115_v30 = vld [vmem:[#allocation4 + $0x18] sm:$0xff]  ;;  %53 = vst.msk [vmem:[#allocation2 + $0x28] sm:$0xff] %vm47_vm0, %v5112_v56 }
  0x2e   :  { %4953 = vmatpush3.bf16.msra.mxu0 %v4950_v5  ;;  %4987 = vmatpush3.bf16.msra.mxu1 %v4950_v5  ;;  %v131_v31 = vld [vmem:[#allocation4 + $0x98] sm:$0xff]  ;;  %v116_v32 = vld [vmem:[#allocation4 + $0x20] sm:$0xff]  ;;  %v117_v34 = vld [vmem:[#allocation4 + $0x28] sm:$0xff]  ;;  %54 = vst.msk [vmem:[#allocation2 + $0x30] sm:$0xff] %vm47_vm0, %v5112_v56 }
  0x2f   :  { %4955 = vmatprep.subr.bf16.mxu0 %v4954_v8  ;;  %4980 = vmatprep.subr.bf16.mxu1 %v4954_v8  ;;  %v132_v33 = vld [vmem:[#allocation4 + $0xa0] sm:$0xff]  ;;  %v133_v35 = vld [vmem:[#allocation4 + $0xa8] sm:$0xff]  ;;  %v118_v36 = vld [vmem:[#allocation4 + $0x30] sm:$0xff]  ;;  %55 = vst.msk [vmem:[#allocation2 + $0x38] sm:$0xff] %vm47_vm0, %v5112_v56 }
  0x30   :  { %v134_v37 = vld [vmem:[#allocation4 + $0xb0] sm:$0xff]  ;;  %v119_v38 = vld [vmem:[#allocation4 + $0x38] sm:$0xff]  ;;  %v120_v40 = vld [vmem:[#allocation4 + $0x40] sm:$0xff]  ;;  %56 = vst.msk [vmem:[#allocation2 + $0x40] sm:$0xff] %vm47_vm0, %v5112_v56 }
  0x31   :  { %v135_v39 = vld [vmem:[#allocation4 + $0xb8] sm:$0xff]  ;;  %v136_v41 = vld [vmem:[#allocation4 + $0xc0] sm:$0xff]  ;;  %v121_v42 = vld [vmem:[#allocation4 + $0x48] sm:$0xff]  ;;  %57 = vst.msk [vmem:[#allocation2 + $0x48] sm:$0xff] %vm47_vm0, %v5112_v56 }
  0x32   :  { %4957 = vmatpush3.bf16.msra.mxu0 %v4954_v8  ;;  %4988 = vmatpush3.bf16.msra.mxu1 %v4954_v8  ;;  %v137_v43 = vld [vmem:[#allocation4 + $0xc8] sm:$0xff]  ;;  %v122_v44 = vld [vmem:[#allocation4 + $0x50] sm:$0xff]  ;;  %v123_v46 = vld [vmem:[#allocation4 + $0x58] sm:$0xff]  ;;  %58 = vst.msk [vmem:[#allocation2 + $0x50] sm:$0xff] %vm47_vm0, %v5112_v56 }
  0x33   :  { %4959 = vmatprep.subr.bf16.mxu0 %v4958_v13  ;;  %4981 = vmatprep.subr.bf16.mxu1 %v4958_v13  ;;  %v138_v45 = vld [vmem:[#allocation4 + $0xd0] sm:$0xff]  ;;  %v139_v47 = vld [vmem:[#allocation4 + $0xd8] sm:$0xff]  ;;  %v124_v48 = vld [vmem:[#allocation4 + $0x60] sm:$0xff]  ;;  %59 = vst.msk [vmem:[#allocation2 + $0x58] sm:$0xff] %vm47_vm0, %v5112_v56 }
  0x34   :  { %v140_v49 = vld [vmem:[#allocation4 + $0xe0] sm:$0xff]  ;;  %v125_v50 = vld [vmem:[#allocation4 + $0x68] sm:$0xff]  ;;  %v126_v52 = vld [vmem:[#allocation4 + $0x70] sm:$0xff]  ;;  %60 = vst.msk [vmem:[#allocation2 + $0x60] sm:$0xff] %vm47_vm0, %v5112_v56 }
  0x35   :  { %v141_v51 = vld [vmem:[#allocation4 + $0xe8] sm:$0xff]  ;;  %v142_v53 = vld [vmem:[#allocation4 + $0xf0] sm:$0xff]  ;;  %v127_v54 = vld [vmem:[#allocation4 + $0x78] sm:$0xff]  ;;  %61 = vst.msk [vmem:[#allocation2 + $0x68] sm:$0xff] %vm47_vm0, %v5112_v56 }
  0x36   :  { %4961 = vmatpush3.bf16.msra.mxu0 %v4958_v13  ;;  %4989 = vmatpush3.bf16.msra.mxu1 %v4958_v13  ;;  %v143_v55 = vld [vmem:[#allocation4 + $0xf8] sm:$0xff]  ;;  %62 = vst.msk [vmem:[#allocation2 + $0x70] sm:$0xff] %vm47_vm0, %v5112_v56  ;;  %63 = vst.msk [vmem:[#allocation2 + $0x78] sm:$0xff] %vm47_vm0, %v5112_v56  ;;  %v5195_v57 = vld [vmem:[%s6943_s2] ss:$0 sm:$0xff]  ;;  %s5115_s2 = smov [#allocation9]  }
  0x37   :  { %4963 = vmatprep.subr.bf16.mxu0 %v4962_v16  ;;  %4982 = vmatprep.subr.bf16.mxu1 %v4962_v16  ;;  %64 = vst.msk [vmem:[#allocation2 + $0x80] sm:$0xff] %vm47_vm0, %v5112_v56  ;;  %66 = vst.msk [vmem:[#allocation2 + $0x90] sm:$0xff] %vm47_vm0, %v5112_v56  ;;  %s4743_s11 = sshll.u32 %s5115_s2, 4  ;;  %s4744_s11 = int_to_ptr.vmem [resolvable:$true] %s4743_s11 }
  0x38   :  { %67 = vst.msk [vmem:[#allocation2 + $0x98] sm:$0xff] %vm47_vm0, %v5112_v56  ;;  %68 = vst.msk [vmem:[#allocation2 + $0xa0] sm:$0xff] %vm47_vm0, %v5112_v56  ;;  %s5080_s12 = scalar_lea.vmem %s4744_s11, 32  ;;  %p5085_p3 = scmp.lt.s32.totalorder %s4744_s11, %s4744_s11 }
  0x39   :  { %69 = vst.msk [vmem:[#allocation2 + $0xa8] sm:$0xff] %vm47_vm0, %v5112_v56  ;;  %70 = vst.msk [vmem:[#allocation2 + $0xb0] sm:$0xff] %vm47_vm0, %v5112_v56  ;;  %p5081_p2 = scmp.ne.s32.totalorder %s4744_s11, %s5080_s12  ;;  %p5086_p4 = scmp.lt.s32.totalorder %s5080_s12, %s5080_s12 }
  0x3a   :  { %4965 = vmatpush3.bf16.msra.mxu0 %v4962_v16  ;;  %4990 = vmatpush3.bf16.msra.mxu1 %v4962_v16  ;;  %71 = vst.msk [vmem:[#allocation2 + $0xb8] sm:$0xff] %vm47_vm0, %v5112_v56  ;;  %72 = vst.msk [vmem:[#allocation2 + $0xc0] sm:$0xff] %vm47_vm0, %v5112_v56 }
  0x3b   :  { %4967 = vmatprep.subr.bf16.mxu0 %v4966_v19  ;;  %4983 = vmatprep.subr.bf16.mxu1 %v4966_v19  ;;  %73 = vst.msk [vmem:[#allocation2 + $0xc8] sm:$0xff] %vm47_vm0, %v5112_v56  ;;  %74 = vst.msk [vmem:[#allocation2 + $0xd0] sm:$0xff] %vm47_vm0, %v5112_v56  ;;  %p5087_p5 = por %p5086_p4, %p5085_p3 }
  0x3c   :  { %75 = vst.msk [vmem:[#allocation2 + $0xd8] sm:$0xff] %vm47_vm0, %v5112_v56  ;;  %76 = vst.msk [vmem:[#allocation2 + $0xe0] sm:$0xff] %vm47_vm0, %v5112_v56 }
  0x3d   :  { %77 = vst.msk [vmem:[#allocation2 + $0xe8] sm:$0xff] %vm47_vm0, %v5112_v56  ;;  %78 = vst.msk [vmem:[#allocation2 + $0xf0] sm:$0xff] %vm47_vm0, %v5112_v56  ;;  %p5088_p6 = pnand %p5087_p5, %p5081_p2 }
  0x3e   :  { %4969 = vmatpush3.bf16.msra.mxu0 %v4966_v19  ;;  %4991 = vmatpush3.bf16.msra.mxu1 %v4966_v19  ;;  %79 = vst.msk [vmem:[#allocation2 + $0xf8] sm:$0xff] %vm47_vm0, %v5112_v56 }
  0x3f   :  { %4971 = vmatprep.subr.bf16.mxu0 %v4970_v22  ;;  %4984 = vmatprep.subr.bf16.mxu1 %v4970_v22 }
  0x42   :  { %4973 = vmatpush3.bf16.msra.mxu0 %v4970_v22  ;;  %4992 = vmatpush3.bf16.msra.mxu1 %v4970_v22 }
  0x43   :  { %4975 = vmatprep.subr.bf16.mxu0 %v4974_v25  ;;  %4985 = vmatprep.subr.bf16.mxu1 %v4974_v25 }
  0x46   :  { %4977 = vmatpush3.bf16.msra.mxu0 %v4974_v25  ;;  %4993 = vmatpush3.bf16.msra.mxu1 %v4974_v25 }
  0x49   :  { %4899 = vmatmul.mubr.f32.vlgmr.msra.gmra.mrb[0].mxu0 %v113_v26  ;;  %4923 = vmatmul.mubr.f32.vlgmr.msra.gmra.mrb[0].mxu1 %v129_v27 }
  0x4a   :  { %4901 = vmatprep.mubr.f32.mxu0 %v114_v28  ;;  %4925 = vmatprep.mubr.f32.mxu1 %v130_v29 }
  0x4d   :  { %4902 = vmatmul.mubr.f32.gmra.mrb[2].mxu0 %v115_v30  ;;  %4926 = vmatmul.mubr.f32.gmra.mrb[2].mxu1 %v131_v31 }
  0x4e   :  { %4904 = vmatprep.mubr.f32.mxu0 %v116_v32  ;;  %4928 = vmatprep.mubr.f32.mxu1 %v132_v33 }
  0x51   :  { %4905 = vmatmul.mubr.f32.gmra.mrb[4].mxu0 %v117_v34  ;;  %4929 = vmatmul.mubr.f32.gmra.mrb[4].mxu1 %v133_v35 }
  0x52   :  { %4907 = vmatprep.mubr.f32.mxu0 %v118_v36  ;;  %4931 = vmatprep.mubr.f32.mxu1 %v134_v37 }
  0x55   :  { %4908 = vmatmul.mubr.f32.gmra.mrb[6].mxu0 %v119_v38  ;;  %4932 = vmatmul.mubr.f32.gmra.mrb[6].mxu1 %v135_v39 }
  0x56   :  { %4910 = vmatprep.mubr.f32.mxu0 %v120_v40  ;;  %4934 = vmatprep.mubr.f32.mxu1 %v136_v41 }
  0x59   :  { %4911 = vmatmul.mubr.f32.gmra.mrb[8].mxu0 %v121_v42  ;;  %4935 = vmatmul.mubr.f32.gmra.mrb[8].mxu1 %v137_v43 }
  0x5a   :  { %4913 = vmatprep.mubr.f32.mxu0 %v122_v44  ;;  %4937 = vmatprep.mubr.f32.mxu1 %v138_v45 }
  0x5d   :  { %4914 = vmatmul.mubr.f32.gmra.mrb[10].mxu0 %v123_v46  ;;  %4938 = vmatmul.mubr.f32.gmra.mrb[10].mxu1 %v139_v47 }
  0x5e   :  { %4916 = vmatprep.mubr.f32.mxu0 %v124_v48  ;;  %4940 = vmatprep.mubr.f32.mxu1 %v140_v49 }
  0x61   :  { %4917 = vmatmul.mubr.f32.gmra.mrb[12].mxu0 %v125_v50  ;;  %4941 = vmatmul.mubr.f32.gmra.mrb[12].mxu1 %v141_v51 }
  0x62   :  { %4919 = vmatprep.mubr.f32.mxu0 %v126_v52  ;;  %4943 = vmatprep.mubr.f32.mxu1 %v142_v53 }
  0x65   :  { %4920 = vmatmul.mubr.f32.gmra.mrb[14].mxu0 %v127_v54  ;;  %4944 = vmatmul.mubr.f32.gmra.mrb[14].mxu1 %v143_v55 }
 0x11c   :  { %v4900_v58 = vpop.f32.mrb[0].mxu0  ;;  %v4924_v59 = vpop.f32.mrb[0].mxu1 }
 0x11d   :  { %v5198_v60 = vsub.f32 %v5195_v57, %v4900_v58  ;;  %v5201_v61 = vsub.f32 %v5195_v57, %v4924_v59  ;;  %v227_v62 = vpop.f32.mrb[1].mxu0  ;;  %v307_v63 = vpop.f32.mrb[1].mxu1  ;;  %v6945_v59 = vlaneseq }
 0x11e   :  { %v5206_v0 = vsub.f32 %v5195_v57, %v307_v63  ;;  %v5209_v3 = vsub.f32 %v5195_v57, %v227_v62  ;;  %v5325_v62 = vld [vmem:[#allocation2 + $0x88] sm:$0xff] }
 0x11f   :  { %458 = vmin.xlane.f32.xlu1 %v5201_v61  ;;  %426 = vmin.xlane.f32.xlu0 %v5198_v60  ;;  %7044 = vst [vmem:[#allocation13_spill] sm:$0xff] %v5325_v62  ;;  %v5327_v63 = vld [vmem:[#allocation2 + $0x8] sm:$0xff] }
 0x120   :  { %v4903_v1 = vpop.f32.mrb[2].mxu0  ;;  %v4927_v2 = vpop.f32.mrb[2].mxu1  ;;  %7045 = vst [vmem:[#allocation14_spill] sm:$0xff] %v5327_v63 }
 0x121   :  { %v237_v4 = vpop.f32.mrb[3].mxu0  ;;  %v317_v5 = vpop.f32.mrb[3].mxu1  ;;  %v5214_v6 = vsub.f32 %v5195_v57, %v4903_v1  ;;  %v5217_v7 = vsub.f32 %v5195_v57, %v4927_v2  ;;  %v5330_v1 = vand.u32 127, %v6945_v59 }
 0x122   :  { %v5222_v12 = vsub.f32 %v5195_v57, %v237_v4  ;;  %v5225_v13 = vsub.f32 %v5195_v57, %v317_v5 }
 0x123   :  { %456 = vmin.xlane.f32.xlu1 %v5206_v0  ;;  %424 = vmin.xlane.f32.xlu0 %v5209_v3  ;;  %7046 = vst [vmem:[#allocation15_spill] sm:$0xff] %v5330_v1 }
 0x124   :  { %v4906_v8 = vpop.f32.mrb[4].mxu0  ;;  %v4930_v9 = vpop.f32.mrb[4].mxu1 }
 0x125   :  { %v247_v10 = vpop.f32.mrb[5].mxu0  ;;  %v327_v11 = vpop.f32.mrb[5].mxu1  ;;  %v5230_v18 = vsub.f32 %v5195_v57, %v4906_v8  ;;  %v5233_v19 = vsub.f32 %v5195_v57, %v4930_v9  ;;  %v5354_v8 = vld [vmem:[#allocation2 + $0x80] sm:$0xff] }
 0x126   :  { %v5238_v24 = vsub.f32 %v5195_v57, %v247_v10  ;;  %v5241_v25 = vsub.f32 %v5195_v57, %v327_v11  ;;  %7049 = vst [vmem:[#allocation18_spill] sm:$0xff] %v5354_v8  ;;  %v5356_v9 = vld [vmem:[#allocation2] sm:$0xff] }
 0x127   :  { %462 = vmin.xlane.f32.xlu1 %v5217_v7  ;;  %430 = vmin.xlane.f32.xlu0 %v5214_v6  ;;  %7050 = vst [vmem:[#allocation19_spill] sm:$0xff] %v5356_v9 }
 0x128   :  { %v4909_v14 = vpop.f32.mrb[6].mxu0  ;;  %v4933_v15 = vpop.f32.mrb[6].mxu1 }
 0x129   :  { %v257_v16 = vpop.f32.mrb[7].mxu0  ;;  %v337_v17 = vpop.f32.mrb[7].mxu1  ;;  %v5246_v30 = vsub.f32 %v5195_v57, %v4909_v14  ;;  %v5249_v31 = vsub.f32 %v5195_v57, %v4933_v15 }
 0x12a   :  { %v5254_v36 = vsub.f32 %v5195_v57, %v257_v16  ;;  %v5257_v37 = vsub.f32 %v5195_v57, %v337_v17 }
 0x12b   :  { %460 = vmin.xlane.f32.xlu1 %v5225_v13  ;;  %428 = vmin.xlane.f32.xlu0 %v5222_v12 }
 0x12c   :  { %v4912_v20 = vpop.f32.mrb[8].mxu0  ;;  %v4936_v21 = vpop.f32.mrb[8].mxu1 }
 0x12d   :  { %v267_v22 = vpop.f32.mrb[9].mxu0  ;;  %v347_v23 = vpop.f32.mrb[9].mxu1  ;;  %v5262_v42 = vsub.f32 %v5195_v57, %v4912_v20  ;;  %v5265_v43 = vsub.f32 %v5195_v57, %v4936_v21 }
 0x12e   :  { %v5270_v44 = vsub.f32 %v5195_v57, %v267_v22  ;;  %v5273_v45 = vsub.f32 %v5195_v57, %v347_v23  ;;  %v5390_v22 = vld [vmem:[#allocation2 + $0x98] sm:$0xff] }
 0x12f   :  { %466 = vmin.xlane.f32.xlu1 %v5233_v19  ;;  %434 = vmin.xlane.f32.xlu0 %v5230_v18  ;;  %7053 = vst [vmem:[#allocation22_spill] sm:$0xff] %v5390_v22  ;;  %v5392_v23 = vld [vmem:[#allocation2 + $0x18] sm:$0xff] }
 0x130   :  { %v4915_v26 = vpop.f32.mrb[10].mxu0  ;;  %v4939_v27 = vpop.f32.mrb[10].mxu1  ;;  %7054 = vst [vmem:[#allocation23_spill] sm:$0xff] %v5392_v23 }
 0x131   :  { %v277_v28 = vpop.f32.mrb[11].mxu0  ;;  %v357_v29 = vpop.f32.mrb[11].mxu1  ;;  %v5278_v46 = vsub.f32 %v5195_v57, %v4915_v26  ;;  %v5281_v47 = vsub.f32 %v5195_v57, %v4939_v27 }
 0x132   :  { %v5286_v48 = vsub.f32 %v5195_v57, %v277_v28  ;;  %v5289_v49 = vsub.f32 %v5195_v57, %v357_v29 }
 0x133   :  { %464 = vmin.xlane.f32.xlu1 %v5241_v25  ;;  %432 = vmin.xlane.f32.xlu0 %v5238_v24 }
 0x134   :  { %v4918_v32 = vpop.f32.mrb[12].mxu0  ;;  %v4942_v33 = vpop.f32.mrb[12].mxu1 }
 0x135   :  { %v287_v34 = vpop.f32.mrb[13].mxu0  ;;  %v367_v35 = vpop.f32.mrb[13].mxu1  ;;  %v5294_v50 = vsub.f32 %v5195_v57, %v4918_v32  ;;  %v5297_v51 = vsub.f32 %v5195_v57, %v4942_v33 }
 0x136   :  { %v5302_v52 = vsub.f32 %v5195_v57, %v287_v34  ;;  %v5305_v53 = vsub.f32 %v5195_v57, %v367_v35  ;;  %v5434_v35 = vld [vmem:[#allocation2 + $0x90] sm:$0xff] }
 0x137   :  { %470 = vmin.xlane.f32.xlu1 %v5249_v31  ;;  %438 = vmin.xlane.f32.xlu0 %v5246_v30  ;;  %7057 = vst [vmem:[#allocation26_spill] sm:$0xff] %v5434_v35 }
 0x138   :  { %v4945_v38 = vpop.f32.mrb[14].mxu1  ;;  %v4921_v39 = vpop.f32.mrb[14].mxu0 }
 0x139   :  { %v297_v40 = vpop.f32.mrb[15].mxu0  ;;  %v377_v41 = vpop.f32.mrb[15].mxu1  ;;  %v5316_v56 = vsub.f32 %v5195_v57, %v4945_v38  ;;  %v5319_v58 = vsub.f32 %v5195_v57, %v4921_v39 }
 0x13a   :  { %v5310_v54 = vsub.f32 %v5195_v57, %v297_v40  ;;  %v5313_v55 = vsub.f32 %v5195_v57, %v377_v41 }
 0x13b   :  { %468 = vmin.xlane.f32.xlu1 %v5257_v37  ;;  %436 = vmin.xlane.f32.xlu0 %v5254_v36 }
 0x13f   :  { %474 = vmin.xlane.f32.xlu1 %v5265_v43  ;;  %442 = vmin.xlane.f32.xlu0 %v5262_v42 }
 0x143   :  { %472 = vmin.xlane.f32.xlu1 %v5273_v45  ;;  %440 = vmin.xlane.f32.xlu0 %v5270_v44 }
 0x147   :  { %478 = vmin.xlane.f32.xlu1 %v5281_v47  ;;  %446 = vmin.xlane.f32.xlu0 %v5278_v46 }
 0x14b   :  { %476 = vmin.xlane.f32.xlu1 %v5289_v49  ;;  %444 = vmin.xlane.f32.xlu0 %v5286_v48 }
 0x14f   :  { %482 = vmin.xlane.f32.xlu1 %v5297_v51  ;;  %450 = vmin.xlane.f32.xlu0 %v5294_v50 }
 0x153   :  { %480 = vmin.xlane.f32.xlu1 %v5305_v53  ;;  %448 = vmin.xlane.f32.xlu0 %v5302_v52 }
 0x157   :  { %484 = vmin.xlane.f32.xlu1 %v5313_v55  ;;  %452 = vmin.xlane.f32.xlu0 %v5310_v54 }
 0x15b   :  { %486 = vmin.xlane.f32.xlu1 %v5316_v56  ;;  %454 = vmin.xlane.f32.xlu0 %v5319_v58 }
 0x1ac   :  { %v5332_v2 = vpop.xlane.xlu1 %458  ;;  %v5334_v57 = vpop.xlane.xlu0 %426 }
 0x1ad   :  { %7047 = vst [vmem:[#allocation16_spill] sm:$0xff] %v5332_v2  ;;  %7048 = vst [vmem:[#allocation17_spill] sm:$0xff] %v5334_v57  ;;  %vm1054_vm1 = vcmp.lt.f32.partialorder %v5332_v2, %v5325_v62  ;;  %vm1038_vm2 = vcmp.lt.f32.partialorder %v5334_v57, %v5327_v63  ;;  %vm507_vm3 = vcmp.eq.f32.partialorder %v5201_v61, %v5332_v2 }
 0x1ae   :  { %vm491_vm4 = vcmp.eq.f32.partialorder %v5198_v60, %v5334_v57  ;;  %v1215_v4 = vsel %vm1054_vm1, %v5332_v2, %v5325_v62  ;;  %v1199_v5 = vsel %vm1038_vm2, %v5334_v57, %v5327_v63  ;;  %v5359_v61 = vsel %vm507_vm3, %v5330_v1, 2147483647 }
 0x1af   :  { %v5362_v60 = vsel %vm491_vm4, %v5330_v1, 2147483647  ;;  %1247 = vst.msk [vmem:[#allocation2 + $0x88] sm:$0xff] %vm47_vm0, %v1215_v4  ;;  %1231 = vst.msk [vmem:[#allocation2 + $0x8] sm:$0xff] %vm47_vm0, %v1199_v5  ;;  %v796_v10 = vshra.s32 %v5359_v61, 16 }
 0x1b0   :  { %v572_v11 = vshra.s32 %v5362_v60, 16  ;;  %v5368_v14 = vpop.xlane.xlu1 %456  ;;  %v5370_v15 = vpop.xlane.xlu0 %424 }
 0x1b1   :  { %7051 = vst [vmem:[#allocation20_spill] sm:$0xff] %v5368_v14  ;;  %7052 = vst [vmem:[#allocation21_spill] sm:$0xff] %v5370_v15  ;;  %vm1053_vm5 = vcmp.lt.f32.partialorder %v5368_v14, %v5354_v8  ;;  %vm1037_vm6 = vcmp.lt.f32.partialorder %v5370_v15, %v5356_v9  ;;  %v5376_v16 = vcvt.s32.f32 %v796_v10  ;;  %vm490_vm7 = vcmp.eq.f32.partialorder %v5209_v3, %v5370_v15 }
 0x1b2   :  { %v5378_v17 = vcvt.s32.f32 %v572_v11  ;;  %v1214_v20 = vsel %vm1053_vm5, %v5368_v14, %v5354_v8  ;;  %v1198_v21 = vsel %vm1037_vm6, %v5370_v15, %v5356_v9  ;;  %vm506_vm8 = vcmp.eq.f32.partialorder %v5206_v0, %v5368_v14 }
 0x1b3   :  { %1246 = vst.msk [vmem:[#allocation2 + $0x80] sm:$0xff] %vm47_vm0, %v1214_v20  ;;  %1230 = vst.msk [vmem:[#allocation2] sm:$0xff] %vm47_vm0, %v1198_v21  ;;  %799 = vmin.xlane.f32.xlu1 %v5376_v16  ;;  %v5403_v26 = vsel %vm490_vm7, %v5330_v1, 2147483647  ;;  %v5406_v27 = vsel %vm506_vm8, %v5330_v1, 2147483647 }
 0x1b4   :  { %575 = vmin.xlane.f32.xlu0 %v5378_v17  ;;  %v5408_v28 = vpop.xlane.xlu1 %462  ;;  %v5410_v3 = vpop.xlane.xlu0 %430  ;;  %v558_v0 = vshra.s32 %v5403_v26, 16  ;;  %v782_v29 = vshra.s32 %v5406_v27, 16  ;;  %v5473_v21 = vld [vmem:[#allocation2 + $0xa8] sm:$0xff] }
 0x1b5   :  { %7055 = vst [vmem:[#allocation24_spill] sm:$0xff] %v5408_v28  ;;  %7056 = vst [vmem:[#allocation25_spill] sm:$0xff] %v5410_v3  ;;  %vm1056_vm9 = vcmp.lt.f32.partialorder %v5408_v28, %v5390_v22  ;;  %vm1040_vm10 = vcmp.lt.f32.partialorder %v5410_v3, %v5392_v23  ;;  %vm509_vm11 = vcmp.eq.f32.partialorder %v5217_v7, %v5408_v28  ;;  %v5436_v7 = vld [vmem:[#allocation2 + $0x10] sm:$0xff] }
 0x1b6   :  { %vm493_vm12 = vcmp.eq.f32.partialorder %v5214_v6, %v5410_v3  ;;  %v1217_v32 = vsel %vm1056_vm9, %v5408_v28, %v5390_v22  ;;  %v1201_v33 = vsel %vm1040_vm10, %v5410_v3, %v5392_v23  ;;  %v5432_v34 = vcvt.s32.f32 %v558_v0  ;;  %7058 = vst [vmem:[#allocation27_spill] sm:$0xff] %v5436_v7  ;;  %7061 = vst [vmem:[#allocation30_spill] sm:$0xff] %v5473_v21  ;;  %v5475_v0 = vld [vmem:[#allocation2 + $0x28] sm:$0xff] }
 0x1b7   :  { %v5439_v6 = vsel %vm509_vm11, %v5330_v1, 2147483647  ;;  %1249 = vst.msk [vmem:[#allocation2 + $0x98] sm:$0xff] %vm47_vm0, %v1217_v32  ;;  %1233 = vst.msk [vmem:[#allocation2 + $0x18] sm:$0xff] %vm47_vm0, %v1201_v33  ;;  %v5445_v39 = vsel %vm493_vm12, %v5330_v1, 2147483647  ;;  %v5471_v20 = vcvt.s32.f32 %v782_v29 }
 0x1b8   :  { %v824_v38 = vshra.s32 %v5439_v6, 16  ;;  %561 = vmin.xlane.f32.xlu0 %v5432_v34  ;;  %v5448_v40 = vpop.xlane.xlu1 %460  ;;  %v5450_v41 = vpop.xlane.xlu0 %428  ;;  %v600_v4 = vshra.s32 %v5445_v39, 16  ;;  %7062 = vst [vmem:[#allocation31_spill] sm:$0xff] %v5475_v0 }
 0x1b9   :  { %7059 = vst [vmem:[#allocation28_spill] sm:$0xff] %v5448_v40  ;;  %7060 = vst [vmem:[#allocation29_spill] sm:$0xff] %v5450_v41  ;;  %vm1055_vm13 = vcmp.lt.f32.partialorder %v5448_v40, %v5434_v35  ;;  %vm1039_vm14 = vcmp.lt.f32.partialorder %v5450_v41, %v5436_v7  ;;  %vm508_vm15 = vcmp.eq.f32.partialorder %v5225_v13, %v5448_v40 }
 0x1ba   :  { %v5457_v5 = vcvt.s32.f32 %v824_v38  ;;  %v1216_v10 = vsel %vm1055_vm13, %v5448_v40, %v5434_v35  ;;  %v1200_v11 = vsel %vm1039_vm14, %v5450_v41, %v5436_v7  ;;  %v5478_v13 = vsel %vm508_vm15, %v5330_v1, 2147483647  ;;  %v5516_v7 = vld [vmem:[#allocation2 + $0x20] sm:$0xff] }
 0x1bb   :  { %1248 = vst.msk [vmem:[#allocation2 + $0x90] sm:$0xff] %vm47_vm0, %v1216_v10  ;;  %1232 = vst.msk [vmem:[#allocation2 + $0x10] sm:$0xff] %vm47_vm0, %v1200_v11  ;;  %v810_v32 = vshra.s32 %v5478_v13, 16  ;;  %vm492_vm3 = vcmp.eq.f32.partialorder %v5222_v12, %v5450_v41  ;;  %v5491_v38 = vcvt.s32.f32 %v600_v4  ;;  %v5514_v11 = vld [vmem:[#allocation2 + $0xa0] sm:$0xff] }
 0x1bc   :  { %827 = vmin.xlane.f32.xlu1 %v5457_v5  ;;  %785 = vmin.xlane.f32.xlu0 %v5471_v20  ;;  %v5487_v29 = vpop.xlane.xlu1 %466  ;;  %v5489_v33 = vpop.xlane.xlu0 %434  ;;  %v5494_v59 = vsel %vm492_vm3, %v5330_v1, 2147483647  ;;  %7065 = vst [vmem:[#allocation34_spill] sm:$0xff] %v5514_v11  ;;  %7066 = vst [vmem:[#allocation35_spill] sm:$0xff] %v5516_v7 }
 0x1bd   :  { %7063 = vst [vmem:[#allocation32_spill] sm:$0xff] %v5487_v29  ;;  %7064 = vst [vmem:[#allocation33_spill] sm:$0xff] %v5489_v33  ;;  %vm1058_vm4 = vcmp.lt.f32.partialorder %v5487_v29, %v5473_v21  ;;  %vm1042_vm7 = vcmp.lt.f32.partialorder %v5489_v33, %v5475_v0  ;;  %v5500_v10 = vcvt.s32.f32 %v810_v32  ;;  %vm511_vm8 = vcmp.eq.f32.partialorder %v5233_v19, %v5487_v29 }
 0x1be   :  { %v1219_v12 = vsel %vm1058_vm4, %v5487_v29, %v5473_v21  ;;  %v1203_v4 = vsel %vm1042_vm7, %v5489_v33, %v5475_v0  ;;  %v5519_v32 = vsel %vm511_vm8, %v5330_v1, 2147483647  ;;  %v586_v19 = vshra.s32 %v5494_v59, 16 }
 0x1bf   :  { %1251 = vst.msk [vmem:[#allocation2 + $0xa8] sm:$0xff] %vm47_vm0, %v1219_v12  ;;  %1235 = vst.msk [vmem:[#allocation2 + $0x28] sm:$0xff] %vm47_vm0, %v1203_v4  ;;  %v852_v21 = vshra.s32 %v5519_v32, 16  ;;  %vm495_vm11 = vcmp.eq.f32.partialorder %v5230_v18, %v5489_v33  ;;  %v5558_v33 = vld [vmem:[#allocation2 + $0x38] sm:$0xff] }
 0x1c0   :  { %813 = vmin.xlane.f32.xlu1 %v5500_v10  ;;  %603 = vmin.xlane.f32.xlu0 %v5491_v38  ;;  %v5529_v29 = vpop.xlane.xlu1 %464  ;;  %v5531_v0 = vpop.xlane.xlu0 %432  ;;  %v5533_v41 = vcvt.s32.f32 %v586_v19  ;;  %v5536_v35 = vsel %vm495_vm11, %v5330_v1, 2147483647  ;;  %v5556_v19 = vld [vmem:[#allocation2 + $0xb8] sm:$0xff]  ;;  %7070 = vst [vmem:[#allocation39_spill] sm:$0xff] %v5558_v33 }
 0x1c1   :  { %7067 = vst [vmem:[#allocation36_spill] sm:$0xff] %v5529_v29  ;;  %7068 = vst [vmem:[#allocation37_spill] sm:$0xff] %v5531_v0  ;;  %vm1057_vm12 = vcmp.lt.f32.partialorder %v5529_v29, %v5514_v11  ;;  %vm6959_vm15 = vcmp.lt.f32.partialorder %v5531_v0, %v5516_v7  ;;  %v5542_v12 = vcvt.s32.f32 %v852_v21  ;;  %vm510_vm3 = vcmp.eq.f32.partialorder %v5241_v25, %v5529_v29 }
 0x1c2   :  { %v1218_v18 = vsel %vm1057_vm12, %v5529_v29, %v5514_v11  ;;  %v1202_v4 = vsel %vm6959_vm15, %v5531_v0, %v5516_v7  ;;  %7069 = vst [vmem:[#allocation38_spill] sm:$0xff] %v5556_v19  ;;  %v5561_v21 = vsel %vm510_vm3, %v5330_v1, 2147483647  ;;  %v628_v25 = vshra.s32 %v5536_v35, 16 }
 0x1c3   :  { %1250 = vst.msk [vmem:[#allocation2 + $0xa0] sm:$0xff] %vm47_vm0, %v1218_v18  ;;  %1234 = vst.msk [vmem:[#allocation2 + $0x20] sm:$0xff] %vm47_vm0, %v1202_v4  ;;  %v838_v11 = vshra.s32 %v5561_v21, 16  ;;  %vm494_vm8 = vcmp.eq.f32.partialorder %v5238_v24, %v5531_v0  ;;  %v5600_v0 = vld [vmem:[#allocation2 + $0x30] sm:$0xff] }
 0x1c4   :  { %855 = vmin.xlane.f32.xlu1 %v5542_v12  ;;  %589 = vmin.xlane.f32.xlu0 %v5533_v41  ;;  %v5571_v7 = vpop.xlane.xlu1 %470  ;;  %v5573_v29 = vpop.xlane.xlu0 %438  ;;  %v5575_v40 = vcvt.s32.f32 %v628_v25  ;;  %v5578_v23 = vsel %vm494_vm8, %v5330_v1, 2147483647  ;;  %v5598_v25 = vld [vmem:[#allocation2 + $0xb0] sm:$0xff]  ;;  %7074 = vst [vmem:[#allocation43_spill] sm:$0xff] %v5600_v0 }
 0x1c5   :  { %7071 = vst [vmem:[#allocation40_spill] sm:$0xff] %v5571_v7  ;;  %7072 = vst [vmem:[#allocation41_spill] sm:$0xff] %v5573_v29  ;;  %vm6966_vm11 = vcmp.lt.f32.partialorder %v5571_v7, %v5556_v19  ;;  %vm6967_vm3 = vcmp.lt.f32.partialorder %v5573_v29, %v5558_v33  ;;  %v5584_v18 = vcvt.s32.f32 %v838_v11  ;;  %vm513_vm15 = vcmp.eq.f32.partialorder %v5249_v31, %v5571_v7 }
 0x1c6   :  { %v1221_v24 = vsel %vm6966_vm11, %v5571_v7, %v5556_v19  ;;  %v1205_v4 = vsel %vm6967_vm3, %v5573_v29, %v5558_v33  ;;  %7073 = vst [vmem:[#allocation42_spill] sm:$0xff] %v5598_v25  ;;  %v5603_v11 = vsel %vm513_vm15, %v5330_v1, 2147483647  ;;  %v614_v31 = vshra.s32 %v5578_v23, 16 }
 0x1c7   :  { %1253 = vst.msk [vmem:[#allocation2 + $0xb8] sm:$0xff] %vm47_vm0, %v1221_v24  ;;  %1237 = vst.msk [vmem:[#allocation2 + $0x38] sm:$0xff] %vm47_vm0, %v1205_v4  ;;  %v880_v19 = vshra.s32 %v5603_v11, 16  ;;  %vm497_vm8 = vcmp.eq.f32.partialorder %v5246_v30, %v5573_v29  ;;  %v5642_v29 = vld [vmem:[#allocation2 + $0x48] sm:$0xff] }
 0x1c8   :  { %841 = vmin.xlane.f32.xlu1 %v5584_v18  ;;  %631 = vmin.xlane.f32.xlu0 %v5575_v40  ;;  %v5613_v7 = vpop.xlane.xlu1 %468  ;;  %v5615_v33 = vpop.xlane.xlu0 %436  ;;  %v5617_v3 = vcvt.s32.f32 %v614_v31  ;;  %v5620_v8 = vsel %vm497_vm8, %v5330_v1, 2147483647  ;;  %v5640_v31 = vld [vmem:[#allocation2 + $0xc8] sm:$0xff]  ;;  %7078 = vst [vmem:[#allocation47_spill] sm:$0xff] %v5642_v29 }
 0x1c9   :  { %7075 = vst [vmem:[#allocation44_spill] sm:$0xff] %v5613_v7  ;;  %7076 = vst [vmem:[#allocation45_spill] sm:$0xff] %v5615_v33  ;;  %vm6975_vm15 = vcmp.lt.f32.partialorder %v5613_v7, %v5598_v25  ;;  %vm6974_vm11 = vcmp.lt.f32.partialorder %v5615_v33, %v5600_v0  ;;  %v5626_v24 = vcvt.s32.f32 %v880_v19  ;;  %vm512_vm3 = vcmp.eq.f32.partialorder %v5257_v37, %v5613_v7 }
 0x1ca   :  { %v1220_v30 = vsel %vm6975_vm15, %v5613_v7, %v5598_v25  ;;  %v1204_v4 = vsel %vm6974_vm11, %v5615_v33, %v5600_v0  ;;  %7077 = vst [vmem:[#allocation46_spill] sm:$0xff] %v5640_v31  ;;  %v5645_v19 = vsel %vm512_vm3, %v5330_v1, 2147483647  ;;  %v656_v37 = vshra.s32 %v5620_v8, 16 }
 0x1cb   :  { %1252 = vst.msk [vmem:[#allocation2 + $0xb0] sm:$0xff] %vm47_vm0, %v1220_v30  ;;  %1236 = vst.msk [vmem:[#allocation2 + $0x30] sm:$0xff] %vm47_vm0, %v1204_v4  ;;  %v866_v25 = vshra.s32 %v5645_v19, 16  ;;  %vm496_vm8 = vcmp.eq.f32.partialorder %v5254_v36, %v5615_v33  ;;  %v5684_v33 = vld [vmem:[#allocation2 + $0x40] sm:$0xff] }
 0x1cc   :  { %883 = vmin.xlane.f32.xlu1 %v5626_v24  ;;  %617 = vmin.xlane.f32.xlu0 %v5617_v3  ;;  %v5655_v0 = vpop.xlane.xlu1 %474  ;;  %v5657_v7 = vpop.xlane.xlu0 %442  ;;  %v5659_v14 = vcvt.s32.f32 %v656_v37  ;;  %v5662_v22 = vsel %vm496_vm8, %v5330_v1, 2147483647  ;;  %v5682_v37 = vld [vmem:[#allocation2 + $0xc0] sm:$0xff]  ;;  %7082 = vst [vmem:[#allocation51_spill] sm:$0xff] %v5684_v33 }
 0x1cd   :  { %7079 = vst [vmem:[#allocation48_spill] sm:$0xff] %v5655_v0  ;;  %7080 = vst [vmem:[#allocation49_spill] sm:$0xff] %v5657_v7  ;;  %vm6983_vm3 = vcmp.lt.f32.partialorder %v5655_v0, %v5640_v31  ;;  %vm6982_vm11 = vcmp.lt.f32.partialorder %v5657_v7, %v5642_v29  ;;  %v5668_v30 = vcvt.s32.f32 %v866_v25  ;;  %vm515_vm15 = vcmp.eq.f32.partialorder %v5265_v43, %v5655_v0 }
 0x1ce   :  { %v1223_v36 = vsel %vm6983_vm3, %v5655_v0, %v5640_v31  ;;  %v1207_v4 = vsel %vm6982_vm11, %v5657_v7, %v5642_v29  ;;  %7081 = vst [vmem:[#allocation50_spill] sm:$0xff] %v5682_v37  ;;  %v5687_v25 = vsel %vm515_vm15, %v5330_v1, 2147483647  ;;  %v642_v43 = vshra.s32 %v5662_v22, 16 }
 0x1cf   :  { %1255 = vst.msk [vmem:[#allocation2 + $0xc8] sm:$0xff] %vm47_vm0, %v1223_v36  ;;  %1239 = vst.msk [vmem:[#allocation2 + $0x48] sm:$0xff] %vm47_vm0, %v1207_v4  ;;  %v908_v31 = vshra.s32 %v5687_v25, 16  ;;  %vm499_vm8 = vcmp.eq.f32.partialorder %v5262_v42, %v5657_v7  ;;  %v5726_v7 = vld [vmem:[#allocation2 + $0x58] sm:$0xff] }
 0x1d0   :  { %869 = vmin.xlane.f32.xlu1 %v5668_v30  ;;  %659 = vmin.xlane.f32.xlu0 %v5659_v14  ;;  %v5697_v29 = vpop.xlane.xlu1 %472  ;;  %v5699_v0 = vpop.xlane.xlu0 %440  ;;  %v5701_v28 = vcvt.s32.f32 %v642_v43  ;;  %v5704_v9 = vsel %vm499_vm8, %v5330_v1, 2147483647  ;;  %v5724_v43 = vld [vmem:[#allocation2 + $0xd8] sm:$0xff]  ;;  %7086 = vst [vmem:[#allocation55_spill] sm:$0xff] %v5726_v7 }
 0x1d1   :  { %7083 = vst [vmem:[#allocation52_spill] sm:$0xff] %v5697_v29  ;;  %7084 = vst [vmem:[#allocation53_spill] sm:$0xff] %v5699_v0  ;;  %vm6991_vm15 = vcmp.lt.f32.partialorder %v5697_v29, %v5682_v37  ;;  %vm6990_vm11 = vcmp.lt.f32.partialorder %v5699_v0, %v5684_v33  ;;  %v5710_v36 = vcvt.s32.f32 %v908_v31  ;;  %vm514_vm3 = vcmp.eq.f32.partialorder %v5273_v45, %v5697_v29 }
 0x1d2   :  { %v1222_v42 = vsel %vm6991_vm15, %v5697_v29, %v5682_v37  ;;  %v1206_v4 = vsel %vm6990_vm11, %v5699_v0, %v5684_v33  ;;  %7085 = vst [vmem:[#allocation54_spill] sm:$0xff] %v5724_v43  ;;  %v5729_v31 = vsel %vm514_vm3, %v5330_v1, 2147483647  ;;  %v684_v45 = vshra.s32 %v5704_v9, 16 }
 0x1d3   :  { %1254 = vst.msk [vmem:[#allocation2 + $0xc0] sm:$0xff] %vm47_vm0, %v1222_v42  ;;  %1238 = vst.msk [vmem:[#allocation2 + $0x40] sm:$0xff] %vm47_vm0, %v1206_v4  ;;  %v894_v37 = vshra.s32 %v5729_v31, 16  ;;  %vm498_vm8 = vcmp.eq.f32.partialorder %v5270_v44, %v5699_v0  ;;  %v5768_v0 = vld [vmem:[#allocation2 + $0x50] sm:$0xff] }
 0x1d4   :  { %911 = vmin.xlane.f32.xlu1 %v5710_v36  ;;  %645 = vmin.xlane.f32.xlu0 %v5701_v28  ;;  %v5739_v33 = vpop.xlane.xlu1 %478  ;;  %v5741_v29 = vpop.xlane.xlu0 %446  ;;  %v5743_v15 = vcvt.s32.f32 %v684_v45  ;;  %v5746_v62 = vsel %vm498_vm8, %v5330_v1, 2147483647  ;;  %v5766_v45 = vld [vmem:[#allocation2 + $0xd0] sm:$0xff]  ;;  %7090 = vst [vmem:[#allocation59_spill] sm:$0xff] %v5768_v0 }
 0x1d5   :  { %7087 = vst [vmem:[#allocation56_spill] sm:$0xff] %v5739_v33  ;;  %7088 = vst [vmem:[#allocation57_spill] sm:$0xff] %v5741_v29  ;;  %vm6999_vm3 = vcmp.lt.f32.partialorder %v5739_v33, %v5724_v43  ;;  %vm6998_vm11 = vcmp.lt.f32.partialorder %v5741_v29, %v5726_v7  ;;  %v5752_v42 = vcvt.s32.f32 %v894_v37  ;;  %vm517_vm15 = vcmp.eq.f32.partialorder %v5281_v47, %v5739_v33 }
 0x1d6   :  { %v1225_v44 = vsel %vm6999_vm3, %v5739_v33, %v5724_v43  ;;  %v1209_v4 = vsel %vm6998_vm11, %v5741_v29, %v5726_v7  ;;  %7089 = vst [vmem:[#allocation58_spill] sm:$0xff] %v5766_v45  ;;  %v5771_v37 = vsel %vm517_vm15, %v5330_v1, 2147483647  ;;  %v670_v47 = vshra.s32 %v5746_v62, 16 }
 0x1d7   :  { %1257 = vst.msk [vmem:[#allocation2 + $0xd8] sm:$0xff] %vm47_vm0, %v1225_v44  ;;  %1241 = vst.msk [vmem:[#allocation2 + $0x58] sm:$0xff] %vm47_vm0, %v1209_v4  ;;  %v936_v43 = vshra.s32 %v5771_v37, 16  ;;  %vm501_vm8 = vcmp.eq.f32.partialorder %v5278_v46, %v5741_v29  ;;  %v5810_v29 = vld [vmem:[#allocation2 + $0x68] sm:$0xff] }
 0x1d8   :  { %897 = vmin.xlane.f32.xlu1 %v5752_v42  ;;  %687 = vmin.xlane.f32.xlu0 %v5743_v15  ;;  %v5781_v7 = vpop.xlane.xlu1 %476  ;;  %v5783_v33 = vpop.xlane.xlu0 %444  ;;  %v5785_v2 = vcvt.s32.f32 %v670_v47  ;;  %v5788_v63 = vsel %vm501_vm8, %v5330_v1, 2147483647  ;;  %v5808_v47 = vld [vmem:[#allocation2 + $0xe8] sm:$0xff]  ;;  %7095 = vst [vmem:[#allocation64_spill] sm:$0xff] %v5810_v29 }
 0x1d9   :  { %7091 = vst [vmem:[#allocation60_spill] sm:$0xff] %v5781_v7  ;;  %7092 = vst [vmem:[#allocation61_spill] sm:$0xff] %v5783_v33  ;;  %vm7007_vm15 = vcmp.lt.f32.partialorder %v5781_v7, %v5766_v45  ;;  %vm7006_vm11 = vcmp.lt.f32.partialorder %v5783_v33, %v5768_v0  ;;  %v5794_v44 = vcvt.s32.f32 %v936_v43  ;;  %vm516_vm3 = vcmp.eq.f32.partialorder %v5289_v49, %v5781_v7 }
 0x1da   :  { %7093 = vst [vmem:[#allocation62_spill] sm:$0xff] %v5788_v63  ;;  %v1224_v46 = vsel %vm7007_vm15, %v5781_v7, %v5766_v45  ;;  %v1208_v4 = vsel %vm7006_vm11, %v5783_v33, %v5768_v0  ;;  %7094 = vst [vmem:[#allocation63_spill] sm:$0xff] %v5808_v47  ;;  %v5813_v43 = vsel %vm516_vm3, %v5330_v1, 2147483647  ;;  %v712_v49 = vshra.s32 %v5788_v63, 16 }
 0x1db   :  { %1256 = vst.msk [vmem:[#allocation2 + $0xd0] sm:$0xff] %vm47_vm0, %v1224_v46  ;;  %1240 = vst.msk [vmem:[#allocation2 + $0x50] sm:$0xff] %vm47_vm0, %v1208_v4  ;;  %v922_v45 = vshra.s32 %v5813_v43, 16  ;;  %vm500_vm8 = vcmp.eq.f32.partialorder %v5286_v48, %v5783_v33 }
 0x1dc   :  { %939 = vmin.xlane.f32.xlu1 %v5794_v44  ;;  %673 = vmin.xlane.f32.xlu0 %v5785_v2  ;;  %v5823_v0 = vpop.xlane.xlu1 %482  ;;  %v5825_v7 = vpop.xlane.xlu0 %450  ;;  %v5827_v57 = vcvt.s32.f32 %v712_v49  ;;  %v5830_v63 = vsel %vm500_vm8, %v5330_v1, 2147483647  ;;  %v5850_v49 = vld [vmem:[#allocation2 + $0xe0] sm:$0xff] }
 0x1dd   :  { %7096 = vst [vmem:[#allocation65_spill] sm:$0xff] %v5823_v0  ;;  %7097 = vst [vmem:[#allocation66_spill] sm:$0xff] %v5825_v7  ;;  %vm7014_vm3 = vcmp.lt.f32.partialorder %v5823_v0, %v5808_v47  ;;  %vm503_vm11 = vcmp.eq.f32.partialorder %v5294_v50, %v5825_v7  ;;  %vm7013_vm15 = vcmp.lt.f32.partialorder %v5825_v7, %v5810_v29  ;;  %v5838_v48 = vcvt.s32.f32 %v922_v45  ;;  %v5852_v50 = vld [vmem:[#allocation2 + $0x60] sm:$0xff] }
 0x1de   :  { %v1227_v46 = vsel %vm7014_vm3, %v5823_v0, %v5808_v47  ;;  %v1211_v4 = vsel %vm7013_vm15, %v5825_v7, %v5810_v29  ;;  %7098 = vst [vmem:[#allocation67_spill] sm:$0xff] %v5850_v49  ;;  %7099 = vst [vmem:[#allocation68_spill] sm:$0xff] %v5852_v50  ;;  %vm519_vm8 = vcmp.eq.f32.partialorder %v5297_v51, %v5823_v0  ;;  %v698_v45 = vshra.s32 %v5830_v63, 16 }
 0x1df   :  { %1259 = vst.msk [vmem:[#allocation2 + $0xe8] sm:$0xff] %vm47_vm0, %v1227_v46  ;;  %1243 = vst.msk [vmem:[#allocation2 + $0x68] sm:$0xff] %vm47_vm0, %v1211_v4  ;;  %v5861_v47 = vsel %vm519_vm8, %v5330_v1, 2147483647  ;;  %v5864_v29 = vsel %vm503_vm11, %v5330_v1, 2147483647 }
 0x1e0   :  { %925 = vmin.xlane.f32.xlu1 %v5838_v48  ;;  %7100 = vst [vmem:[#allocation69_spill] sm:$0xff] %v5861_v47  ;;  %7101 = vst [vmem:[#allocation70_spill] sm:$0xff] %v5864_v29  ;;  %715 = vmin.xlane.f32.xlu0 %v5827_v57  ;;  %v5867_v7 = vpop.xlane.xlu1 %480  ;;  %v5869_v33 = vpop.xlane.xlu0 %448  ;;  %v964_v51 = vshra.s32 %v5861_v47, 16  ;;  %v5872_v0 = vcvt.s32.f32 %v698_v45  ;;  %v740_v46 = vshra.s32 %v5864_v29, 16  ;;  %v5897_v47 = vld [vmem:[#allocation2 + $0x70] sm:$0xff] }
 0x1e1   :  { %7102 = vst [vmem:[#allocation71_spill] sm:$0xff] %v5867_v7  ;;  %7103 = vst [vmem:[#allocation72_spill] sm:$0xff] %v5869_v33  ;;  %vm7025_vm15 = vcmp.lt.f32.partialorder %v5867_v7, %v5850_v49  ;;  %vm502_vm8 = vcmp.eq.f32.partialorder %v5302_v52, %v5869_v33  ;;  %vm7021_vm11 = vcmp.lt.f32.partialorder %v5869_v33, %v5852_v50  ;;  %v5895_v52 = vld [vmem:[#allocation2 + $0xf0] sm:$0xff] }
 0x1e2   :  { %vm518_vm3 = vcmp.eq.f32.partialorder %v5305_v53, %v5867_v7  ;;  %v1226_v4 = vsel %vm7025_vm15, %v5867_v7, %v5850_v49  ;;  %v1210_v45 = vsel %vm7021_vm11, %v5869_v33, %v5852_v50  ;;  %v5893_v29 = vcvt.s32.f32 %v964_v51  ;;  %7105 = vst [vmem:[#allocation74_spill] sm:$0xff] %v5895_v52  ;;  %7106 = vst [vmem:[#allocation75_spill] sm:$0xff] %v5897_v47 }
 0x1e3   :  { %v5900_v53 = vsel %vm518_vm3, %v5330_v1, 2147483647  ;;  %1258 = vst.msk [vmem:[#allocation2 + $0xe0] sm:$0xff] %vm47_vm0, %v1226_v4  ;;  %1242 = vst.msk [vmem:[#allocation2 + $0x60] sm:$0xff] %vm47_vm0, %v1210_v45  ;;  %v5906_v7 = vsel %vm502_vm8, %v5330_v1, 2147483647 }
 0x1e4   :  { %7104 = vst [vmem:[#allocation73_spill] sm:$0xff] %v5893_v29  ;;  %7107 = vst [vmem:[#allocation76_spill] sm:$0xff] %v5900_v53  ;;  %v950_v49 = vshra.s32 %v5900_v53, 16  ;;  %967 = vmin.xlane.f32.xlu1 %v5893_v29  ;;  %701 = vmin.xlane.f32.xlu0 %v5872_v0  ;;  %v5910_v51 = vpop.xlane.xlu1 %484  ;;  %v5912_v50 = vpop.xlane.xlu0 %452  ;;  %v726_v33 = vshra.s32 %v5906_v7, 16  ;;  %v5933_v53 = vcvt.s32.f32 %v740_v46  ;;  %v5937_v29 = vld [vmem:[#allocation2 + $0x78] sm:$0xff] }
 0x1e5   :  { %7108 = vst [vmem:[#allocation77_spill] sm:$0xff] %v5906_v7  ;;  %7109 = vst [vmem:[#allocation78_spill] sm:$0xff] %v5910_v51  ;;  %vm7029_vm3 = vcmp.lt.f32.partialorder %v5910_v51, %v5895_v52  ;;  %vm504_vm11 = vcmp.eq.f32.partialorder %v5310_v54, %v5912_v50  ;;  %vm7030_vm8 = vcmp.lt.f32.partialorder %v5912_v50, %v5897_v47  ;;  %v5935_v54 = vld [vmem:[#allocation2 + $0xf8] sm:$0xff] }
 0x1e6   :  { %7110 = vst [vmem:[#allocation79_spill] sm:$0xff] %v5912_v50  ;;  %v5921_v4 = vcvt.s32.f32 %v950_v49  ;;  %v1228_v45 = vsel %vm7029_vm3, %v5910_v51, %v5895_v52  ;;  %v1212_v7 = vsel %vm7030_vm8, %v5912_v50, %v5897_v47  ;;  %7111 = vst [vmem:[#allocation80_spill] sm:$0xff] %v5935_v54  ;;  %vm520_vm15 = vcmp.eq.f32.partialorder %v5313_v55, %v5910_v51 }
 0x1e7   :  { %7112 = vst [vmem:[#allocation81_spill] sm:$0xff] %v5937_v29  ;;  %1260 = vst.msk [vmem:[#allocation2 + $0xf0] sm:$0xff] %vm47_vm0, %v1228_v45  ;;  %v5944_v49 = vsel %vm520_vm15, %v5330_v1, 2147483647  ;;  %v5947_v52 = vsel %vm504_vm11, %v5330_v1, 2147483647  ;;  %v5956_v51 = vcvt.s32.f32 %v726_v33 }
 0x1e8   :  { %1244 = vst.msk [vmem:[#allocation2 + $0x70] sm:$0xff] %vm47_vm0, %v1212_v7  ;;  %7113 = vst [vmem:[#allocation82_spill] sm:$0xff] %v5944_v49  ;;  %953 = vmin.xlane.f32.xlu1 %v5921_v4  ;;  %743 = vmin.xlane.f32.xlu0 %v5933_v53  ;;  %v5951_v46 = vpop.xlane.xlu1 %486  ;;  %v5953_v47 = vpop.xlane.xlu0 %454  ;;  %v978_v55 = vshra.s32 %v5944_v49, 16  ;;  %v754_v7 = vshra.s32 %v5947_v52, 16 }
 0x1e9   :  { %7114 = vst [vmem:[#allocation83_spill] sm:$0xff] %v5951_v46  ;;  %7115 = vst [vmem:[#allocation84_spill] sm:$0xff] %v5953_v47  ;;  %vm7043_vm15 = vcmp.lt.f32.partialorder %v5951_v46, %v5935_v54  ;;  %vm505_vm11 = vcmp.eq.f32.partialorder %v5319_v58, %v5953_v47  ;;  %vm7042_vm3 = vcmp.lt.f32.partialorder %v5953_v47, %v5937_v29 }
 0x1ea   :  { %vm521_vm8 = vcmp.eq.f32.partialorder %v5316_v56, %v5951_v46  ;;  %v1229_v33 = vsel %vm7043_vm15, %v5951_v46, %v5935_v54  ;;  %v1213_v45 = vsel %vm7042_vm3, %v5953_v47, %v5937_v29  ;;  %v5977_v50 = vcvt.s32.f32 %v978_v55 }
 0x1eb   :  { %v5980_v58 = vsel %vm521_vm8, %v5330_v1, 2147483647  ;;  %1261 = vst.msk [vmem:[#allocation2 + $0xf8] sm:$0xff] %vm47_vm0, %v1229_v33  ;;  %1245 = vst.msk [vmem:[#allocation2 + $0x78] sm:$0xff] %vm47_vm0, %v1213_v45  ;;  %v5986_v49 = vsel %vm505_vm11, %v5330_v1, 2147483647  ;;  %v5992_v55 = vcvt.s32.f32 %v754_v7 }
 0x1ec   :  { %7116 = vst [vmem:[#allocation85_spill] sm:$0xff] %v5977_v50  ;;  %v992_v56 = vshra.s32 %v5980_v58, 16  ;;  %981 = vmin.xlane.f32.xlu1 %v5977_v50  ;;  %729 = vmin.xlane.f32.xlu0 %v5956_v51  ;;  %v768_v29 = vshra.s32 %v5986_v49, 16  ;;  %v5113_v45 = vmov 0   ;;  %v571_v7 = vand.u32 65535, %v5362_v60 }
 0x1ed   :  { %7117 = vst [vmem:[#allocation86_spill] sm:$0xff] %v5992_v55  ;;  %81 = vst.msk [vmem:[#allocation3 + $0x8] sm:$0xff] %vm47_vm0, %v5113_v45  ;;  %5003 = vset.pattern.permute.xlu0 %v5113_v45  ;;  %5002 = vset.pattern.permute.xlu1 %v5113_v45 }
 0x1ee   :  { %v5990_v54 = vcvt.s32.f32 %v992_v56  ;;  %v5997_v33 = vcvt.s32.f32 %v768_v29  ;;  %80 = vst.msk [vmem:[#allocation3] sm:$0xff] %vm47_vm0, %v5113_v45  ;;  %82 = vst.msk [vmem:[#allocation3 + $0x10] sm:$0xff] %vm47_vm0, %v5113_v45  ;;  %v795_v29 = vand.u32 65535, %v5359_v61  ;;  %v573_v46 = vcvt.s32.f32 %v571_v7 }
 0x1ef   :  { %83 = vst.msk [vmem:[#allocation3 + $0x18] sm:$0xff] %vm47_vm0, %v5113_v45  ;;  %84 = vst.msk [vmem:[#allocation3 + $0x20] sm:$0xff] %vm47_vm0, %v5113_v45  ;;  %v823_v61 = vand.u32 65535, %v5439_v6  ;;  %v599_v6 = vand.u32 65535, %v5445_v39 }
 0x1f0   :  { %995 = vmin.xlane.f32.xlu1 %v5990_v54  ;;  %757 = vmin.xlane.f32.xlu0 %v5992_v55  ;;  %7118 = vst [vmem:[#allocation87_spill] sm:$0xff] %v5997_v33  ;;  %85 = vst.msk [vmem:[#allocation3 + $0x28] sm:$0xff] %vm47_vm0, %v5113_v45  ;;  %v797_v47 = vcvt.s32.f32 %v795_v29  ;;  %v781_v29 = vand.u32 65535, %v5406_v27 }
 0x1f1   :  { %86 = vst.msk [vmem:[#allocation3 + $0x30] sm:$0xff] %vm47_vm0, %v5113_v45  ;;  %87 = vst.msk [vmem:[#allocation3 + $0x38] sm:$0xff] %vm47_vm0, %v5113_v45 }
 0x1f2   :  { %88 = vst.msk [vmem:[#allocation3 + $0x40] sm:$0xff] %vm47_vm0, %v5113_v45  ;;  %89 = vst.msk [vmem:[#allocation3 + $0x48] sm:$0xff] %vm47_vm0, %v5113_v45 }
 0x1f3   :  { %90 = vst.msk [vmem:[#allocation3 + $0x50] sm:$0xff] %vm47_vm0, %v5113_v45  ;;  %91 = vst.msk [vmem:[#allocation3 + $0x58] sm:$0xff] %vm47_vm0, %v5113_v45 }
 0x1f4   :  { %771 = vmin.xlane.f32.xlu0 %v5997_v33  ;;  %92 = vst.msk [vmem:[#allocation3 + $0x60] sm:$0xff] %vm47_vm0, %v5113_v45  ;;  %93 = vst.msk [vmem:[#allocation3 + $0x68] sm:$0xff] %vm47_vm0, %v5113_v45  ;;  %v557_v33 = vand.u32 65535, %v5403_v26 }
 0x1f5   :  { %94 = vst.msk [vmem:[#allocation3 + $0x70] sm:$0xff] %vm47_vm0, %v5113_v45  ;;  %95 = vst.msk [vmem:[#allocation3 + $0x78] sm:$0xff] %vm47_vm0, %v5113_v45 }
 0x1f6   :  { %96 = vst.msk [vmem:[#allocation3 + $0x80] sm:$0xff] %vm47_vm0, %v5113_v45  ;;  %97 = vst.msk [vmem:[#allocation3 + $0x88] sm:$0xff] %vm47_vm0, %v5113_v45  ;;  %v559_v55 = vcvt.s32.f32 %v557_v33  ;;  %v809_v33 = vand.u32 65535, %v5478_v13  ;;  %v627_v13 = vand.u32 65535, %v5536_v35  ;;  %v613_v35 = vand.u32 65535, %v5578_v23 }
 0x1f7   :  { %98 = vst.msk [vmem:[#allocation3 + $0x90] sm:$0xff] %vm47_vm0, %v5113_v45  ;;  %99 = vst.msk [vmem:[#allocation3 + $0x98] sm:$0xff] %vm47_vm0, %v5113_v45  ;;  %v655_v23 = vand.u32 65535, %v5620_v8  ;;  %v641_v8 = vand.u32 65535, %v5662_v22  ;;  %v683_v22 = vand.u32 65535, %v5704_v9  ;;  %v669_v9 = vand.u32 65535, %v5746_v62 }
 0x1f8   :  { %100 = vst.msk [vmem:[#allocation3 + $0xa0] sm:$0xff] %vm47_vm0, %v5113_v45  ;;  %101 = vst.msk [vmem:[#allocation3 + $0xa8] sm:$0xff] %vm47_vm0, %v5113_v45 }
 0x1f9   :  { %102 = vst.msk [vmem:[#allocation3 + $0xb0] sm:$0xff] %vm47_vm0, %v5113_v45  ;;  %103 = vst.msk [vmem:[#allocation3 + $0xb8] sm:$0xff] %vm47_vm0, %v5113_v45 }
 0x1fa   :  { %104 = vst.msk [vmem:[#allocation3 + $0xc0] sm:$0xff] %vm47_vm0, %v5113_v45  ;;  %105 = vst.msk [vmem:[#allocation3 + $0xc8] sm:$0xff] %vm47_vm0, %v5113_v45 }
 0x1fb   :  { %106 = vst.msk [vmem:[#allocation3 + $0xd0] sm:$0xff] %vm47_vm0, %v5113_v45  ;;  %107 = vst.msk [vmem:[#allocation3 + $0xd8] sm:$0xff] %vm47_vm0, %v5113_v45 }
 0x1fc   :  { %108 = vst.msk [vmem:[#allocation3 + $0xe0] sm:$0xff] %vm47_vm0, %v5113_v45  ;;  %109 = vst.msk [vmem:[#allocation3 + $0xe8] sm:$0xff] %vm47_vm0, %v5113_v45 }
 0x1fd   :  { %110 = vst.msk [vmem:[#allocation3 + $0xf0] sm:$0xff] %vm47_vm0, %v5113_v45  ;;  %111 = vst.msk [vmem:[#allocation3 + $0xf8] sm:$0xff] %vm47_vm0, %v5113_v45 }
 0x240   :  { %v6034_v56 = vpop.xlane.xlu1 %799 }
 0x241   :  { %v6036_v1 = vpop.xlane.xlu0 %575  ;;  %vm801_vm8 = vcmp.eq.f32.partialorder %v5376_v16, %v6034_v56 }
 0x242   :  { %vm577_vm11 = vcmp.eq.f32.partialorder %v5378_v17, %v6036_v1  ;;  %v802_v50 = vsel %vm801_vm8, %v797_v47, inf  ;;  %v825_v17 = vcvt.s32.f32 %v823_v61  ;;  %v783_v47 = vcvt.s32.f32 %v781_v29 }
 0x243   :  { %v578_v45 = vsel %vm577_vm11, %v573_v46, inf  ;;  %803 = vmin.xlane.f32.xlu0 %v802_v50  ;;  %v811_v61 = vcvt.s32.f32 %v809_v33  ;;  %v615_v33 = vcvt.s32.f32 %v613_v35  ;;  %v685_v35 = vcvt.s32.f32 %v683_v22  ;;  %v7122_v22 = vld [vmem:[#allocation73_spill] sm:$0xff] }
 0x244   :  { %579 = vmin.xlane.f32.xlu1 %v578_v45  ;;  %v585_v45 = vand.u32 65535, %v5494_v59 }
 0x245   :  { %v6044_v60 = vpop.xlane.xlu0 %561 }
 0x246   :  { %vm563_vm3 = vcmp.eq.f32.partialorder %v5432_v34, %v6044_v60  ;;  %v587_v29 = vcvt.s32.f32 %v585_v45 }
 0x247   :  { %v564_v16 = vsel %vm563_vm3, %v559_v55, inf  ;;  %v601_v55 = vcvt.s32.f32 %v599_v6  ;;  %v629_v6 = vcvt.s32.f32 %v627_v13 }
 0x248   :  { %565 = vmin.xlane.f32.xlu1 %v564_v16  ;;  %v851_v16 = vand.u32 65535, %v5519_v32  ;;  %v837_v32 = vand.u32 65535, %v5561_v21  ;;  %v879_v21 = vand.u32 65535, %v5603_v11  ;;  %v865_v11 = vand.u32 65535, %v5645_v19 }
 0x249   :  { %v6049_v7 = vpop.xlane.xlu1 %827  ;;  %v6051_v26 = vpop.xlane.xlu0 %785  ;;  %v907_v19 = vand.u32 65535, %v5687_v25  ;;  %v893_v25 = vand.u32 65535, %v5729_v31  ;;  %v935_v31 = vand.u32 65535, %v5771_v37  ;;  %v921_v37 = vand.u32 65535, %v5813_v43 }
 0x24a   :  { %vm829_vm8 = vcmp.eq.f32.partialorder %v5457_v5, %v6049_v7  ;;  %vm787_vm11 = vcmp.eq.f32.partialorder %v5471_v20, %v6051_v26 }
 0x24b   :  { %v830_v50 = vsel %vm829_vm8, %v825_v17, inf  ;;  %v788_v27 = vsel %vm787_vm11, %v783_v47, inf  ;;  %v853_v47 = vcvt.s32.f32 %v851_v16 }
 0x24c   :  { %831 = vmin.xlane.f32.xlu0 %v830_v50  ;;  %789 = vmin.xlane.f32.xlu1 %v788_v27 }
 0x24d   :  { %v6058_v34 = vpop.xlane.xlu1 %813  ;;  %v6060_v46 = vpop.xlane.xlu0 %603 }
 0x24e   :  { %vm605_vm3 = vcmp.eq.f32.partialorder %v5491_v38, %v6060_v46  ;;  %vm815_vm8 = vcmp.eq.f32.partialorder %v5500_v10, %v6058_v34 }
 0x24f   :  { %v606_v39 = vsel %vm605_vm3, %v601_v55, inf  ;;  %v816_v59 = vsel %vm815_vm8, %v811_v61, inf  ;;  %v839_v55 = vcvt.s32.f32 %v837_v32  ;;  %v881_v61 = vcvt.s32.f32 %v879_v21  ;;  %v7119_v21 = vld [vmem:[#allocation62_spill] sm:$0xff] }
 0x250   :  { %607 = vmin.xlane.f32.xlu1 %v606_v39  ;;  %v909_v32 = vcvt.s32.f32 %v907_v19  ;;  %v711_v62 = vand.u32 65535, %v7119_v21 }
 0x251   :  { %v6066_v5 = vpop.xlane.xlu1 %855  ;;  %v6070_v20 = vpop.xlane.xlu0 %589 }
 0x252   :  { %vm591_vm11 = vcmp.eq.f32.partialorder %v5533_v41, %v6070_v20  ;;  %vm857_vm3 = vcmp.eq.f32.partialorder %v5542_v12, %v6066_v5 }
 0x253   :  { %v592_v38 = vsel %vm591_vm11, %v587_v29, inf  ;;  %v858_v41 = vsel %vm857_vm3, %v853_v47, inf  ;;  %v657_v29 = vcvt.s32.f32 %v655_v23 }
 0x254   :  { %817 = vmin.xlane.f32.xlu1 %v816_v59  ;;  %593 = vmin.xlane.f32.xlu0 %v592_v38  ;;  %v867_v59 = vcvt.s32.f32 %v865_v11  ;;  %v643_v38 = vcvt.s32.f32 %v641_v8 }
 0x255   :  { %v6076_v17 = vpop.xlane.xlu1 %841  ;;  %v6080_v10 = vpop.xlane.xlu0 %631 }
 0x256   :  { %vm633_vm15 = vcmp.eq.f32.partialorder %v5575_v40, %v6080_v10  ;;  %vm843_vm8 = vcmp.eq.f32.partialorder %v5584_v18, %v6076_v17 }
 0x257   :  { %v634_v50 = vsel %vm633_vm15, %v629_v6, inf  ;;  %v844_v40 = vsel %vm843_vm8, %v839_v55, inf  ;;  %v895_v55 = vcvt.s32.f32 %v893_v25 }
 0x258   :  { %859 = vmin.xlane.f32.xlu0 %v858_v41  ;;  %635 = vmin.xlane.f32.xlu1 %v634_v50 }
 0x259   :  { %v6086_v27 = vpop.xlane.xlu1 %883  ;;  %v6090_v12 = vpop.xlane.xlu0 %617 }
 0x25a   :  { %vm619_vm11 = vcmp.eq.f32.partialorder %v5617_v3, %v6090_v12  ;;  %vm885_vm15 = vcmp.eq.f32.partialorder %v5626_v24, %v6086_v27 }
 0x25b   :  { %v620_v45 = vsel %vm619_vm11, %v615_v33, inf  ;;  %v886_v3 = vsel %vm885_vm15, %v881_v61, inf  ;;  %v671_v33 = vcvt.s32.f32 %v669_v9  ;;  %v713_v61 = vcvt.s32.f32 %v711_v62  ;;  %v7124_v9 = vld [vmem:[#allocation77_spill] sm:$0xff] }
 0x25c   :  { %845 = vmin.xlane.f32.xlu1 %v844_v40  ;;  %621 = vmin.xlane.f32.xlu0 %v620_v45  ;;  %v937_v45 = vcvt.s32.f32 %v935_v31  ;;  %v991_v62 = vand.u32 65535, %v5980_v58 }
 0x25d   :  { %v6096_v39 = vpop.xlane.xlu1 %869  ;;  %v6100_v18 = vpop.xlane.xlu0 %659 }
 0x25e   :  { %vm661_vm3 = vcmp.eq.f32.partialorder %v5659_v14, %v6100_v18  ;;  %vm871_vm8 = vcmp.eq.f32.partialorder %v5668_v30, %v6096_v39 }
 0x25f   :  { %v662_v16 = vsel %vm661_vm3, %v657_v29, inf  ;;  %v872_v14 = vsel %vm871_vm8, %v867_v59, inf  ;;  %v697_v29 = vand.u32 65535, %v5830_v63  ;;  %v7120_v59 = vld [vmem:[#allocation69_spill] sm:$0xff] }
 0x260   :  { %887 = vmin.xlane.f32.xlu0 %v886_v3  ;;  %663 = vmin.xlane.f32.xlu1 %v662_v16  ;;  %v923_v3 = vcvt.s32.f32 %v921_v37  ;;  %v963_v43 = vand.u32 65535, %v7120_v59 }
 0x261   :  { %v6106_v13 = vpop.xlane.xlu1 %911  ;;  %v6110_v24 = vpop.xlane.xlu0 %645  ;;  %v699_v16 = vcvt.s32.f32 %v697_v29  ;;  %v7125_v29 = vld [vmem:[#allocation82_spill] sm:$0xff] }
 0x262   :  { %vm647_vm11 = vcmp.eq.f32.partialorder %v5701_v28, %v6110_v24  ;;  %vm913_vm15 = vcmp.eq.f32.partialorder %v5710_v36, %v6106_v13 }
 0x263   :  { %v648_v47 = vsel %vm647_vm11, %v643_v38, inf  ;;  %v914_v28 = vsel %vm913_vm15, %v909_v32, inf  ;;  %v7121_v38 = vld [vmem:[#allocation70_spill] sm:$0xff] }
 0x264   :  { %873 = vmin.xlane.f32.xlu1 %v872_v14  ;;  %649 = vmin.xlane.f32.xlu0 %v648_v47  ;;  %v739_v63 = vand.u32 65535, %v7121_v38  ;;  %v965_v47 = vcvt.s32.f32 %v963_v43  ;;  %v7128_v38 = vld [vmem:[#allocation87_spill] sm:$0xff] }
 0x265   :  { %v6116_v6 = vpop.xlane.xlu1 %897  ;;  %v6120_v30 = vpop.xlane.xlu0 %687 }
 0x266   :  { %vm689_vm3 = vcmp.eq.f32.partialorder %v5743_v15, %v6120_v30  ;;  %vm899_vm8 = vcmp.eq.f32.partialorder %v5752_v42, %v6116_v6  ;;  %v741_v32 = vcvt.s32.f32 %v739_v63 }
 0x267   :  { %v690_v41 = vsel %vm689_vm3, %v685_v35, inf  ;;  %v900_v15 = vsel %vm899_vm8, %v895_v55, inf  ;;  %v7123_v35 = vld [vmem:[#allocation76_spill] sm:$0xff] }
 0x268   :  { %915 = vmin.xlane.f32.xlu1 %v914_v28  ;;  %691 = vmin.xlane.f32.xlu0 %v690_v41  ;;  %v949_v25 = vand.u32 65535, %v7123_v35  ;;  %v725_v28 = vand.u32 65535, %v7124_v9  ;;  %v610_v35 = vcvt.f32.s32 %v6060_v46  ;;  %v596_v9 = vcvt.f32.s32 %v6070_v20 }
 0x269   :  { %v6126_v50 = vpop.xlane.xlu1 %939  ;;  %v6130_v36 = vpop.xlane.xlu0 %673  ;;  %v890_v46 = vcvt.f32.s32 %v6086_v27  ;;  %v918_v27 = vcvt.f32.s32 %v6106_v13 }
 0x26a   :  { %vm675_vm11 = vcmp.eq.f32.partialorder %v5785_v2, %v6130_v36  ;;  %vm941_vm15 = vcmp.eq.f32.partialorder %v5794_v44, %v6126_v50  ;;  %v951_v31 = vcvt.s32.f32 %v949_v25  ;;  %v727_v21 = vcvt.s32.f32 %v725_v28 }
 0x26b   :  { %v676_v23 = vsel %vm675_vm11, %v671_v33, inf  ;;  %v942_v2 = vsel %vm941_vm15, %v937_v45, inf  ;;  %v862_v25 = vcvt.f32.s32 %v6066_v5  ;;  %v7129_v28 = vlaneseq }
 0x26c   :  { %901 = vmin.xlane.f32.xlu1 %v900_v15  ;;  %677 = vmin.xlane.f32.xlu0 %v676_v23  ;;  %v753_v15 = vand.u32 65535, %v5947_v52  ;;  %v7126_v52 = vld [vmem:[#allocation86_spill] sm:$0xff]  ;;  %v6213_v20 = vshll.u32 %v610_v35, 16 }
 0x26d   :  { %v6136_v40 = vpop.xlane.xlu1 %925  ;;  %v6140_v42 = vpop.xlane.xlu0 %715 }
 0x26e   :  { %vm717_vm3 = vcmp.eq.f32.partialorder %v5827_v57, %v6140_v42  ;;  %vm927_vm8 = vcmp.eq.f32.partialorder %v5838_v48, %v6136_v40  ;;  %v755_v37 = vcvt.s32.f32 %v753_v15 }
 0x26f   :  { %v718_v11 = vsel %vm717_vm3, %v713_v61, inf  ;;  %v928_v57 = vsel %vm927_vm8, %v923_v3, inf  ;;  %v993_v61 = vcvt.s32.f32 %v991_v62  ;;  %v7127_v3 = vld [vmem:[#allocation85_spill] sm:$0xff]  ;;  %v6215_v62 = vshll.u32 %v862_v25, 16 }
 0x270   :  { %943 = vmin.xlane.f32.xlu1 %v942_v2  ;;  %719 = vmin.xlane.f32.xlu0 %v718_v11  ;;  %v977_v2 = vand.u32 65535, %v7125_v29  ;;  %v767_v11 = vand.u32 65535, %v5986_v49  ;;  %v932_v25 = vcvt.f32.s32 %v6136_v40 }
 0x271   :  { %v6148_v8 = vpop.xlane.xlu1 %967  ;;  %v6150_v44 = vpop.xlane.xlu0 %701 }
 0x272   :  { %vm703_vm11 = vcmp.eq.f32.partialorder %v5872_v0, %v6150_v44  ;;  %vm969_vm15 = vcmp.eq.f32.partialorder %v7122_v22, %v6148_v8  ;;  %v979_v59 = vcvt.s32.f32 %v977_v2  ;;  %v769_v43 = vcvt.s32.f32 %v767_v11 }
 0x273   :  { %v704_v19 = vsel %vm703_vm11, %v699_v16, inf  ;;  %v970_v0 = vsel %vm969_vm15, %v965_v47, inf  ;;  %v834_v22 = vcvt.f32.s32 %v6049_v7  ;;  %v792_v47 = vcvt.f32.s32 %v6051_v26 }
 0x274   :  { %929 = vmin.xlane.f32.xlu1 %v928_v57  ;;  %705 = vmin.xlane.f32.xlu0 %v704_v19  ;;  %v582_v57 = vcvt.f32.s32 %v6036_v1  ;;  %v568_v19 = vcvt.f32.s32 %v6044_v60  ;;  %v708_v40 = vcvt.f32.s32 %v6150_v44 }
 0x275   :  { %v6158_v48 = vpop.xlane.xlu1 %953  ;;  %v6160_v14 = vpop.xlane.xlu0 %743  ;;  %v6207_v26 = vshll.u32 %v792_v47, 16 }
 0x276   :  { %vm745_vm3 = vcmp.eq.f32.partialorder %v5933_v53, %v6160_v14  ;;  %vm955_vm8 = vcmp.eq.f32.partialorder %v5921_v4, %v6158_v48  ;;  %v569_v60 = vshll.u32 %v568_v19, 16 }
 0x277   :  { %v746_v41 = vsel %vm745_vm3, %v741_v32, inf  ;;  %v956_v53 = vsel %vm955_vm8, %v951_v31, inf  ;;  %v820_v32 = vcvt.f32.s32 %v6058_v34  ;;  %v5114_v31 = vmov 1966171168  }
 0x278   :  { %971 = vmin.xlane.f32.xlu1 %v970_v0  ;;  %747 = vmin.xlane.f32.xlu0 %v746_v41  ;;  %v6202_v0 = vshrl.u32 %v7129_v28, 7  ;;  %v583_v41 = vshll.u32 %v582_v57, 16  ;;  %v1299_v7 = vunpack.c.l.s4 %v5114_v31  ;;  %v638_v34 = vcvt.f32.s32 %v6080_v10 }
 0x279   :  { %v6168_v55 = vpop.xlane.xlu1 %981  ;;  %v6170_v33 = vpop.xlane.xlu0 %729  ;;  %v6211_v5 = vshll.u32 %v820_v32, 16  ;;  %v6240_v57 = vshll.u32 %v918_v27, 16  ;;  %v974_v31 = vcvt.f32.s32 %v6148_v8 }
 0x27a   :  { %vm731_vm11 = vcmp.eq.f32.partialorder %v5956_v51, %v6170_v33  ;;  %vm983_vm8 = vcmp.eq.f32.partialorder %v7127_v3, %v6168_v55  ;;  %v1300_v11 = vunpack.c.0.s8 %v1299_v7  ;;  %v904_v3 = vcvt.f32.s32 %v6116_v6  ;;  %v1069_v7 = vld [vmem:[#allocation3] sm:$0xff] }
 0x27b   :  { %v732_v23 = vsel %vm731_vm11, %v727_v21, inf  ;;  %v984_v49 = vsel %vm983_vm8, %v979_v59, inf  ;;  %v6205_v21 = vshll.u32 %v834_v22, 16  ;;  %v1086_v59 = vld [vmem:[#allocation3 + $0x88] sm:$0xff] }
 0x27c   :  { %957 = vmin.xlane.f32.xlu1 %v956_v53  ;;  %733 = vmin.xlane.f32.xlu0 %v732_v23  ;;  %v624_v53 = vcvt.f32.s32 %v6090_v12  ;;  %v876_v23 = vcvt.f32.s32 %v6096_v39  ;;  %v1070_v12 = vld [vmem:[#allocation3 + $0x8] sm:$0xff]  ;;  %v694_v39 = vcvt.f32.s32 %v6120_v30  ;;  %v6249_v32 = vsub.s32 %v1300_v11, %v6202_v0 }
 0x27d   :  { %v6176_v45 = vpop.xlane.xlu1 %995  ;;  %v6178_v4 = vpop.xlane.xlu0 %757 }
 0x27e   :  { %vm997_vm15 = vcmp.eq.f32.partialorder %v5990_v54, %v6176_v45  ;;  %vm759_vm3 = vcmp.eq.f32.partialorder %v7126_v52, %v6178_v4  ;;  %v806_v54 = vcvt.f32.s32 %v6034_v56  ;;  %v848_v56 = vcvt.f32.s32 %v6076_v17 }
 0x27f   :  { %v998_v51 = vsel %vm997_vm15, %v993_v61, inf  ;;  %v760_v58 = vsel %vm759_vm3, %v755_v37, inf  ;;  %v6217_v17 = vshll.u32 %v596_v9, 16  ;;  %v666_v61 = vcvt.f32.s32 %v6100_v18 }
 0x280   :  { %999 = vmin.xlane.f32.xlu1 %v998_v51  ;;  %761 = vmin.xlane.f32.xlu0 %v760_v58  ;;  %v807_v1 = vshll.u32 %v806_v54, 16  ;;  %v6219_v15 = vshll.u32 %v848_v56, 16  ;;  %v6225_v52 = vshll.u32 %v638_v34, 16  ;;  %v6227_v51 = vshll.u32 %v890_v46, 16 }
 0x281   :  { %v6188_v16 = vpop.xlane.xlu0 %771  ;;  %v652_v58 = vcvt.f32.s32 %v6110_v24  ;;  %v946_v18 = vcvt.f32.s32 %v6126_v50  ;;  %v6233_v13 = vshll.u32 %v624_v53, 16  ;;  %v680_v54 = vcvt.f32.s32 %v6130_v36 }
 0x282   :  { %vm773_vm11 = vcmp.eq.f32.partialorder %v7128_v38, %v6188_v16  ;;  %v722_v36 = vcvt.f32.s32 %v6140_v42  ;;  %v6257_v56 = vshll.u32 %v904_v3, 16  ;;  %v960_v42 = vcvt.f32.s32 %v6158_v48  ;;  %v1088_v48 = vld [vmem:[#allocation3 + $0x98] sm:$0xff] }
 0x283   :  { %v774_v63 = vsel %vm773_vm11, %v769_v43, inf  ;;  %v6251_v35 = vshll.u32 %v652_v58, 16  ;;  %v6264_v34 = vshll.u32 %v680_v54, 16 }
 0x284   :  { %985 = vmin.xlane.f32.xlu1 %v984_v49  ;;  %775 = vmin.xlane.f32.xlu0 %v774_v63  ;;  %v6235_v49 = vshll.u32 %v876_v23, 16  ;;  %v6237_v63 = vshll.u32 %v666_v61, 16  ;;  %v750_v23 = vcvt.f32.s32 %v6160_v14  ;;  %v988_v61 = vcvt.f32.s32 %v6168_v55 }
 0x285   :  { %v6273_v8 = vshll.u32 %v722_v36, 16  ;;  %v1002_v14 = vcvt.f32.s32 %v6176_v45  ;;  %v764_v55 = vcvt.f32.s32 %v6178_v4 }
 0x287   :  { %v6306_v36 = vshll.u32 %v764_v55, 16 }
 0x2d0   :  { %v804_v10 = vpop.xlane.xlu0 %803 }
 0x2d1   :  { %v580_v37 = vpop.xlane.xlu1 %579  ;;  %v805_v2 = vcvt.f32.s32 %v804_v10 }
 0x2d2   :  { %v581_v29 = vcvt.f32.s32 %v580_v37  ;;  %v736_v37 = vcvt.f32.s32 %v6170_v33  ;;  %v1085_v33 = vld [vmem:[#allocation3 + $0x80] sm:$0xff] }
 0x2d3   :  { %v808_v38 = vadd.s32 %v807_v1, %v805_v2  ;;  %v6259_v1 = vshll.u32 %v694_v39, 16  ;;  %v778_v39 = vcvt.f32.s32 %v6188_v16 }
 0x2d4   :  { %v584_v43 = vadd.s32 %v583_v41, %v581_v29  ;;  %v6261_v41 = vshll.u32 %v946_v18, 16  ;;  %v6271_v29 = vshll.u32 %v932_v25, 16  ;;  %v6294_v45 = vshll.u32 %v736_v37, 16 }
 0x2d5   :  { %v1118_v50 = vsel %vm1054_vm1, %v808_v38, %v1086_v59  ;;  %v566_v47 = vpop.xlane.xlu1 %565  ;;  %v6286_v59 = vshll.u32 %v960_v42, 16  ;;  %v6292_v38 = vshll.u32 %v988_v61, 16  ;;  %v6304_v25 = vshll.u32 %v1002_v14, 16 }
 0x2d6   :  { %v1102_v19 = vsel %vm1038_vm2, %v584_v43, %v1070_v12  ;;  %1151 = vst.msk [vmem:[#allocation3 + $0x88] sm:$0xff] %vm47_vm0, %v1118_v50  ;;  %v567_v9 = vcvt.f32.s32 %v566_v47  ;;  %v6284_v12 = vshll.u32 %v708_v40, 16  ;;  %v6290_v43 = vshll.u32 %v750_v23, 16 }
 0x2d7   :  { %1135 = vst.msk [vmem:[#allocation3 + $0x8] sm:$0xff] %vm47_vm0, %v1102_v19  ;;  %v6310_v40 = vshll.u32 %v778_v39, 16 }
 0x2d8   :  { %v570_v46 = vadd.s32 %v569_v60, %v567_v9  ;;  %v6278_v60 = vshll.u32 %v974_v31, 16  ;;  %v1072_v9 = vld [vmem:[#allocation3 + $0x18] sm:$0xff] }
 0x2d9   :  { %v832_v53 = vpop.xlane.xlu0 %831  ;;  %v790_v10 = vpop.xlane.xlu1 %789 }
 0x2da   :  { %v833_v27 = vcvt.f32.s32 %v832_v53  ;;  %v1101_v44 = vsel %vm1037_vm6, %v570_v46, %v1069_v7  ;;  %v791_v58 = vcvt.f32.s32 %v790_v10 }
 0x2db   :  { %1134 = vst.msk [vmem:[#allocation3] sm:$0xff] %vm47_vm0, %v1101_v44 }
 0x2dc   :  { %v836_v3 = vadd.s32 %v6205_v21, %v833_v27  ;;  %v794_v18 = vadd.s32 %v6207_v26, %v791_v58 }
 0x2dd   :  { %v608_v6 = vpop.xlane.xlu1 %607  ;;  %v1282_v21 = vld [vmem:[#allocation3 + $0x88] sm:$0xff] }
 0x2de   :  { %v1120_v24 = vsel %vm1056_vm9, %v836_v3, %v1088_v48  ;;  %v1266_v19 = vld [vmem:[#allocation3 + $0x8] sm:$0xff]  ;;  %v1117_v50 = vsel %vm1053_vm5, %v794_v18, %v1085_v33  ;;  %v609_v16 = vcvt.f32.s32 %v608_v6  ;;  %v2130_v26 = vcombine.high %v1282_v21, %v1282_v21  ;;  %v1087_v33 = vld [vmem:[#allocation3 + $0x90] sm:$0xff] }
 0x2df   :  { %1153 = vst.msk [vmem:[#allocation3 + $0x98] sm:$0xff] %vm47_vm0, %v1120_v24  ;;  %v2137_v47 = vrot.slane %v1282_v21, %v6249_v32  ;;  %1150 = vst.msk [vmem:[#allocation3 + $0x80] sm:$0xff] %vm47_vm0, %v1117_v50  ;;  %v1346_v31 = vcombine.high %v1266_v19, %v1266_v19  ;;  %v1353_v7 = vrot.slane %v1266_v19, %v6249_v32  ;;  %v1071_v3 = vld [vmem:[#allocation3 + $0x10] sm:$0xff] }
 0x2e0   :  { %v612_v42 = vadd.s32 %v6213_v20, %v609_v16  ;;  %v2144_v46 = vrot.slane %v2130_v26, %v6249_v32 }
 0x2e1   :  { %v2145_v53 = vcombine.high %v2137_v47, %v2137_v47  ;;  %v818_v23 = vpop.xlane.xlu1 %817  ;;  %v594_v61 = vpop.xlane.xlu0 %593  ;;  %v2153_v37 = vrot.slane %v2137_v47, %v6249_v32  ;;  %v1360_v10 = vrot.slane %v1346_v31, %v6249_v32  ;;  %v1361_v27 = vcombine.high %v1353_v7, %v1353_v7 }
 0x2e2   :  { %v1369_v2 = vrot.slane %v1353_v7, %v6249_v32  ;;  %v1104_v58 = vsel %vm1040_vm10, %v612_v42, %v1072_v9  ;;  %v819_v48 = vcvt.f32.s32 %v818_v23  ;;  %v595_v14 = vcvt.f32.s32 %v594_v61  ;;  %v1265_v20 = vld [vmem:[#allocation3] sm:$0xff]  ;;  %v1074_v23 = vld [vmem:[#allocation3 + $0x28] sm:$0xff] }
 0x2e3   :  { %v2146_v55 = vcombine.high %v2144_v46, %v2144_v46  ;;  %1137 = vst.msk [vmem:[#allocation3 + $0x18] sm:$0xff] %vm47_vm0, %v1104_v58  ;;  %v2160_v39 = vrot.slane %v2144_v46, %v6249_v32  ;;  %v2167_v18 = vrot.slane %v2145_v53, %v6249_v32  ;;  %v1362_v4 = vcombine.high %v1360_v10, %v1360_v10  ;;  %v1090_v61 = vld [vmem:[#allocation3 + $0xa8] sm:$0xff] }
 0x2e4   :  { %v1376_v54 = vrot.slane %v1360_v10, %v6249_v32  ;;  %v822_v24 = vadd.s32 %v6211_v5, %v819_v48  ;;  %v598_v6 = vadd.s32 %v6217_v17, %v595_v14  ;;  %v1383_v19 = vrot.slane %v1361_v27, %v6249_v32 }
 0x2e5   :  { %v2174_v21 = vrot.slane %v2146_v55, %v6249_v32  ;;  %v636_v22 = vpop.xlane.xlu1 %635  ;;  %v860_v30 = vpop.xlane.xlu0 %859  ;;  %v3698_v50 = vcombine.low %v2153_v37, %v2167_v18  ;;  %v4788_v16 = vcombine.high %v2153_v37, %v2167_v18  ;;  %v1390_v26 = vrot.slane %v1362_v4, %v6249_v32 }
 0x2e6   :  { %v1297_v47 = vcombine.high %v1265_v20, %v1265_v20  ;;  %v1119_v7 = vsel %vm1055_vm13, %v822_v24, %v1087_v33  ;;  %v1103_v5 = vsel %vm1039_vm14, %v598_v6, %v1071_v3  ;;  %v637_v17 = vcvt.f32.s32 %v636_v22 }
 0x2e7   :  { %v861_v53 = vcvt.f32.s32 %v860_v30  ;;  %1152 = vst.msk [vmem:[#allocation3 + $0x90] sm:$0xff] %vm47_vm0, %v1119_v7  ;;  %1136 = vst.msk [vmem:[#allocation3 + $0x10] sm:$0xff] %vm47_vm0, %v1103_v5  ;;  %v3700_v37 = vcombine.low %v2160_v39, %v2174_v21  ;;  %v4789_v10 = vcombine.high %v2160_v39, %v2174_v21  ;;  %v3708_v27 = vrot.slane %v3698_v50, %v6249_v32 }
 0x2e8   :  { %v3715_v11 = vrot.slane %v4788_v16, %v6249_v32  ;;  %v640_v44 = vadd.s32 %v6225_v52, %v637_v17  ;;  %v2914_v48 = vcombine.low %v1369_v2, %v1383_v19  ;;  %v4756_v14 = vcombine.high %v1369_v2, %v1383_v19  ;;  %v1089_v2 = vld [vmem:[#allocation3 + $0xa0] sm:$0xff] }
 0x2e9   :  { %v864_v58 = vadd.s32 %v6215_v62, %v861_v53  ;;  %v846_v55 = vpop.xlane.xlu1 %845  ;;  %v622_v33 = vpop.xlane.xlu0 %621  ;;  %v3722_v3 = vrot.slane %v3700_v37, %v6249_v32  ;;  %v3729_v18 = vrot.slane %v4789_v10, %v6249_v32  ;;  %v2916_v24 = vcombine.low %v1376_v54, %v1390_v26  ;;  %v1073_v19 = vld [vmem:[#allocation3 + $0x20] sm:$0xff] }
 0x2ea   :  { %v3730_v4 = vcombine.low %v3708_v27, %v3715_v11  ;;  %v1106_v21 = vsel %vm1042_vm7, %v640_v44, %v1074_v23  ;;  %v847_v50 = vcvt.f32.s32 %v846_v55  ;;  %v623_v62 = vcvt.f32.s32 %v622_v33  ;;  %v7152_v11 = vld [vmem:[#allocation37_spill] sm:$0xff]  ;;  %v1092_v55 = vld [vmem:[#allocation3 + $0xb8] sm:$0xff] }
 0x2eb   :  { %v1122_v52 = vsel %vm1058_vm4, %v864_v58, %v1090_v61  ;;  %1139 = vst.msk [vmem:[#allocation3 + $0x28] sm:$0xff] %vm47_vm0, %v1106_v21  ;;  %v3731_v16 = vcombine.low %v3722_v3, %v3729_v18  ;;  %v4757_v31 = vcombine.high %v1376_v54, %v1390_v26  ;;  %v2924_v7 = vrot.slane %v2914_v48, %v6249_v32 }
 0x2ec   :  { %1155 = vst.msk [vmem:[#allocation3 + $0xa8] sm:$0xff] %vm47_vm0, %v1122_v52  ;;  %v3738_v9 = vrot.slane %v3730_v4, %v6249_v32  ;;  %v850_v42 = vadd.s32 %v6219_v15, %v847_v50  ;;  %v626_v46 = vadd.s32 %v6233_v13, %v623_v62  ;;  %v2931_v5 = vrot.slane %v4756_v14, %v6249_v32  ;;  %v7153_v13 = vld [vmem:[#allocation35_spill] sm:$0xff]  ;;  %v1281_v62 = vld [vmem:[#allocation3 + $0x80] sm:$0xff] }
 0x2ed   :  { %v2938_v17 = vrot.slane %v2916_v24, %v6249_v32  ;;  %v664_v53 = vpop.xlane.xlu1 %663  ;;  %v888_v23 = vpop.xlane.xlu0 %887  ;;  %v3745_v61 = vrot.slane %v3731_v16, %v6249_v32  ;;  %v2945_v37 = vrot.slane %v4757_v31, %v6249_v32  ;;  %v1304_v10 = vrot.slane %v1265_v20, %v6249_v32  ;;  %v1076_v14 = vld [vmem:[#allocation3 + $0x38] sm:$0xff]  ;;  %v7159_v16 = vld [vmem:[#allocation38_spill] sm:$0xff] }
 0x2ee   :  { %v1311_v54 = vrot.slane %v1297_v47, %v6249_v32  ;;  %v1121_v15 = vsel %vm1057_vm12, %v850_v42, %v1089_v2  ;;  %vm7154_vm1 = vcmp.lt.f32.partialorder %v7152_v11, %v7153_v13  ;;  %v665_v58 = vcvt.f32.s32 %v664_v53  ;;  %v7155_v2 = vld [vmem:[#allocation41_spill] sm:$0xff]  ;;  %v1091_v42 = vld [vmem:[#allocation3 + $0xb0] sm:$0xff] }
 0x2ef   :  { %v1105_v44 = vsel %vm7154_vm1, %v626_v46, %v1073_v19  ;;  %v889_v48 = vcvt.f32.s32 %v888_v23  ;;  %1154 = vst.msk [vmem:[#allocation3 + $0xa0] sm:$0xff] %vm47_vm0, %v1121_v15  ;;  %v3746_v33 = vcombine.low %v3738_v9, %v3745_v61  ;;  %v2946_v20 = vcombine.low %v2924_v7, %v2931_v5  ;;  %v7156_v19 = vld [vmem:[#allocation39_spill] sm:$0xff] }
 0x2f0   :  { %1138 = vst.msk [vmem:[#allocation3 + $0x20] sm:$0xff] %vm47_vm0, %v1105_v44  ;;  %v2947_v3 = vcombine.low %v2938_v17, %v2945_v37  ;;  %v1312_v47 = vcombine.high %v1304_v10, %v1304_v10  ;;  %v668_v18 = vadd.s32 %v6237_v63, %v665_v58  ;;  %v1313_v24 = vcombine.high %v1311_v54, %v1311_v54  ;;  %v1075_v46 = vld [vmem:[#allocation3 + $0x30] sm:$0xff]  ;;  %v7161_v58 = vld [vmem:[#allocation44_spill] sm:$0xff] }
 0x2f1   :  { %v892_v4 = vadd.s32 %v6227_v51, %v889_v48  ;;  %v1320_v6 = vrot.slane %v1304_v10, %v6249_v32  ;;  %v874_v39 = vpop.xlane.xlu1 %873  ;;  %v650_v21 = vpop.xlane.xlu0 %649  ;;  %4485 = vperm.xlu0 %5003, %v3746_v33   ;;  %v2954_v22 = vrot.slane %v2946_v20, %v6249_v32  ;;  %v1327_v52 = vrot.slane %v1311_v54, %v6249_v32  ;;  %v7158_v51 = vld [vmem:[#allocation40_spill] sm:$0xff]  ;;  %v7162_v48 = vld [vmem:[#allocation42_spill] sm:$0xff] }
 0x2f2   :  { %v2961_v30 = vrot.slane %v2947_v3, %v6249_v32  ;;  %v1334_v50 = vrot.slane %v1312_v47, %v6249_v32  ;;  %vm7157_vm2 = vcmp.lt.f32.partialorder %v7155_v2, %v7156_v19  ;;  %vm7160_vm5 = vcmp.lt.f32.partialorder %v7158_v51, %v7159_v16  ;;  %v1094_v3 = vld [vmem:[#allocation3 + $0xc8] sm:$0xff]  ;;  %v1268_v16 = vld [vmem:[#allocation3 + $0x18] sm:$0xff] }
 0x2f3   :  { %v1108_v63 = vsel %vm7157_vm2, %v668_v18, %v1076_v14  ;;  %v1124_v9 = vsel %vm7160_vm5, %v892_v4, %v1092_v55  ;;  %v875_v31 = vcvt.f32.s32 %v874_v39  ;;  %v651_v7 = vcvt.f32.s32 %v650_v21  ;;  %v7164_v55 = vld [vmem:[#allocation45_spill] sm:$0xff] }
 0x2f4   :  { %1141 = vst.msk [vmem:[#allocation3 + $0x38] sm:$0xff] %vm47_vm0, %v1108_v63  ;;  %1157 = vst.msk [vmem:[#allocation3 + $0xb8] sm:$0xff] %vm47_vm0, %v1124_v9  ;;  %v2962_v5 = vcombine.low %v2954_v22, %v2961_v30  ;;  %v1341_v17 = vrot.slane %v1313_v24, %v6249_v32  ;;  %v2865_v53 = vcombine.low %v1320_v6, %v1334_v50  ;;  %v1078_v47 = vld [vmem:[#allocation3 + $0x48] sm:$0xff]  ;;  %v7167_v9 = vld [vmem:[#allocation48_spill] sm:$0xff] }
 0x2f5   :  { %v4754_v23 = vcombine.high %v1320_v6, %v1334_v50  ;;  %v878_v61 = vadd.s32 %v6235_v49, %v875_v31  ;;  %v654_v37 = vadd.s32 %v6251_v35, %v651_v7  ;;  %v2081_v10 = vcombine.high %v1281_v62, %v1281_v62  ;;  %v916_v26 = vpop.xlane.xlu1 %915  ;;  %v692_v27 = vpop.xlane.xlu0 %691  ;;  %v7165_v49 = vld [vmem:[#allocation43_spill] sm:$0xff]  ;;  %v7168_v31 = vld [vmem:[#allocation46_spill] sm:$0xff] }
 0x2f6   :  { %v2088_v54 = vrot.slane %v1281_v62, %v6249_v32  ;;  %4437 = vperm.xlu1 %5002, %v2962_v5   ;;  %v2867_v15 = vcombine.low %v1327_v52, %v1341_v17  ;;  %v4755_v11 = vcombine.high %v1327_v52, %v1341_v17  ;;  %v2875_v13 = vrot.slane %v2865_v53, %v6249_v32  ;;  %v1284_v52 = vld [vmem:[#allocation3 + $0x98] sm:$0xff]  ;;  %v1093_v53 = vld [vmem:[#allocation3 + $0xc0] sm:$0xff] }
 0x2f7   :  { %v2882_v44 = vrot.slane %v4754_v23, %v6249_v32  ;;  %vm7163_vm6 = vcmp.lt.f32.partialorder %v7161_v58, %v7162_v48  ;;  %vm7166_vm9 = vcmp.lt.f32.partialorder %v7164_v55, %v7165_v49  ;;  %v917_v33 = vcvt.f32.s32 %v916_v26  ;;  %v1077_v23 = vld [vmem:[#allocation3 + $0x40] sm:$0xff] }
 0x2f8   :  { %v1123_v14 = vsel %vm7163_vm6, %v878_v61, %v1091_v42  ;;  %v1107_v35 = vsel %vm7166_vm9, %v654_v37, %v1075_v46  ;;  %v693_v20 = vcvt.f32.s32 %v692_v27  ;;  %v2889_v18 = vrot.slane %v2867_v15, %v6249_v32  ;;  %v7171_v42 = vld [vmem:[#allocation47_spill] sm:$0xff]  ;;  %v7173_v48 = vld [vmem:[#allocation52_spill] sm:$0xff]  ;;  %v7176_v49 = vld [vmem:[#allocation53_spill] sm:$0xff] }
 0x2f9   :  { %1156 = vst.msk [vmem:[#allocation3 + $0xb0] sm:$0xff] %vm47_vm0, %v1123_v14  ;;  %1140 = vst.msk [vmem:[#allocation3 + $0x30] sm:$0xff] %vm47_vm0, %v1107_v35  ;;  %v2896_v4 = vrot.slane %v4755_v11, %v6249_v32  ;;  %v2897_v24 = vcombine.low %v2875_v13, %v2882_v44  ;;  %v2095_v6 = vrot.slane %v2081_v10, %v6249_v32  ;;  %v902_v2 = vpop.xlane.xlu1 %901  ;;  %v678_v19 = vpop.xlane.xlu0 %677  ;;  %v7174_v14 = vld [vmem:[#allocation50_spill] sm:$0xff]  ;;  %v7177_v35 = vld [vmem:[#allocation51_spill] sm:$0xff] }
 0x2fa   :  { %v920_v39 = vadd.s32 %v6240_v57, %v917_v33  ;;  %v696_v21 = vadd.s32 %v6259_v1, %v693_v20  ;;  %v2096_v22 = vcombine.high %v2088_v54, %v2088_v54  ;;  %v2104_v30 = vrot.slane %v2088_v54, %v6249_v32  ;;  %v7170_v57 = vld [vmem:[#allocation49_spill] sm:$0xff] }
 0x2fb   :  { %v2898_v50 = vcombine.low %v2889_v18, %v2896_v4  ;;  %v2905_v62 = vrot.slane %v2897_v24, %v6249_v32  ;;  %v2097_v63 = vcombine.high %v2095_v6, %v2095_v6  ;;  %v2111_v51 = vrot.slane %v2095_v6, %v6249_v32 }
 0x2fc   :  { %vm7169_vm10 = vcmp.lt.f32.partialorder %v7167_v9, %v7168_v31  ;;  %vm7172_vm13 = vcmp.lt.f32.partialorder %v7170_v57, %v7171_v42  ;;  %v903_v46 = vcvt.f32.s32 %v902_v2  ;;  %v679_v5 = vcvt.f32.s32 %v678_v19 }
 0x2fd   :  { %v1126_v7 = vsel %vm7169_vm10, %v920_v39, %v1094_v3  ;;  %v1110_v1 = vsel %vm7172_vm13, %v696_v21, %v1078_v47  ;;  %v2912_v17 = vrot.slane %v2898_v50, %v6249_v32  ;;  %v2118_v61 = vrot.slane %v2096_v22, %v6249_v32  ;;  %v944_v3 = vpop.xlane.xlu1 %943 }
 0x2fe   :  { %1159 = vst.msk [vmem:[#allocation3 + $0xc8] sm:$0xff] %vm47_vm0, %v1126_v7  ;;  %1143 = vst.msk [vmem:[#allocation3 + $0x48] sm:$0xff] %vm47_vm0, %v1110_v1  ;;  %v2125_v37 = vrot.slane %v2097_v63, %v6249_v32  ;;  %v2228_v10 = vcombine.high %v1284_v52, %v1284_v52  ;;  %v906_v54 = vadd.s32 %v6257_v56, %v903_v46  ;;  %v945_v50 = vcvt.f32.s32 %v944_v3  ;;  %v1096_v63 = vld [vmem:[#allocation3 + $0xd8] sm:$0xff] }
 0x2ff   :  { %v682_v26 = vadd.s32 %v6264_v34, %v679_v5  ;;  %v2235_v27 = vrot.slane %v1284_v52, %v6249_v32  ;;  %v1444_v15 = vcombine.high %v1268_v16, %v1268_v16  ;;  %v2913_v11 = vcombine.low %v2905_v62, %v2912_v17  ;;  %v720_v34 = vpop.xlane.xlu0 %719  ;;  %v1080_v1 = vld [vmem:[#allocation3 + $0x58] sm:$0xff] }
 0x300   :  { %v3649_v13 = vcombine.low %v2104_v30, %v2118_v61  ;;  %v4786_v44 = vcombine.high %v2104_v30, %v2118_v61  ;;  %v3651_v58 = vcombine.low %v2111_v51, %v2125_v37  ;;  %vm7175_vm14 = vcmp.lt.f32.partialorder %v7173_v48, %v7174_v14 }
 0x301   :  { %v1125_v55 = vsel %vm7175_vm14, %v906_v54, %v1093_v53  ;;  %vm7178_vm4 = vcmp.lt.f32.partialorder %v7176_v49, %v7177_v35  ;;  %v4787_v20 = vcombine.high %v2111_v51, %v2125_v37  ;;  %v2242_v56 = vrot.slane %v2228_v10, %v6249_v32  ;;  %4434 = vperm.xlu0 %5003, %v2913_v11   ;;  %v7180_v37 = vld [vmem:[#allocation54_spill] sm:$0xff] }
 0x302   :  { %v1109_v33 = vsel %vm7178_vm4, %v682_v26, %v1077_v23  ;;  %1158 = vst.msk [vmem:[#allocation3 + $0xc0] sm:$0xff] %vm47_vm0, %v1125_v55  ;;  %v3659_v47 = vrot.slane %v3649_v13, %v6249_v32  ;;  %v3666_v18 = vrot.slane %v4786_v44, %v6249_v32  ;;  %v3673_v4 = vrot.slane %v3651_v58, %v6249_v32  ;;  %v930_v26 = vpop.xlane.xlu1 %929  ;;  %v7182_v13 = vld [vmem:[#allocation57_spill] sm:$0xff]  ;;  %v1267_v58 = vld [vmem:[#allocation3 + $0x10] sm:$0xff] }
 0x303   :  { %1142 = vst.msk [vmem:[#allocation3 + $0x40] sm:$0xff] %vm47_vm0, %v1109_v33  ;;  %v2243_v24 = vcombine.high %v2235_v27, %v2235_v27  ;;  %v3680_v6 = vrot.slane %v4787_v20, %v6249_v32  ;;  %v2244_v39 = vcombine.high %v2242_v56, %v2242_v56  ;;  %v2251_v21 = vrot.slane %v2235_v27, %v6249_v32  ;;  %v706_v27 = vpop.xlane.xlu0 %705 }
 0x304   :  { %v2258_v22 = vrot.slane %v2242_v56, %v6249_v32  ;;  %v3681_v30 = vcombine.low %v3659_v47, %v3666_v18  ;;  %v721_v62 = vcvt.f32.s32 %v720_v34  ;;  %v1451_v51 = vrot.slane %v1268_v16, %v6249_v32  ;;  %v7179_v16 = vld [vmem:[#allocation56_spill] sm:$0xff]  ;;  %v1095_v47 = vld [vmem:[#allocation3 + $0xd0] sm:$0xff] }
 0x305   :  { %v2265_v52 = vrot.slane %v2243_v24, %v6249_v32  ;;  %v3682_v2 = vcombine.low %v3673_v4, %v3680_v6  ;;  %v2272_v19 = vrot.slane %v2244_v39, %v6249_v32  ;;  %v1458_v9 = vrot.slane %v1444_v15, %v6249_v32 }
 0x306   :  { %v3689_v31 = vrot.slane %v3681_v30, %v6249_v32  ;;  %v948_v42 = vadd.s32 %v6261_v41, %v945_v50  ;;  %v724_v53 = vadd.s32 %v6273_v8, %v721_v62  ;;  %vm7181_vm7 = vcmp.lt.f32.partialorder %v7179_v16, %v7180_v37  ;;  %v7183_v8 = vld [vmem:[#allocation55_spill] sm:$0xff] }
 0x307   :  { %v3796_v7 = vcombine.low %v2251_v21, %v2265_v52  ;;  %v4792_v57 = vcombine.high %v2251_v21, %v2265_v52  ;;  %v3696_v46 = vrot.slane %v3682_v2, %v6249_v32  ;;  %v3798_v5 = vcombine.low %v2258_v22, %v2272_v19 }
 0x308   :  { %v4793_v17 = vcombine.high %v2258_v22, %v2272_v19  ;;  %v1128_v10 = vsel %vm7181_vm7, %v948_v42, %v1096_v63  ;;  %v1459_v54 = vcombine.high %v1451_v51, %v1451_v51  ;;  %vm7184_vm12 = vcmp.lt.f32.partialorder %v7182_v13, %v7183_v8  ;;  %v1079_v22 = vld [vmem:[#allocation3 + $0x50] sm:$0xff] }
 0x309   :  { %v3806_v23 = vrot.slane %v3796_v7, %v6249_v32  ;;  %v3813_v61 = vrot.slane %v4792_v57, %v6249_v32  ;;  %v3697_v15 = vcombine.low %v3689_v31, %v3696_v46  ;;  %v3820_v41 = vrot.slane %v3798_v5, %v6249_v32  ;;  %1161 = vst.msk [vmem:[#allocation3 + $0xd8] sm:$0xff] %vm47_vm0, %v1128_v10  ;;  %v972_v7 = vpop.xlane.xlu1 %971  ;;  %v748_v57 = vpop.xlane.xlu0 %747 }
 0x30a   :  { %v3827_v11 = vrot.slane %v4793_v17, %v6249_v32  ;;  %v1112_v44 = vsel %vm7184_vm12, %v724_v53, %v1080_v1  ;;  %v1460_v14 = vcombine.high %v1458_v9, %v1458_v9  ;;  %v1467_v55 = vrot.slane %v1451_v51, %v6249_v32  ;;  %v7185_v51 = vld [vmem:[#allocation60_spill] sm:$0xff]  ;;  %v7189_v1 = vld [vmem:[#allocation59_spill] sm:$0xff] }
 0x30b   :  { %v3828_v48 = vcombine.low %v3806_v23, %v3813_v61  ;;  %1145 = vst.msk [vmem:[#allocation3 + $0x58] sm:$0xff] %vm47_vm0, %v1112_v44  ;;  %v1474_v49 = vrot.slane %v1458_v9, %v6249_v32  ;;  %4482 = vperm.xlu1 %5002, %v3697_v15   ;;  %v1481_v33 = vrot.slane %v1459_v54, %v6249_v32  ;;  %v931_v20 = vcvt.f32.s32 %v930_v26  ;;  %v7186_v9 = vld [vmem:[#allocation58_spill] sm:$0xff] }
 0x30c   :  { %v3829_v35 = vcombine.low %v3820_v41, %v3827_v11  ;;  %v707_v56 = vcvt.f32.s32 %v706_v27  ;;  %v1488_v34 = vrot.slane %v1460_v14, %v6249_v32  ;;  %v1395_v18 = vcombine.high %v1267_v58, %v1267_v58  ;;  %v1283_v17 = vld [vmem:[#allocation3 + $0x90] sm:$0xff]  ;;  %v1098_v41 = vld [vmem:[#allocation3 + $0xe8] sm:$0xff] }
 0x30d   :  { %v3836_v3 = vrot.slane %v3828_v48, %v6249_v32  ;;  %v1402_v4 = vrot.slane %v1267_v58, %v6249_v32  ;;  %v3012_v6 = vcombine.low %v1467_v55, %v1481_v33  ;;  %v4760_v39 = vcombine.high %v1467_v55, %v1481_v33  ;;  %v1082_v14 = vld [vmem:[#allocation3 + $0x68] sm:$0xff] }
 0x30e   :  { %v3843_v24 = vrot.slane %v3829_v35, %v6249_v32  ;;  %v934_v21 = vadd.s32 %v6271_v29, %v931_v20  ;;  %v3014_v30 = vcombine.low %v1474_v49, %v1488_v34  ;;  %v4761_v52 = vcombine.high %v1474_v49, %v1488_v34  ;;  %v7191_v34 = vld [vmem:[#allocation65_spill] sm:$0xff] }
 0x30f   :  { %v710_v50 = vadd.s32 %v6284_v12, %v707_v56  ;;  %v1409_v62 = vrot.slane %v1395_v18, %v6249_v32  ;;  %v3022_v19 = vrot.slane %v3012_v6, %v6249_v32  ;;  %v3029_v63 = vrot.slane %v4760_v39, %v6249_v32  ;;  %v7188_v12 = vld [vmem:[#allocation61_spill] sm:$0xff]  ;;  %v7194_v6 = vld [vmem:[#allocation66_spill] sm:$0xff] }
 0x310   :  { %v3844_v2 = vcombine.low %v3836_v3, %v3843_v24  ;;  %vm7187_vm15 = vcmp.lt.f32.partialorder %v7185_v51, %v7186_v9  ;;  %v3036_v29 = vrot.slane %v3014_v30, %v6249_v32  ;;  %v3043_v42 = vrot.slane %v4761_v52, %v6249_v32  ;;  %v734_v30 = vpop.xlane.xlu0 %733 }
 0x311   :  { %v1127_v31 = vsel %vm7187_vm15, %v934_v21, %v1095_v47  ;;  %vm7190_vm3 = vcmp.lt.f32.partialorder %v7188_v12, %v7189_v1  ;;  %v1410_v5 = vcombine.high %v1402_v4, %v1402_v4  ;;  %v3044_v53 = vcombine.low %v3022_v19, %v3029_v63  ;;  %v7192_v47 = vld [vmem:[#allocation63_spill] sm:$0xff] }
 0x312   :  { %1160 = vst.msk [vmem:[#allocation3 + $0xd0] sm:$0xff] %vm47_vm0, %v1127_v31  ;;  %v1111_v46 = vsel %vm7190_vm3, %v710_v50, %v1079_v22  ;;  %4491 = vperm.xlu0 %5003, %v3844_v2   ;;  %v1411_v23 = vcombine.high %v1409_v62, %v1409_v62  ;;  %v1418_v61 = vrot.slane %v1402_v4, %v6249_v32  ;;  %v973_v54 = vcvt.f32.s32 %v972_v7  ;;  %v1286_v4 = vld [vmem:[#allocation3 + $0xa8] sm:$0xff]  ;;  %v958_v22 = vpop.xlane.xlu1 %957 }
 0x313   :  { %1144 = vst.msk [vmem:[#allocation3 + $0x50] sm:$0xff] %vm47_vm0, %v1111_v46  ;;  %v1425_v16 = vrot.slane %v1409_v62, %v6249_v32  ;;  %v3045_v37 = vcombine.low %v3036_v29, %v3043_v42  ;;  %v1432_v10 = vrot.slane %v1410_v5, %v6249_v32  ;;  %v749_v26 = vcvt.f32.s32 %v748_v57 }
 0x314   :  { %v3052_v27 = vrot.slane %v3044_v53, %v6249_v32  ;;  %v1439_v15 = vrot.slane %v1411_v23, %v6249_v32  ;;  %v2179_v11 = vcombine.high %v1283_v17, %v1283_v17  ;;  %v2186_v13 = vrot.slane %v1283_v17, %v6249_v32 }
 0x315   :  { %v3059_v8 = vrot.slane %v3045_v37, %v6249_v32  ;;  %v2963_v44 = vcombine.low %v1418_v61, %v1432_v10  ;;  %v4758_v58 = vcombine.high %v1418_v61, %v1432_v10  ;;  %v976_v48 = vadd.s32 %v6278_v60, %v973_v54  ;;  %v1270_v54 = vld [vmem:[#allocation3 + $0x28] sm:$0xff] }
 0x316   :  { %v2965_v55 = vcombine.low %v1425_v16, %v1439_v15  ;;  %v4759_v49 = vcombine.high %v1425_v16, %v1439_v15  ;;  %v752_v35 = vadd.s32 %v6290_v43, %v749_v26  ;;  %v2193_v33 = vrot.slane %v2179_v11, %v6249_v32  ;;  %v7195_v43 = vld [vmem:[#allocation64_spill] sm:$0xff] }
 0x317   :  { %v3060_v20 = vcombine.low %v3052_v27, %v3059_v8  ;;  %v2973_v56 = vrot.slane %v2963_v44, %v6249_v32  ;;  %v2980_v3 = vrot.slane %v4758_v58, %v6249_v32  ;;  %vm7193_vm8 = vcmp.lt.f32.partialorder %v7191_v34, %v7192_v47  ;;  %v1097_v11 = vld [vmem:[#allocation3 + $0xe0] sm:$0xff]  ;;  %v7198_v34 = vld [vmem:[#allocation67_spill] sm:$0xff] }
 0x318   :  { %v1130_v18 = vsel %vm7193_vm8, %v976_v48, %v1098_v41  ;;  %v2987_v24 = vrot.slane %v2965_v55, %v6249_v32  ;;  %v2994_v60 = vrot.slane %v4759_v49, %v6249_v32  ;;  %vm7196_vm11 = vcmp.lt.f32.partialorder %v7194_v6, %v7195_v43  ;;  %v1081_v48 = vld [vmem:[#allocation3 + $0x60] sm:$0xff] }
 0x319   :  { %1163 = vst.msk [vmem:[#allocation3 + $0xe8] sm:$0xff] %vm47_vm0, %v1130_v18  ;;  %v1114_v39 = vsel %vm7196_vm11, %v752_v35, %v1082_v14  ;;  %v2194_v21 = vcombine.high %v2186_v13, %v2186_v13  ;;  %4443 = vperm.xlu1 %5002, %v3060_v20   ;;  %v2995_v52 = vcombine.low %v2973_v56, %v2980_v3  ;;  %v959_v57 = vcvt.f32.s32 %v958_v22  ;;  %v7197_v3 = vld [vmem:[#allocation71_spill] sm:$0xff]  ;;  %v1000_v18 = vpop.xlane.xlu1 %999  ;;  %v7201_v6 = vld [vmem:[#allocation68_spill] sm:$0xff] }
 0x31a   :  { %1147 = vst.msk [vmem:[#allocation3 + $0x68] sm:$0xff] %vm47_vm0, %v1114_v39  ;;  %v2195_v50 = vcombine.high %v2193_v33, %v2193_v33  ;;  %v2202_v62 = vrot.slane %v2186_v13, %v6249_v32  ;;  %v2209_v2 = vrot.slane %v2193_v33, %v6249_v32  ;;  %v2996_v19 = vcombine.low %v2987_v24, %v2994_v60  ;;  %v7200_v60 = vld [vmem:[#allocation72_spill] sm:$0xff] }
 0x31b   :  { %v2216_v63 = vrot.slane %v2194_v21, %v6249_v32  ;;  %v2326_v51 = vcombine.high %v1286_v4, %v1286_v4  ;;  %v2333_v9 = vrot.slane %v1286_v4, %v6249_v32  ;;  %v3003_v31 = vrot.slane %v2995_v52, %v6249_v32  ;;  %v762_v4 = vpop.xlane.xlu0 %761 }
 0x31c   :  { %v2223_v7 = vrot.slane %v2195_v50, %v6249_v32  ;;  %v735_v29 = vcvt.f32.s32 %v734_v30  ;;  %v3010_v42 = vrot.slane %v2996_v19, %v6249_v32  ;;  %v962_v44 = vadd.s32 %v6286_v59, %v959_v57  ;;  %v1269_v19 = vld [vmem:[#allocation3 + $0x20] sm:$0xff]  ;;  %v1083_v57 = vld [vmem:[#allocation3 + $0x70] sm:$0xff] }
 0x31d   :  { %v3747_v12 = vcombine.low %v2202_v62, %v2216_v63  ;;  %v4790_v1 = vcombine.high %v2202_v62, %v2216_v63  ;;  %v2340_v46 = vrot.slane %v2326_v51, %v6249_v32  ;;  %v2341_v53 = vcombine.high %v2333_v9, %v2333_v9 }
 0x31e   :  { %v3749_v5 = vcombine.low %v2209_v2, %v2223_v7  ;;  %v4791_v17 = vcombine.high %v2209_v2, %v2223_v7  ;;  %v2349_v23 = vrot.slane %v2333_v9, %v6249_v32  ;;  %v3011_v61 = vcombine.low %v3003_v31, %v3010_v42  ;;  %v1100_v7 = vld [vmem:[#allocation3 + $0xf8] sm:$0xff] }
 0x31f   :  { %v3757_v16 = vrot.slane %v3747_v12, %v6249_v32  ;;  %v3764_v37 = vrot.slane %v4790_v1, %v6249_v32  ;;  %v2342_v10 = vcombine.high %v2340_v46, %v2340_v46  ;;  %v2356_v15 = vrot.slane %v2340_v46, %v6249_v32 }
 0x320   :  { %v3771_v26 = vrot.slane %v3749_v5, %v6249_v32  ;;  %v3778_v27 = vrot.slane %v4791_v17, %v6249_v32  ;;  %v2363_v41 = vrot.slane %v2341_v53, %v6249_v32  ;;  %4440 = vperm.xlu1 %5002, %v3011_v61   ;;  %v738_v58 = vadd.s32 %v6294_v45, %v735_v29  ;;  %v1288_v29 = vld [vmem:[#allocation3 + $0xb8] sm:$0xff] }
 0x321   :  { %v3779_v13 = vcombine.low %v3757_v16, %v3764_v37  ;;  %v2370_v8 = vrot.slane %v2342_v10, %v6249_v32  ;;  %v1542_v35 = vcombine.high %v1270_v54, %v1270_v54  ;;  %vm7199_vm1 = vcmp.lt.f32.partialorder %v7197_v3, %v7198_v34  ;;  %v7203_v61 = vld [vmem:[#allocation83_spill] sm:$0xff]  ;;  %v7204_v16 = vld [vmem:[#allocation80_spill] sm:$0xff] }
 0x322   :  { %v3780_v14 = vcombine.low %v3771_v26, %v3778_v27  ;;  %v3894_v55 = vcombine.low %v2349_v23, %v2363_v41  ;;  %v4796_v49 = vcombine.high %v2349_v23, %v2363_v41  ;;  %v1129_v47 = vsel %vm7199_vm1, %v962_v44, %v1097_v11  ;;  %v7206_v10 = vld [vmem:[#allocation79_spill] sm:$0xff] }
 0x323   :  { %v3787_v33 = vrot.slane %v3779_v13, %v6249_v32  ;;  %v3896_v20 = vcombine.low %v2356_v15, %v2370_v8  ;;  %v4797_v56 = vcombine.high %v2356_v15, %v2370_v8  ;;  %1162 = vst.msk [vmem:[#allocation3 + $0xe0] sm:$0xff] %vm47_vm0, %v1129_v47  ;;  %vm7202_vm2 = vcmp.lt.f32.partialorder %v7200_v60, %v7201_v6 }
 0x324   :  { %v3794_v24 = vrot.slane %v3780_v14, %v6249_v32  ;;  %v3904_v59 = vrot.slane %v3894_v55, %v6249_v32  ;;  %v3911_v45 = vrot.slane %v4796_v49, %v6249_v32  ;;  %v1113_v43 = vsel %vm7202_vm2, %v738_v58, %v1081_v48 }
 0x325   :  { %v3918_v39 = vrot.slane %v3896_v20, %v6249_v32  ;;  %v3925_v21 = vrot.slane %v4797_v56, %v6249_v32  ;;  %1146 = vst.msk [vmem:[#allocation3 + $0x60] sm:$0xff] %vm47_vm0, %v1113_v43  ;;  %v1549_v22 = vrot.slane %v1270_v54, %v6249_v32  ;;  %v1556_v30 = vrot.slane %v1542_v35, %v6249_v32  ;;  %v7207_v54 = vld [vmem:[#allocation75_spill] sm:$0xff] }
 0x326   :  { %v3795_v52 = vcombine.low %v3787_v33, %v3794_v24  ;;  %v3926_v50 = vcombine.low %v3904_v59, %v3911_v45  ;;  %v1001_v62 = vcvt.f32.s32 %v1000_v18  ;;  %v763_v2 = vcvt.f32.s32 %v762_v4 }
 0x327   :  { %v3927_v63 = vcombine.low %v3918_v39, %v3925_v21  ;;  %v1557_v51 = vcombine.high %v1549_v22, %v1549_v22  ;;  %v1558_v9 = vcombine.high %v1556_v30, %v1556_v30  ;;  %v1565_v31 = vrot.slane %v1549_v22, %v6249_v32  ;;  %v986_v21 = vpop.xlane.xlu1 %985 }
 0x328   :  { %4488 = vperm.xlu1 %5002, %v3795_v52   ;;  %v3934_v42 = vrot.slane %v3926_v50, %v6249_v32  ;;  %v1572_v12 = vrot.slane %v1556_v30, %v6249_v32  ;;  %v1004_v1 = vadd.s32 %v6304_v25, %v1001_v62  ;;  %v766_v46 = vadd.s32 %v6306_v36, %v763_v2 }
 0x329   :  { %v3941_v5 = vrot.slane %v3927_v63, %v6249_v32  ;;  %v1579_v17 = vrot.slane %v1557_v51, %v6249_v32  ;;  %v1586_v53 = vrot.slane %v1558_v9, %v6249_v32  ;;  %v1493_v23 = vcombine.high %v1269_v19, %v1269_v19  ;;  %v776_v51 = vpop.xlane.xlu0 %775 }
 0x32a   :  { %vm7205_vm5 = vcmp.lt.f32.partialorder %v7203_v61, %v7204_v16  ;;  %vm7208_vm6 = vcmp.lt.f32.partialorder %v7206_v10, %v7207_v54  ;;  %v1500_v27 = vrot.slane %v1269_v19, %v6249_v32  ;;  %v2424_v25 = vcombine.high %v1288_v29, %v1288_v29  ;;  %v1272_v16 = vld [vmem:[#allocation3 + $0x38] sm:$0xff] }
 0x32b   :  { %v1132_v37 = vsel %vm7205_vm5, %v1004_v1, %v1100_v7  ;;  %v1115_v26 = vsel %vm7208_vm6, %v766_v46, %v1083_v57  ;;  %v3942_v15 = vcombine.low %v3934_v42, %v3941_v5  ;;  %v3110_v36 = vcombine.low %v1565_v31, %v1579_v17  ;;  %v1099_v5 = vld [vmem:[#allocation3 + $0xf0] sm:$0xff] }
 0x32c   :  { %v4764_v41 = vcombine.high %v1565_v31, %v1579_v17  ;;  %v3112_v11 = vcombine.low %v1572_v12, %v1586_v53  ;;  %1165 = vst.msk [vmem:[#allocation3 + $0xf8] sm:$0xff] %vm47_vm0, %v1132_v37  ;;  %1148 = vst.msk [vmem:[#allocation3 + $0x70] sm:$0xff] %vm47_vm0, %v1115_v26  ;;  %v4765_v13 = vcombine.high %v1572_v12, %v1586_v53  ;;  %v987_v57 = vcvt.f32.s32 %v986_v21  ;;  %v1084_v26 = vld [vmem:[#allocation3 + $0x78] sm:$0xff] }
 0x32d   :  { %v1507_v8 = vrot.slane %v1493_v23, %v6249_v32  ;;  %v1508_v44 = vcombine.high %v1500_v27, %v1500_v27  ;;  %v1516_v58 = vrot.slane %v1500_v27, %v6249_v32  ;;  %4497 = vperm.xlu0 %5003, %v3942_v15   ;;  %v3120_v48 = vrot.slane %v3110_v36, %v6249_v32  ;;  %v7209_v36 = vld [vmem:[#allocation78_spill] sm:$0xff] }
 0x32e   :  { %v3127_v14 = vrot.slane %v4764_v41, %v6249_v32  ;;  %v3134_v55 = vrot.slane %v3112_v11, %v6249_v32  ;;  %v2431_v49 = vrot.slane %v1288_v29, %v6249_v32  ;;  %v3141_v35 = vrot.slane %v4765_v13, %v6249_v32  ;;  %v1285_v29 = vld [vmem:[#allocation3 + $0xa0] sm:$0xff]  ;;  %v7210_v41 = vld [vmem:[#allocation74_spill] sm:$0xff] }
 0x32f   :  { %v1509_v33 = vcombine.high %v1507_v8, %v1507_v8  ;;  %v1523_v20 = vrot.slane %v1507_v8, %v6249_v32  ;;  %v1530_v56 = vrot.slane %v1508_v44, %v6249_v32  ;;  %v2438_v34 = vrot.slane %v2424_v25, %v6249_v32 }
 0x330   :  { %v3142_v3 = vcombine.low %v3120_v48, %v3127_v14  ;;  %v2439_v47 = vcombine.high %v2431_v49, %v2431_v49  ;;  %v2447_v18 = vrot.slane %v2431_v49, %v6249_v32  ;;  %v3143_v4 = vcombine.low %v3134_v55, %v3141_v35  ;;  %v7212_v55 = vld [vmem:[#allocation84_spill] sm:$0xff]  ;;  %v7213_v49 = vld [vmem:[#allocation81_spill] sm:$0xff] }
 0x331   :  { %v1537_v24 = vrot.slane %v1509_v33, %v6249_v32  ;;  %v3061_v59 = vcombine.low %v1516_v58, %v1530_v56  ;;  %v4762_v45 = vcombine.high %v1516_v58, %v1530_v56  ;;  %v2440_v6 = vcombine.high %v2438_v34, %v2438_v34 }
 0x332   :  { %v3150_v60 = vrot.slane %v3142_v3, %v6249_v32  ;;  %v2454_v43 = vrot.slane %v2438_v34, %v6249_v32  ;;  %v2461_v39 = vrot.slane %v2439_v47, %v6249_v32  ;;  %v3157_v22 = vrot.slane %v3143_v4, %v6249_v32 }
 0x333   :  { %v3063_v30 = vcombine.low %v1523_v20, %v1537_v24  ;;  %v4763_v52 = vcombine.high %v1523_v20, %v1537_v24  ;;  %v3071_v50 = vrot.slane %v3061_v59, %v6249_v32  ;;  %v3078_v62 = vrot.slane %v4762_v45, %v6249_v32  ;;  %v1274_v20 = vld [vmem:[#allocation3 + $0x48] sm:$0xff] }
 0x334   :  { %v2468_v2 = vrot.slane %v2440_v6, %v6249_v32  ;;  %v3992_v19 = vcombine.low %v2447_v18, %v2461_v39  ;;  %v4800_v63 = vcombine.high %v2447_v18, %v2461_v39  ;;  %v3158_v9 = vcombine.low %v3150_v60, %v3157_v22 }
 0x335   :  { %v3085_v31 = vrot.slane %v3063_v30, %v6249_v32  ;;  %v3092_v7 = vrot.slane %v4763_v52, %v6249_v32  ;;  %v3093_v42 = vcombine.low %v3071_v50, %v3078_v62  ;;  %v990_v23 = vadd.s32 %v6292_v38, %v987_v57 }
 0x336   :  { %v3994_v12 = vcombine.low %v2454_v43, %v2468_v2  ;;  %v4801_v1 = vcombine.high %v2454_v43, %v2468_v2  ;;  %v4002_v46 = vrot.slane %v3992_v19, %v6249_v32  ;;  %4449 = vperm.xlu1 %5002, %v3158_v9   ;;  %v4009_v53 = vrot.slane %v4800_v63, %v6249_v32 }
 0x337   :  { %v3094_v17 = vcombine.low %v3085_v31, %v3092_v7  ;;  %v777_v61 = vcvt.f32.s32 %v776_v51  ;;  %v3101_v37 = vrot.slane %v3093_v42, %v6249_v32  ;;  %v2277_v27 = vcombine.high %v1285_v29, %v1285_v29 }
 0x338   :  { %v4016_v10 = vrot.slane %v3994_v12, %v6249_v32  ;;  %v4023_v54 = vrot.slane %v4801_v1, %v6249_v32  ;;  %v4024_v15 = vcombine.low %v4002_v46, %v4009_v53  ;;  %vm7211_vm9 = vcmp.lt.f32.partialorder %v7209_v36, %v7210_v41 }
 0x339   :  { %v3108_v25 = vrot.slane %v3094_v17, %v6249_v32  ;;  %v1131_v11 = vsel %vm7211_vm9, %v990_v23, %v1099_v5  ;;  %v780_v13 = vadd.s32 %v6310_v40, %v777_v61  ;;  %v2284_v8 = vrot.slane %v1285_v29, %v6249_v32  ;;  %v1271_v23 = vld [vmem:[#allocation3 + $0x30] sm:$0xff] }
 0x33a   :  { %v4025_v38 = vcombine.low %v4016_v10, %v4023_v54  ;;  %1164 = vst.msk [vmem:[#allocation3 + $0xf0] sm:$0xff] %vm47_vm0, %v1131_v11  ;;  %v2291_v44 = vrot.slane %v2277_v27, %v6249_v32  ;;  %v1640_v58 = vcombine.high %v1272_v16, %v1272_v16  ;;  %v4032_v14 = vrot.slane %v4024_v15, %v6249_v32 }
 0x33b   :  { %v3109_v48 = vcombine.low %v3101_v37, %v3108_v25  ;;  %vm7214_vm10 = vcmp.lt.f32.partialorder %v7212_v55, %v7213_v49  ;;  %v1647_v33 = vrot.slane %v1272_v16, %v6249_v32  ;;  %v2292_v56 = vcombine.high %v2284_v8, %v2284_v8  ;;  %v1290_v49 = vld [vmem:[#allocation3 + $0xc8] sm:$0xff] }
 0x33c   :  { %v1116_v35 = vsel %vm7214_vm10, %v780_v13, %v1084_v26  ;;  %v4039_v40 = vrot.slane %v4025_v38, %v6249_v32  ;;  %v2293_v3 = vcombine.high %v2291_v44, %v2291_v44  ;;  %v2300_v34 = vrot.slane %v2284_v8, %v6249_v32 }
 0x33d   :  { %1149 = vst.msk [vmem:[#allocation3 + $0x78] sm:$0xff] %vm47_vm0, %v1116_v35  ;;  %4446 = vperm.xlu1 %5002, %v3109_v48   ;;  %v2307_v47 = vrot.slane %v2291_v44, %v6249_v32  ;;  %v1654_v18 = vrot.slane %v1640_v58, %v6249_v32  ;;  %v1655_v4 = vcombine.high %v1647_v33, %v1647_v33  ;;  %vm4538_vm0 = vcmask 130112  }
 0x33e   :  { %v1663_v24 = vrot.slane %v1647_v33, %v6249_v32  ;;  %v4040_v59 = vcombine.low %v4032_v14, %v4039_v40  ;;  %v2314_v45 = vrot.slane %v2292_v56, %v6249_v32  ;;  %v2321_v60 = vrot.slane %v2293_v3, %v6249_v32  ;;  %v1287_v56 = vld [vmem:[#allocation3 + $0xb0] sm:$0xff] }
 0x33f   :  { %v1738_v6 = vcombine.high %v1274_v20, %v1274_v20  ;;  %v1656_v43 = vcombine.high %v1654_v18, %v1654_v18  ;;  %v1670_v39 = vrot.slane %v1654_v18, %v6249_v32  ;;  %v1677_v21 = vrot.slane %v1655_v4, %v6249_v32 }
 0x340   :  { %v1745_v22 = vrot.slane %v1274_v20, %v6249_v32  ;;  %4503 = vperm.xlu0 %5003, %v4040_v59   ;;  %v3845_v30 = vcombine.low %v2300_v34, %v2314_v45  ;;  %v4794_v52 = vcombine.high %v2300_v34, %v2314_v45  ;;  %v3847_v50 = vcombine.low %v2307_v47, %v2321_v60 }
 0x341   :  { %v4795_v62 = vcombine.high %v2307_v47, %v2321_v60  ;;  %v1684_v2 = vrot.slane %v1656_v43, %v6249_v32  ;;  %v3208_v19 = vcombine.low %v1663_v24, %v1677_v21  ;;  %v4768_v63 = vcombine.high %v1663_v24, %v1677_v21 }
 0x342   :  { %v1752_v51 = vrot.slane %v1738_v6, %v6249_v32  ;;  %v3855_v9 = vrot.slane %v3845_v30, %v6249_v32  ;;  %v3862_v31 = vrot.slane %v4794_v52, %v6249_v32  ;;  %v3869_v7 = vrot.slane %v3847_v50, %v6249_v32 }
 0x343   :  { %v3876_v57 = vrot.slane %v4795_v62, %v6249_v32  ;;  %v3210_v29 = vcombine.low %v1670_v39, %v1684_v2  ;;  %v4769_v42 = vcombine.high %v1670_v39, %v1684_v2  ;;  %v3218_v12 = vrot.slane %v3208_v19, %v6249_v32 }
 0x344   :  { %v3225_v1 = vrot.slane %v4768_v63, %v6249_v32  ;;  %v3877_v46 = vcombine.low %v3855_v9, %v3862_v31  ;;  %v1753_v17 = vcombine.high %v1745_v22, %v1745_v22  ;;  %v1754_v53 = vcombine.high %v1752_v51, %v1752_v51 }
 0x345   :  { %v3878_v5 = vcombine.low %v3869_v7, %v3876_v57  ;;  %v3232_v61 = vrot.slane %v3210_v29, %v6249_v32  ;;  %v3239_v16 = vrot.slane %v4769_v42, %v6249_v32  ;;  %v1761_v10 = vrot.slane %v1745_v22, %v6249_v32  ;;  %v1292_v7 = vld [vmem:[#allocation3 + $0xd8] sm:$0xff] }
 0x346   :  { %v3240_v37 = vcombine.low %v3218_v12, %v3225_v1  ;;  %v3885_v54 = vrot.slane %v3877_v46, %v6249_v32  ;;  %v1768_v27 = vrot.slane %v1752_v51, %v6249_v32  ;;  %v1775_v25 = vrot.slane %v1753_v17, %v6249_v32 }
 0x347   :  { %v3892_v26 = vrot.slane %v3878_v5, %v6249_v32  ;;  %v3241_v15 = vcombine.low %v3232_v61, %v3239_v16  ;;  %v1782_v41 = vrot.slane %v1754_v53, %v6249_v32  ;;  %v1591_v11 = vcombine.high %v1271_v23, %v1271_v23 }
 0x348   :  { %v3248_v36 = vrot.slane %v3240_v37, %v6249_v32  ;;  %v3306_v38 = vcombine.low %v1761_v10, %v1775_v25  ;;  %v4772_v8 = vcombine.high %v1761_v10, %v1775_v25  ;;  %v1598_v44 = vrot.slane %v1271_v23, %v6249_v32 }
 0x349   :  { %v3893_v13 = vcombine.low %v3885_v54, %v3892_v26  ;;  %v3255_v58 = vrot.slane %v3241_v15, %v6249_v32  ;;  %v3308_v48 = vcombine.low %v1768_v27, %v1782_v41  ;;  %v4773_v14 = vcombine.high %v1768_v27, %v1782_v41 }
 0x34a   :  { %v1605_v55 = vrot.slane %v1591_v11, %v6249_v32  ;;  %v3316_v35 = vrot.slane %v3306_v38, %v6249_v32  ;;  %v3323_v33 = vrot.slane %v4772_v8, %v6249_v32  ;;  %v1606_v20 = vcombine.high %v1598_v44, %v1598_v44 }
 0x34b   :  { %4494 = vperm.xlu1 %5002, %v3893_v13   ;;  %v1614_v40 = vrot.slane %v1598_v44, %v6249_v32  ;;  %v3256_v3 = vcombine.low %v3248_v36, %v3255_v58  ;;  %v3330_v34 = vrot.slane %v3308_v48, %v6249_v32  ;;  %v3337_v47 = vrot.slane %v4773_v14, %v6249_v32 }
 0x34c   :  { %v1607_v18 = vcombine.high %v1605_v55, %v1605_v55  ;;  %v3338_v4 = vcombine.low %v3316_v35, %v3323_v33  ;;  %v1621_v24 = vrot.slane %v1605_v55, %v6249_v32  ;;  %v1628_v59 = vrot.slane %v1606_v20, %v6249_v32 }
 0x34d   :  { %v2522_v45 = vcombine.high %v1290_v49, %v1290_v49  ;;  %v3339_v60 = vcombine.low %v3330_v34, %v3337_v47  ;;  %v2529_v43 = vrot.slane %v1290_v49, %v6249_v32  ;;  %v2375_v39 = vcombine.high %v1287_v56, %v1287_v56 }
 0x34e   :  { %v1635_v6 = vrot.slane %v1607_v18, %v6249_v32  ;;  %v3346_v21 = vrot.slane %v3338_v4, %v6249_v32  ;;  %v3159_v22 = vcombine.low %v1614_v40, %v1628_v59  ;;  %v4766_v30 = vcombine.high %v1614_v40, %v1628_v59  ;;  %v1273_v4 = vld [vmem:[#allocation3 + $0x40] sm:$0xff] }
 0x34f   :  { %4455 = vperm.xlu1 %5002, %v3256_v3   ;;  %v2536_v52 = vrot.slane %v2522_v45, %v6249_v32  ;;  %v3353_v50 = vrot.slane %v3339_v60, %v6249_v32  ;;  %v2537_v19 = vcombine.high %v2529_v43, %v2529_v43  ;;  %v2545_v31 = vrot.slane %v2529_v43, %v6249_v32 }
 0x350   :  { %v3161_v62 = vcombine.low %v1621_v24, %v1635_v6  ;;  %v4767_v2 = vcombine.high %v1621_v24, %v1635_v6  ;;  %v3169_v63 = vrot.slane %v3159_v22, %v6249_v32  ;;  %v3176_v51 = vrot.slane %v4766_v30, %v6249_v32 }
 0x351   :  { %v2538_v9 = vcombine.high %v2536_v52, %v2536_v52  ;;  %v3354_v57 = vcombine.low %v3346_v21, %v3353_v50  ;;  %v2552_v12 = vrot.slane %v2536_v52, %v6249_v32  ;;  %v2559_v46 = vrot.slane %v2537_v19, %v6249_v32 }
 0x352   :  { %v3183_v29 = vrot.slane %v3161_v62, %v6249_v32  ;;  %v3190_v42 = vrot.slane %v4767_v2, %v6249_v32  ;;  %v3191_v1 = vcombine.low %v3169_v63, %v3176_v51  ;;  %v2382_v17 = vrot.slane %v1287_v56, %v6249_v32 }
 0x353   :  { %v2566_v5 = vrot.slane %v2538_v9, %v6249_v32  ;;  %4461 = vperm.xlu0 %5003, %v3354_v57   ;;  %v2389_v23 = vrot.slane %v2375_v39, %v6249_v32  ;;  %v2620_v61 = vcombine.high %v1292_v7, %v1292_v7  ;;  %v2627_v16 = vrot.slane %v1292_v7, %v6249_v32  ;;  %v1291_v57 = vld [vmem:[#allocation3 + $0xd0] sm:$0xff] }
 0x354   :  { %v3192_v53 = vcombine.low %v3183_v29, %v3190_v42  ;;  %v3199_v37 = vrot.slane %v3191_v1, %v6249_v32  ;;  %v4090_v10 = vcombine.low %v2545_v31, %v2559_v46  ;;  %v4804_v54 = vcombine.high %v2545_v31, %v2559_v46  ;;  %v1289_v46 = vld [vmem:[#allocation3 + $0xc0] sm:$0xff] }
 0x355   :  { %v4092_v26 = vcombine.low %v2552_v12, %v2566_v5  ;;  %v4805_v25 = vcombine.high %v2552_v12, %v2566_v5  ;;  %v2390_v15 = vcombine.high %v2382_v17, %v2382_v17  ;;  %v2391_v36 = vcombine.high %v2389_v23, %v2389_v23 }
 0x356   :  { %v3206_v27 = vrot.slane %v3192_v53, %v6249_v32  ;;  %v4100_v41 = vrot.slane %v4090_v10, %v6249_v32  ;;  %v4107_v11 = vrot.slane %v4804_v54, %v6249_v32  ;;  %v2398_v38 = vrot.slane %v2382_v17, %v6249_v32 }
 0x357   :  { %v4114_v13 = vrot.slane %v4092_v26, %v6249_v32  ;;  %v4121_v44 = vrot.slane %v4805_v25, %v6249_v32  ;;  %v2405_v58 = vrot.slane %v2389_v23, %v6249_v32  ;;  %v2412_v48 = vrot.slane %v2390_v15, %v6249_v32 }
 0x358   :  { %v3207_v8 = vcombine.low %v3199_v37, %v3206_v27  ;;  %v4122_v14 = vcombine.low %v4100_v41, %v4107_v11  ;;  %v2419_v55 = vrot.slane %v2391_v36, %v6249_v32  ;;  %v2634_v49 = vrot.slane %v2620_v61, %v6249_v32 }
 0x359   :  { %v2635_v35 = vcombine.high %v2627_v16, %v2627_v16  ;;  %v4123_v33 = vcombine.low %v4114_v13, %v4121_v44  ;;  %v3943_v20 = vcombine.low %v2398_v38, %v2412_v48  ;;  %v4798_v40 = vcombine.high %v2398_v38, %v2412_v48 }
 0x35a   :  { %4452 = vperm.xlu1 %5002, %v3207_v8   ;;  %v2643_v56 = vrot.slane %v2627_v16, %v6249_v32  ;;  %v4130_v3 = vrot.slane %v4122_v14, %v6249_v32  ;;  %v3945_v34 = vcombine.low %v2405_v58, %v2419_v55  ;;  %v4799_v47 = vcombine.high %v2405_v58, %v2419_v55 }
 0x35b   :  { %v2636_v18 = vcombine.high %v2634_v49, %v2634_v49  ;;  %v4137_v24 = vrot.slane %v4123_v33, %v6249_v32  ;;  %v3953_v59 = vrot.slane %v3943_v20, %v6249_v32  ;;  %v3960_v45 = vrot.slane %v4798_v40, %v6249_v32 }
 0x35c   :  { %v2650_v60 = vrot.slane %v2634_v49, %v6249_v32  ;;  %v3967_v6 = vrot.slane %v3945_v34, %v6249_v32  ;;  %v3974_v43 = vrot.slane %v4799_v47, %v6249_v32  ;;  %v2657_v39 = vrot.slane %v2635_v35, %v6249_v32  ;;  %v1294_v49 = vld [vmem:[#allocation3 + $0xe8] sm:$0xff] }
 0x35d   :  { %v2664_v21 = vrot.slane %v2636_v18, %v6249_v32  ;;  %v4138_v22 = vcombine.low %v4130_v3, %v4137_v24  ;;  %v3975_v30 = vcombine.low %v3953_v59, %v3960_v45  ;;  %v1689_v52 = vcombine.high %v1273_v4, %v1273_v4 }
 0x35e   :  { %v1696_v50 = vrot.slane %v1273_v4, %v6249_v32  ;;  %v3976_v62 = vcombine.low %v3967_v6, %v3974_v43  ;;  %v4188_v2 = vcombine.low %v2643_v56, %v2657_v39  ;;  %v4808_v19 = vcombine.high %v2643_v56, %v2657_v39 }
 0x35f   :  { %v4190_v63 = vcombine.low %v2650_v60, %v2664_v21  ;;  %4509 = vperm.xlu0 %5003, %v4138_v22   ;;  %v3983_v51 = vrot.slane %v3975_v30, %v6249_v32  ;;  %v4809_v9 = vcombine.high %v2650_v60, %v2664_v21  ;;  %v1703_v31 = vrot.slane %v1689_v52, %v6249_v32 }
 0x360   :  { %v1704_v7 = vcombine.high %v1696_v50, %v1696_v50  ;;  %v3990_v29 = vrot.slane %v3976_v62, %v6249_v32  ;;  %v4198_v42 = vrot.slane %v4188_v2, %v6249_v32  ;;  %v4205_v12 = vrot.slane %v4808_v19, %v6249_v32 }
 0x361   :  { %v4212_v1 = vrot.slane %v4190_v63, %v6249_v32  ;;  %v4219_v5 = vrot.slane %v4809_v9, %v6249_v32  ;;  %v1705_v17 = vcombine.high %v1703_v31, %v1703_v31  ;;  %v1712_v53 = vrot.slane %v1696_v50, %v6249_v32 }
 0x362   :  { %v1719_v23 = vrot.slane %v1703_v31, %v6249_v32  ;;  %v3991_v61 = vcombine.low %v3983_v51, %v3990_v29  ;;  %v4220_v16 = vcombine.low %v4198_v42, %v4205_v12  ;;  %v1726_v37 = vrot.slane %v1704_v7, %v6249_v32 }
 0x363   :  { %v2571_v10 = vcombine.high %v1291_v57, %v1291_v57  ;;  %v4221_v54 = vcombine.low %v4212_v1, %v4219_v5  ;;  %v1733_v26 = vrot.slane %v1705_v17, %v6249_v32  ;;  %v2578_v27 = vrot.slane %v1291_v57, %v6249_v32 }
 0x364   :  { %v2473_v25 = vcombine.high %v1289_v46, %v1289_v46  ;;  %4500 = vperm.xlu1 %5002, %v3991_v61   ;;  %v4228_v15 = vrot.slane %v4220_v16, %v6249_v32  ;;  %v3257_v36 = vcombine.low %v1712_v53, %v1726_v37  ;;  %v4770_v41 = vcombine.high %v1712_v53, %v1726_v37  ;;  %v1276_v61 = vld [vmem:[#allocation3 + $0x58] sm:$0xff] }
 0x365   :  { %v2585_v11 = vrot.slane %v2571_v10, %v6249_v32  ;;  %v4235_v13 = vrot.slane %v4221_v54, %v6249_v32  ;;  %v3259_v38 = vcombine.low %v1719_v23, %v1733_v26  ;;  %v4771_v8 = vcombine.high %v1719_v23, %v1733_v26 }
 0x366   :  { %v2586_v44 = vcombine.high %v2578_v27, %v2578_v27  ;;  %v3267_v58 = vrot.slane %v3257_v36, %v6249_v32  ;;  %v3274_v48 = vrot.slane %v4770_v41, %v6249_v32  ;;  %v2594_v55 = vrot.slane %v2578_v27, %v6249_v32 }
 0x367   :  { %v2587_v14 = vcombine.high %v2585_v11, %v2585_v11  ;;  %v4236_v35 = vcombine.low %v4228_v15, %v4235_v13  ;;  %v3281_v33 = vrot.slane %v3259_v38, %v6249_v32  ;;  %v3288_v20 = vrot.slane %v4771_v8, %v6249_v32 }
 0x368   :  { %v2601_v40 = vrot.slane %v2585_v11, %v6249_v32  ;;  %v3289_v56 = vcombine.low %v3267_v58, %v3274_v48  ;;  %v2608_v3 = vrot.slane %v2586_v44, %v6249_v32  ;;  %v2480_v47 = vrot.slane %v1289_v46, %v6249_v32 }
 0x369   :  { %v2615_v34 = vrot.slane %v2587_v14, %v6249_v32  ;;  %4515 = vperm.xlu0 %5003, %v4236_v35   ;;  %v3290_v18 = vcombine.low %v3281_v33, %v3288_v20  ;;  %v2487_v4 = vrot.slane %v2473_v25, %v6249_v32  ;;  %v2718_v24 = vcombine.high %v1294_v49, %v1294_v49  ;;  %v1293_v35 = vld [vmem:[#allocation3 + $0xe0] sm:$0xff] }
 0x36a   :  { %v2725_v59 = vrot.slane %v1294_v49, %v6249_v32  ;;  %v3297_v45 = vrot.slane %v3289_v56, %v6249_v32  ;;  %v4139_v60 = vcombine.low %v2594_v55, %v2608_v3  ;;  %v4806_v6 = vcombine.high %v2594_v55, %v2608_v3  ;;  %v1275_v3 = vld [vmem:[#allocation3 + $0x50] sm:$0xff] }
 0x36b   :  { %v4141_v43 = vcombine.low %v2601_v40, %v2615_v34  ;;  %v3304_v39 = vrot.slane %v3290_v18, %v6249_v32  ;;  %v4807_v21 = vcombine.high %v2601_v40, %v2615_v34  ;;  %v2488_v22 = vcombine.high %v2480_v47, %v2480_v47 }
 0x36c   :  { %v2489_v30 = vcombine.high %v2487_v4, %v2487_v4  ;;  %v4149_v52 = vrot.slane %v4139_v60, %v6249_v32  ;;  %v4156_v50 = vrot.slane %v4806_v6, %v6249_v32  ;;  %v2496_v2 = vrot.slane %v2480_v47, %v6249_v32 }
 0x36d   :  { %v4163_v62 = vrot.slane %v4141_v43, %v6249_v32  ;;  %v3305_v19 = vcombine.low %v3297_v45, %v3304_v39  ;;  %v4170_v63 = vrot.slane %v4807_v21, %v6249_v32  ;;  %v2503_v51 = vrot.slane %v2487_v4, %v6249_v32 }
 0x36e   :  { %v2510_v9 = vrot.slane %v2488_v22, %v6249_v32  ;;  %v4171_v31 = vcombine.low %v4149_v52, %v4156_v50  ;;  %v2517_v7 = vrot.slane %v2489_v30, %v6249_v32  ;;  %v2732_v57 = vrot.slane %v2718_v24, %v6249_v32 }
 0x36f   :  { %v2733_v29 = vcombine.high %v2725_v59, %v2725_v59  ;;  %4458 = vperm.xlu1 %5002, %v3305_v19   ;;  %v4172_v42 = vcombine.low %v4163_v62, %v4170_v63  ;;  %v2741_v46 = vrot.slane %v2725_v59, %v6249_v32  ;;  %v1836_v11 = vcombine.high %v1276_v61, %v1276_v61 }
 0x370   :  { %v4041_v12 = vcombine.low %v2496_v2, %v2510_v9  ;;  %v4802_v1 = vcombine.high %v2496_v2, %v2510_v9  ;;  %v4179_v5 = vrot.slane %v4171_v31, %v6249_v32  ;;  %v4043_v17 = vcombine.low %v2503_v51, %v2517_v7 }
 0x371   :  { %v4803_v53 = vcombine.high %v2503_v51, %v2517_v7  ;;  %v2734_v23 = vcombine.high %v2732_v57, %v2732_v57  ;;  %v4186_v16 = vrot.slane %v4172_v42, %v6249_v32  ;;  %v2748_v54 = vrot.slane %v2732_v57, %v6249_v32  ;;  %v1278_v57 = vld [vmem:[#allocation3 + $0x68] sm:$0xff] }
 0x372   :  { %v4051_v37 = vrot.slane %v4041_v12, %v6249_v32  ;;  %v4058_v10 = vrot.slane %v4802_v1, %v6249_v32  ;;  %v4065_v26 = vrot.slane %v4043_v17, %v6249_v32  ;;  %v2755_v25 = vrot.slane %v2733_v29, %v6249_v32 }
 0x373   :  { %v4072_v27 = vrot.slane %v4803_v53, %v6249_v32  ;;  %v2762_v15 = vrot.slane %v2734_v23, %v6249_v32  ;;  %v4187_v36 = vcombine.low %v4179_v5, %v4186_v16  ;;  %v1843_v13 = vrot.slane %v1276_v61, %v6249_v32 }
 0x374   :  { %v4073_v41 = vcombine.low %v4051_v37, %v4058_v10  ;;  %v4286_v8 = vcombine.low %v2741_v46, %v2755_v25  ;;  %v4812_v44 = vcombine.high %v2741_v46, %v2755_v25  ;;  %v1850_v55 = vrot.slane %v1836_v11, %v6249_v32 }
 0x375   :  { %v4074_v38 = vcombine.low %v4065_v26, %v4072_v27  ;;  %v4288_v58 = vcombine.low %v2748_v54, %v2762_v15  ;;  %4512 = vperm.xlu0 %5003, %v4187_v36   ;;  %v4813_v14 = vcombine.high %v2748_v54, %v2762_v15  ;;  %v1851_v49 = vcombine.high %v1843_v13, %v1843_v13 }
 0x376   :  { %v4081_v48 = vrot.slane %v4073_v41, %v6249_v32  ;;  %v4296_v20 = vrot.slane %v4286_v8, %v6249_v32  ;;  %v4303_v40 = vrot.slane %v4812_v44, %v6249_v32  ;;  %v1852_v47 = vcombine.high %v1850_v55, %v1850_v55 }
 0x377   :  { %v4088_v33 = vrot.slane %v4074_v38, %v6249_v32  ;;  %v4310_v56 = vrot.slane %v4288_v58, %v6249_v32  ;;  %v4317_v34 = vrot.slane %v4813_v14, %v6249_v32  ;;  %v1859_v18 = vrot.slane %v1843_v13, %v6249_v32 }
 0x378   :  { %v1866_v4 = vrot.slane %v1850_v55, %v6249_v32  ;;  %v4318_v59 = vcombine.low %v4296_v20, %v4303_v40  ;;  %v1873_v45 = vrot.slane %v1851_v49, %v6249_v32  ;;  %v2669_v60 = vcombine.high %v1293_v35, %v1293_v35 }
 0x379   :  { %v4089_v24 = vcombine.low %v4081_v48, %v4088_v33  ;;  %v4319_v6 = vcombine.low %v4310_v56, %v4317_v34  ;;  %v1880_v43 = vrot.slane %v1852_v47, %v6249_v32  ;;  %v2676_v39 = vrot.slane %v1293_v35, %v6249_v32 }
 0x37a   :  { %v1787_v21 = vcombine.high %v1275_v3, %v1275_v3  ;;  %v4326_v22 = vrot.slane %v4318_v59, %v6249_v32  ;;  %v3404_v30 = vcombine.low %v1859_v18, %v1873_v45  ;;  %v4776_v52 = vcombine.high %v1859_v18, %v1873_v45 }
 0x37b   :  { %4506 = vperm.xlu1 %5002, %v4089_v24   ;;  %v2683_v50 = vrot.slane %v2669_v60, %v6249_v32  ;;  %v4333_v62 = vrot.slane %v4319_v6, %v6249_v32  ;;  %v3406_v2 = vcombine.low %v1866_v4, %v1880_v43  ;;  %v4777_v19 = vcombine.high %v1866_v4, %v1880_v43  ;;  %v1295_v24 = vld [vmem:[#allocation3 + $0xf0] sm:$0xff] }
 0x37c   :  { %v2684_v63 = vcombine.high %v2676_v39, %v2676_v39  ;;  %v3414_v51 = vrot.slane %v3404_v30, %v6249_v32  ;;  %v3421_v9 = vrot.slane %v4776_v52, %v6249_v32  ;;  %v2692_v7 = vrot.slane %v2676_v39, %v6249_v32 }
 0x37d   :  { %v2685_v31 = vcombine.high %v2683_v50, %v2683_v50  ;;  %v4334_v29 = vcombine.low %v4326_v22, %v4333_v62  ;;  %v3428_v42 = vrot.slane %v3406_v2, %v6249_v32  ;;  %v3435_v12 = vrot.slane %v4777_v19, %v6249_v32 }
 0x37e   :  { %v2699_v1 = vrot.slane %v2683_v50, %v6249_v32  ;;  %v3436_v46 = vcombine.low %v3414_v51, %v3421_v9  ;;  %v2706_v5 = vrot.slane %v2684_v63, %v6249_v32  ;;  %v1794_v53 = vrot.slane %v1275_v3, %v6249_v32 }
 0x37f   :  { %v2713_v17 = vrot.slane %v2685_v31, %v6249_v32  ;;  %4521 = vperm.xlu0 %5003, %v4334_v29   ;;  %v3437_v23 = vcombine.low %v3428_v42, %v3435_v12  ;;  %v1801_v61 = vrot.slane %v1787_v21, %v6249_v32  ;;  %v1934_v16 = vcombine.high %v1278_v57, %v1278_v57  ;;  %v1277_v29 = vld [vmem:[#allocation3 + $0x60] sm:$0xff] }
 0x380   :  { %v1941_v37 = vrot.slane %v1278_v57, %v6249_v32  ;;  %v3444_v10 = vrot.slane %v3436_v46, %v6249_v32  ;;  %v4237_v54 = vcombine.low %v2692_v7, %v2706_v5  ;;  %v4810_v26 = vcombine.high %v2692_v7, %v2706_v5  ;;  %v1296_v5 = vld [vmem:[#allocation3 + $0xf8] sm:$0xff] }
 0x381   :  { %v4239_v27 = vcombine.low %v2699_v1, %v2713_v17  ;;  %v3451_v25 = vrot.slane %v3437_v23, %v6249_v32  ;;  %v4811_v15 = vcombine.high %v2699_v1, %v2713_v17  ;;  %v1802_v36 = vcombine.high %v1794_v53, %v1794_v53 }
 0x382   :  { %v1803_v41 = vcombine.high %v1801_v61, %v1801_v61  ;;  %v4247_v11 = vrot.slane %v4237_v54, %v6249_v32  ;;  %v4254_v13 = vrot.slane %v4810_v26, %v6249_v32  ;;  %v1810_v8 = vrot.slane %v1794_v53, %v6249_v32 }
 0x383   :  { %v4261_v38 = vrot.slane %v4239_v27, %v6249_v32  ;;  %v3452_v44 = vcombine.low %v3444_v10, %v3451_v25  ;;  %v4268_v58 = vrot.slane %v4811_v15, %v6249_v32  ;;  %v1817_v48 = vrot.slane %v1801_v61, %v6249_v32 }
 0x384   :  { %v1824_v14 = vrot.slane %v1802_v36, %v6249_v32  ;;  %v4269_v55 = vcombine.low %v4247_v11, %v4254_v13  ;;  %v1831_v49 = vrot.slane %v1803_v41, %v6249_v32  ;;  %v1948_v35 = vrot.slane %v1934_v16, %v6249_v32 }
 0x385   :  { %v1949_v33 = vcombine.high %v1941_v37, %v1941_v37  ;;  %4467 = vperm.xlu1 %5002, %v3452_v44   ;;  %v4270_v20 = vcombine.low %v4261_v38, %v4268_v58  ;;  %v1957_v3 = vrot.slane %v1941_v37, %v6249_v32  ;;  %v2767_v50 = vcombine.high %v1295_v24, %v1295_v24 }
 0x386   :  { %v3355_v40 = vcombine.low %v1810_v8, %v1824_v14  ;;  %v4774_v56 = vcombine.high %v1810_v8, %v1824_v14  ;;  %v4277_v34 = vrot.slane %v4269_v55, %v6249_v32  ;;  %v3357_v47 = vcombine.low %v1817_v48, %v1831_v49 }
 0x387   :  { %v4775_v18 = vcombine.high %v1817_v48, %v1831_v49  ;;  %v1950_v4 = vcombine.high %v1948_v35, %v1948_v35  ;;  %v4284_v59 = vrot.slane %v4270_v20, %v6249_v32  ;;  %v1964_v6 = vrot.slane %v1948_v35, %v6249_v32  ;;  %v1279_v35 = vld [vmem:[#allocation3 + $0x70] sm:$0xff] }
 0x388   :  { %v3365_v45 = vrot.slane %v3355_v40, %v6249_v32  ;;  %v3372_v60 = vrot.slane %v4774_v56, %v6249_v32  ;;  %v3379_v43 = vrot.slane %v3357_v47, %v6249_v32  ;;  %v1971_v21 = vrot.slane %v1949_v33, %v6249_v32 }
 0x389   :  { %v3386_v39 = vrot.slane %v4775_v18, %v6249_v32  ;;  %v1978_v22 = vrot.slane %v1950_v4, %v6249_v32  ;;  %v4285_v30 = vcombine.low %v4277_v34, %v4284_v59  ;;  %v2774_v62 = vrot.slane %v1295_v24, %v6249_v32 }
 0x38a   :  { %v3387_v52 = vcombine.low %v3365_v45, %v3372_v60  ;;  %v3502_v19 = vcombine.low %v1957_v3, %v1971_v21  ;;  %v4780_v63 = vcombine.high %v1957_v3, %v1971_v21  ;;  %v2781_v7 = vrot.slane %v2767_v50, %v6249_v32 }
 0x38b   :  { %v3388_v2 = vcombine.low %v3379_v43, %v3386_v39  ;;  %v3504_v51 = vcombine.low %v1964_v6, %v1978_v22  ;;  %4518 = vperm.xlu0 %5003, %v4285_v30   ;;  %v4781_v31 = vcombine.high %v1964_v6, %v1978_v22  ;;  %v2782_v57 = vcombine.high %v2774_v62, %v2774_v62 }
 0x38c   :  { %v3395_v9 = vrot.slane %v3387_v52, %v6249_v32  ;;  %v3512_v12 = vrot.slane %v3502_v19, %v6249_v32  ;;  %v3519_v1 = vrot.slane %v4780_v63, %v6249_v32  ;;  %v2783_v53 = vcombine.high %v2781_v7, %v2781_v7 }
 0x38d   :  { %v3402_v42 = vrot.slane %v3388_v2, %v6249_v32  ;;  %v3526_v46 = vrot.slane %v3504_v51, %v6249_v32  ;;  %v3533_v17 = vrot.slane %v4781_v31, %v6249_v32  ;;  %v2790_v23 = vrot.slane %v2774_v62, %v6249_v32 }
 0x38e   :  { %v2797_v61 = vrot.slane %v2781_v7, %v6249_v32  ;;  %v3534_v37 = vcombine.low %v3512_v12, %v3519_v1  ;;  %v2804_v10 = vrot.slane %v2782_v57, %v6249_v32  ;;  %v1885_v54 = vcombine.high %v1277_v29, %v1277_v29 }
 0x38f   :  { %v3403_v16 = vcombine.low %v3395_v9, %v3402_v42  ;;  %v3535_v26 = vcombine.low %v3526_v46, %v3533_v17  ;;  %v2811_v27 = vrot.slane %v2783_v53, %v6249_v32  ;;  %v1892_v25 = vrot.slane %v1277_v29, %v6249_v32 }
 0x390   :  { %v2816_v15 = vcombine.high %v1296_v5, %v1296_v5  ;;  %v3542_v36 = vrot.slane %v3534_v37, %v6249_v32  ;;  %v4335_v41 = vcombine.low %v2790_v23, %v2804_v10  ;;  %v4814_v11 = vcombine.high %v2790_v23, %v2804_v10 }
 0x391   :  { %4464 = vperm.xlu1 %5002, %v3403_v16   ;;  %v1899_v13 = vrot.slane %v1885_v54, %v6249_v32  ;;  %v3549_v38 = vrot.slane %v3535_v26, %v6249_v32  ;;  %v4337_v8 = vcombine.low %v2797_v61, %v2811_v27  ;;  %v4815_v44 = vcombine.high %v2797_v61, %v2811_v27  ;;  %v1280_v16 = vld [vmem:[#allocation3 + $0x78] sm:$0xff] }
 0x392   :  { %v1900_v58 = vcombine.high %v1892_v25, %v1892_v25  ;;  %v4345_v48 = vrot.slane %v4335_v41, %v6249_v32  ;;  %v4352_v14 = vrot.slane %v4814_v11, %v6249_v32  ;;  %v1908_v49 = vrot.slane %v1892_v25, %v6249_v32 }
 0x393   :  { %v1901_v55 = vcombine.high %v1899_v13, %v1899_v13  ;;  %v3550_v33 = vcombine.low %v3542_v36, %v3549_v38  ;;  %v4359_v20 = vrot.slane %v4337_v8, %v6249_v32  ;;  %v4366_v40 = vrot.slane %v4815_v44, %v6249_v32 }
 0x394   :  { %v1915_v56 = vrot.slane %v1899_v13, %v6249_v32  ;;  %v4367_v3 = vcombine.low %v4345_v48, %v4352_v14  ;;  %v1922_v34 = vrot.slane %v1900_v58, %v6249_v32  ;;  %v2823_v18 = vrot.slane %v1296_v5, %v6249_v32 }
 0x395   :  { %v1929_v47 = vrot.slane %v1901_v55, %v6249_v32  ;;  %4473 = vperm.xlu1 %5002, %v3550_v33   ;;  %v4368_v4 = vcombine.low %v4359_v20, %v4366_v40  ;;  %v2830_v24 = vrot.slane %v2816_v15, %v6249_v32  ;;  %v1983_v59 = vcombine.high %v1279_v35, %v1279_v35 }
 0x396   :  { %v1990_v45 = vrot.slane %v1279_v35, %v6249_v32  ;;  %v4375_v60 = vrot.slane %v4367_v3, %v6249_v32  ;;  %v3453_v6 = vcombine.low %v1908_v49, %v1922_v34  ;;  %v4778_v43 = vcombine.high %v1908_v49, %v1922_v34 }
 0x397   :  { %v3455_v39 = vcombine.low %v1915_v56, %v1929_v47  ;;  %v4382_v21 = vrot.slane %v4368_v4, %v6249_v32  ;;  %v4779_v22 = vcombine.high %v1915_v56, %v1929_v47  ;;  %v2831_v30 = vcombine.high %v2823_v18, %v2823_v18 }
 0x398   :  { %v2832_v52 = vcombine.high %v2830_v24, %v2830_v24  ;;  %v3463_v50 = vrot.slane %v3453_v6, %v6249_v32  ;;  %v3470_v62 = vrot.slane %v4778_v43, %v6249_v32  ;;  %v2839_v19 = vrot.slane %v2823_v18, %v6249_v32 }
 0x399   :  { %v3477_v2 = vrot.slane %v3455_v39, %v6249_v32  ;;  %v4383_v63 = vcombine.low %v4375_v60, %v4382_v21  ;;  %v3484_v51 = vrot.slane %v4779_v22, %v6249_v32  ;;  %v2846_v9 = vrot.slane %v2830_v24, %v6249_v32 }
 0x39a   :  { %v2853_v31 = vrot.slane %v2831_v30, %v6249_v32  ;;  %v3485_v7 = vcombine.low %v3463_v50, %v3470_v62  ;;  %v2860_v57 = vrot.slane %v2832_v52, %v6249_v32  ;;  %v1997_v29 = vrot.slane %v1983_v59, %v6249_v32 }
 0x39b   :  { %v1998_v42 = vcombine.high %v1990_v45, %v1990_v45  ;;  %4524 = vperm.xlu0 %5003, %v4383_v63   ;;  %v3486_v12 = vcombine.low %v3477_v2, %v3484_v51  ;;  %v2006_v5 = vrot.slane %v1990_v45, %v6249_v32  ;;  %v2032_v13 = vcombine.high %v1280_v16, %v1280_v16 }
 0x39c   :  { %v4384_v1 = vcombine.low %v2839_v19, %v2853_v31  ;;  %v4816_v46 = vcombine.high %v2839_v19, %v2853_v31  ;;  %v3493_v17 = vrot.slane %v3485_v7, %v6249_v32  ;;  %v4386_v53 = vcombine.low %v2846_v9, %v2860_v57 }
 0x39d   :  { %v4817_v23 = vcombine.high %v2846_v9, %v2860_v57  ;;  %v1999_v61 = vcombine.high %v1997_v29, %v1997_v29  ;;  %v3500_v37 = vrot.slane %v3486_v12, %v6249_v32  ;;  %v2013_v26 = vrot.slane %v1997_v29, %v6249_v32  ;;  %v4438_v57 = vpop.permute.xlu1 %4437 }
 0x39e   :  { %v4394_v10 = vrot.slane %v4384_v1, %v6249_v32  ;;  %v4401_v54 = vrot.slane %v4816_v46, %v6249_v32  ;;  %v4408_v27 = vrot.slane %v4386_v53, %v6249_v32  ;;  %v2020_v15 = vrot.slane %v1998_v42, %v6249_v32 }
 0x39f   :  { %v4415_v25 = vrot.slane %v4817_v23, %v6249_v32  ;;  %v2027_v36 = vrot.slane %v1999_v61, %v6249_v32  ;;  %v3501_v41 = vcombine.low %v3493_v17, %v3500_v37  ;;  %v2039_v38 = vrot.slane %v1280_v16, %v6249_v32  ;;  %v4486_v17 = vpop.permute.xlu0 %4485 }
 0x3a0   :  { %v4416_v11 = vcombine.low %v4394_v10, %v4401_v54  ;;  %v3551_v44 = vcombine.low %v2006_v5, %v2020_v15  ;;  %v4782_v58 = vcombine.high %v2006_v5, %v2020_v15  ;;  %v2046_v49 = vrot.slane %v2032_v13, %v6249_v32 }
 0x3a1   :  { %v4417_v8 = vcombine.low %v4408_v27, %v4415_v25  ;;  %v3553_v48 = vcombine.low %v2013_v26, %v2027_v36  ;;  %4470 = vperm.xlu1 %5002, %v3501_v41   ;;  %v4783_v55 = vcombine.high %v2013_v26, %v2027_v36  ;;  %v2047_v35 = vcombine.high %v2039_v38, %v2039_v38  ;;  %v4483_v29 = vpop.permute.xlu1 %4482  ;;  %v7215_v36 = vld [vmem:[#allocation15_spill] sm:$0xff] }
 0x3a2   :  { %v4424_v14 = vrot.slane %v4416_v11, %v6249_v32  ;;  %v3561_v20 = vrot.slane %v3551_v44, %v6249_v32  ;;  %v3568_v40 = vrot.slane %v4782_v58, %v6249_v32  ;;  %v2048_v34 = vcombine.high %v2046_v49, %v2046_v49 }
 0x3a3   :  { %v4431_v33 = vrot.slane %v4417_v8, %v6249_v32  ;;  %v3575_v56 = vrot.slane %v3553_v48, %v6249_v32  ;;  %v3582_v3 = vrot.slane %v4783_v55, %v6249_v32  ;;  %v2055_v4 = vrot.slane %v2039_v38, %v6249_v32  ;;  %v4435_v23 = vpop.permute.xlu0 %4434 }
 0x3a4   :  { %v3583_v18 = vcombine.low %v3561_v20, %v3568_v40  ;;  %v2069_v24 = vrot.slane %v2047_v35, %v6249_v32  ;;  %v2062_v45 = vrot.slane %v2046_v49, %v6249_v32  ;;  %v2076_v60 = vrot.slane %v2048_v34, %v6249_v32 }
 0x3a5   :  { %v4432_v47 = vcombine.low %v4424_v14, %v4431_v33  ;;  %v3584_v59 = vcombine.low %v3575_v56, %v3582_v3  ;;  %v6829_v42 = vpop.permute.xlu1 %4443  ;;  %v4533_v41 = vadd.s32 4294967288, %v7215_v36  ;;  %v4540_v11 = vadd.s32 4294967280, %v7215_v36 }
 0x3a6   :  { %v3600_v6 = vcombine.low %v2055_v4, %v2069_v24  ;;  %v4784_v43 = vcombine.high %v2055_v4, %v2069_v24  ;;  %v3591_v39 = vrot.slane %v3583_v18, %v6249_v32  ;;  %v3602_v22 = vcombine.low %v2062_v45, %v2076_v60 }
 0x3a7   :  { %4527 = vperm.xlu0 %5003, %v4432_v47   ;;  %v3598_v21 = vrot.slane %v3584_v59, %v6249_v32  ;;  %v4785_v30 = vcombine.high %v2062_v45, %v2076_v60  ;;  %v4492_v16 = vpop.permute.xlu0 %4491  ;;  %v4536_v38 = vsub.s32 %v4533_v41, %v6202_v0  ;;  %v4531_v8 = vsub.s32 %v7215_v36, %v6202_v0 }
 0x3a8   :  { %v3610_v52 = vrot.slane %v3600_v6, %v6249_v32  ;;  %v3617_v50 = vrot.slane %v4784_v43, %v6249_v32  ;;  %v3624_v2 = vrot.slane %v3602_v22, %v6249_v32  ;;  %v4547_v44 = vadd.s32 4294967272, %v7215_v36 }
 0x3a9   :  { %v3599_v62 = vcombine.low %v3591_v39, %v3598_v21  ;;  %v3631_v19 = vrot.slane %v4785_v30, %v6249_v32  ;;  %v4441_v12 = vpop.permute.xlu1 %4440  ;;  %v4543_v58 = vsub.s32 %v4540_v11, %v6202_v0  ;;  %v4554_v48 = vadd.s32 4294967264, %v7215_v36 }
 0x3aa   :  { %v3632_v63 = vcombine.low %v3610_v52, %v3617_v50  ;;  %v4641_v55 = vrot.slane %v4483_v29, %v4531_v8  ;;  %v4645_v33 = vrot.slane %v4486_v17, %v4536_v38  ;;  %v4550_v20 = vsub.s32 %v4547_v44, %v6202_v0 }
 0x3ab   :  { %4476 = vperm.xlu1 %5002, %v3599_v62   ;;  %v3633_v51 = vcombine.low %v3624_v2, %v3631_v19  ;;  %v4561_v40 = vadd.s32 4294967256, %v7215_v36  ;;  %v4557_v56 = vsub.s32 %v4554_v48, %v6202_v0  ;;  %v4568_v3 = vadd.s32 4294967248, %v7215_v36 }
 0x3ac   :  { %v3640_v9 = vrot.slane %v3632_v63, %v6249_v32  ;;  %v4498_v10 = vpop.permute.xlu0 %4497  ;;  %v4532_v34 = vrot.slane %v4435_v23, %v4531_v8  ;;  %v4646_v47 = vsel %vm4538_vm0, %v4645_v33, %v4641_v55  ;;  %vm4545_vm13 = vcmask 195712  }
 0x3ad   :  { %v3647_v31 = vrot.slane %v3633_v51, %v6249_v32  ;;  %v4489_v1 = vpop.permute.xlu1 %4488  ;;  %v4544_v18 = vrot.slane %v4441_v12, %v4543_v58  ;;  %v4537_v45 = vrot.slane %v4438_v57, %v4536_v38  ;;  %v4655_v60 = vrot.slane %v4492_v16, %v4550_v20 }
 0x3ae   :  { %v4650_v49 = vrot.slane %v4489_v1, %v4543_v58  ;;  %v4564_v6 = vsub.s32 %v4561_v40, %v6202_v0  ;;  %v4575_v43 = vadd.s32 4294967240, %v7215_v36  ;;  %vm4552_vm14 = vcmask 261312  }
 0x3af   :  { %v3648_v7 = vcombine.low %v3640_v9, %v3647_v31  ;;  %v4571_v39 = vsub.s32 %v4568_v3, %v6202_v0  ;;  %v4582_v21 = vadd.s32 4294967232, %v7215_v36  ;;  %v4539_v30 = vsel %vm4538_vm0, %v4537_v45, %v4532_v34 }
 0x3b0   :  { %v4651_v4 = vsel %vm4545_vm13, %v4650_v49, %v4646_v47  ;;  %vm4559_vm4 = vcmask 326912   ;;  %v4546_v50 = vsel %vm4545_vm13, %v4544_v18, %v4539_v30  ;;  %v4551_v63 = vrot.slane %v6829_v42, %v4550_v20 }
 0x3b1   :  { %4479 = vperm.xlu1 %5002, %v3648_v7   ;;  %v4656_v52 = vsel %vm4552_vm14, %v4655_v60, %v4651_v4  ;;  %v4665_v51 = vrot.slane %v4498_v10, %v4564_v6  ;;  %v4578_v9 = vsub.s32 %v4575_v43, %v6202_v0  ;;  %v4589_v31 = vadd.s32 4294967224, %v7215_v36 }
 0x3b2   :  { %vm4566_vm7 = vcmask 392512   ;;  %v4585_v7 = vsub.s32 %v4582_v21, %v6202_v0  ;;  %v4553_v29 = vsel %vm4552_vm14, %v4551_v63, %v4546_v50  ;;  %vm4573_vm12 = vcmask 458112  }
 0x3b3   :  { %v4596_v1 = vadd.s32 4294967216, %v7215_v36  ;;  %v4603_v41 = vadd.s32 4294967208, %v7215_v36  ;;  %vm4580_vm15 = vcmask 523712   ;;  %vm4587_vm3 = vcmask 589312  }
 0x3b4   :  { %vm4594_vm8 = vcmask 654912   ;;  %v4617_v49 = vadd.s32 4294967192, %v7215_v36  ;;  %vm4601_vm11 = vcmask 720512   ;;  %v4631_v18 = vadd.s32 4294967176, %v7215_v36 }
 0x3b5   :  { %v6831_v46 = vpop.permute.xlu1 %4449  ;;  %v4599_v38 = vsub.s32 %v4596_v1, %v6202_v0  ;;  %v4606_v55 = vsub.s32 %v4603_v41, %v6202_v0  ;;  %vm4608_vm1 = vcmask 786112   ;;  %vm4615_vm2 = vcmask 851712  }
 0x3b6   :  { %v4565_v16 = vrot.slane %v6831_v46, %v4564_v6  ;;  %v4620_v45 = vsub.s32 %v4617_v49, %v6202_v0  ;;  %vm4622_vm5 = vcmask 917312   ;;  %vm4629_vm6 = vcmask 982912  }
 0x3b7   :  { %vm4636_vm9 = vcmask 1048512   ;;  %vm4734_vm10 = vcmp.lt.s32.totalorder %v7129_v28, 256 }
 0x3bc   :  { %v6833_v5 = vpop.permute.xlu1 %4446 }
 0x3bd   :  { %v4558_v62 = vrot.slane %v6833_v5, %v4557_v56 }
 0x3bf   :  { %v6839_v54 = vpop.permute.xlu0 %4503  ;;  %v4560_v5 = vsel %vm4559_vm4, %v4558_v62, %v4553_v29 }
 0x3c0   :  { %v4675_v10 = vrot.slane %v6839_v54, %v4578_v9  ;;  %v4567_v11 = vsel %vm4566_vm7, %v4565_v16, %v4560_v5  ;;  %v4610_v54 = vadd.s32 4294967200, %v7215_v36 }
 0x3ca   :  { %v4495_v53 = vpop.permute.xlu1 %4494 }
 0x3cb   :  { %v4660_v24 = vrot.slane %v4495_v53, %v4557_v56 }
 0x3cd   :  { %v4661_v2 = vsel %vm4559_vm4, %v4660_v24, %v4656_v52 }
 0x3ce   :  { %v6835_v61 = vpop.permute.xlu1 %4455  ;;  %v4666_v12 = vsel %vm4566_vm7, %v4665_v51, %v4661_v2 }
 0x3cf   :  { %v4579_v58 = vrot.slane %v6835_v61, %v4578_v9  ;;  %v4613_v61 = vsub.s32 %v4610_v54, %v6202_v0 }
 0x3d2   :  { %v6841_v27 = vpop.permute.xlu0 %4461 }
 0x3d9   :  { %v6837_v37 = vpop.permute.xlu1 %4452 }
 0x3da   :  { %v4572_v42 = vrot.slane %v6837_v37, %v4571_v39 }
 0x3dc   :  { %v4574_v8 = vsel %vm4573_vm12, %v4572_v42, %v4567_v11 }
 0x3dd   :  { %v4581_v20 = vsel %vm4580_vm15, %v4579_v58, %v4574_v8 }
 0x3de   :  { %v6845_v15 = vpop.permute.xlu0 %4509 }
 0x3e3   :  { %v4501_v26 = vpop.permute.xlu1 %4500 }
 0x3e4   :  { %v4670_v19 = vrot.slane %v4501_v26, %v4571_v39  ;;  %v4592_v26 = vsub.s32 %v4589_v31, %v6202_v0 }
 0x3e6   :  { %v4671_v17 = vsel %vm4573_vm12, %v4670_v19, %v4666_v12  ;;  %v4685_v48 = vrot.slane %v6845_v15, %v4592_v26  ;;  %v4593_v47 = vrot.slane %v6841_v27, %v4592_v26 }
 0x3e7   :  { %v4676_v37 = vsel %vm4580_vm15, %v4675_v10, %v4671_v17 }
 0x3e8   :  { %v6857_v14 = vpop.permute.xlu0 %4515 }
 0x3e9   :  { %v4695_v24 = vrot.slane %v6857_v14, %v4606_v55 }
 0x3ee   :  { %v6843_v25 = vpop.permute.xlu1 %4458 }
 0x3f4   :  { %v6867_v59 = vpop.permute.xlu0 %4512 }
 0x3f5   :  { %v4690_v3 = vrot.slane %v6867_v59, %v4599_v38 }
 0x3fa   :  { %v6849_v13 = vpop.permute.xlu1 %4506 }
 0x3fb   :  { %v4680_v53 = vrot.slane %v6849_v13, %v4585_v7  ;;  %v4586_v13 = vrot.slane %v6843_v25, %v4585_v7  ;;  %v4624_v25 = vadd.s32 4294967184, %v7215_v36  ;;  %v4634_v36 = vsub.s32 %v4631_v18, %v6202_v0 }
 0x3fd   :  { %v4681_v46 = vsel %vm4587_vm3, %v4680_v53, %v4676_v37  ;;  %v4588_v56 = vsel %vm4587_vm3, %v4586_v13, %v4581_v20  ;;  %v4627_v59 = vsub.s32 %v4624_v25, %v6202_v0 }
 0x3fe   :  { %v6884_v57 = vpop.permute.xlu0 %4521  ;;  %v4686_v40 = vsel %vm4594_vm8, %v4685_v48, %v4681_v46  ;;  %v4595_v60 = vsel %vm4594_vm8, %v4593_v47, %v4588_v56 }
 0x3ff   :  { %v4691_v4 = vsel %vm4601_vm11, %v4690_v3, %v4686_v40  ;;  %v4705_v19 = vrot.slane %v6884_v57, %v4620_v45 }
 0x400   :  { %v4696_v27 = vsel %vm4608_vm1, %v4695_v24, %v4691_v4 }
 0x404   :  { %v6859_v35 = vpop.permute.xlu1 %4467 }
 0x40a   :  { %v4519_v44 = vpop.permute.xlu0 %4518 }
 0x40b   :  { %v4700_v6 = vrot.slane %v4519_v44, %v4613_v61 }
 0x40d   :  { %v4701_v52 = vsel %vm4615_vm2, %v4700_v6, %v4696_v27 }
 0x40e   :  { %v4706_v9 = vsel %vm4622_vm5, %v4705_v19, %v4701_v52 }
 0x410   :  { %v6873_v22 = vpop.permute.xlu1 %4464 }
 0x411   :  { %v4600_v15 = vrot.slane %v6873_v22, %v4599_v38  ;;  %v4607_v22 = vrot.slane %v6859_v35, %v4606_v55 }
 0x413   :  { %v4602_v43 = vsel %vm4601_vm11, %v4600_v15, %v4595_v60 }
 0x414   :  { %v4474_v23 = vpop.permute.xlu1 %4473  ;;  %v4609_v14 = vsel %vm4608_vm1, %v4607_v22, %v4602_v43 }
 0x415   :  { %v4621_v63 = vrot.slane %v4474_v23, %v4620_v45 }
 0x41a   :  { %v4525_v34 = vpop.permute.xlu0 %4524 }
 0x41b   :  { %v4710_v50 = vrot.slane %v4525_v34, %v4627_v59 }
 0x41d   :  { %v4711_v29 = vsel %vm4629_vm6, %v4710_v50, %v4706_v9 }
 0x420   :  { %v4471_v33 = vpop.permute.xlu1 %4470 }
 0x421   :  { %v4614_v39 = vrot.slane %v4471_v33, %v4613_v61 }
 0x423   :  { %v4616_v62 = vsel %vm4615_vm2, %v4614_v39, %v4609_v14 }
 0x424   :  { %v4623_v31 = vsel %vm4622_vm5, %v4621_v63, %v4616_v62 }
 0x426   :  { %v4528_v30 = vpop.permute.xlu0 %4527 }
 0x427   :  { %v4715_v51 = vrot.slane %v4528_v30, %v4634_v36 }
 0x429   :  { %v4716_v12 = vsel %vm4636_vm9, %v4715_v51, %v4711_v29 }
 0x42a   :  { %v4477_v21 = vpop.permute.xlu1 %4476 }
 0x42b   :  { %v4628_v2 = vrot.slane %v4477_v21, %v4627_v59 }
 0x42d   :  { %v4630_v0 = vsel %vm4629_vm6, %v4628_v2, %v4623_v31 }
 0x430   :  { %v4480_v35 = vpop.permute.xlu1 %4479 }
 0x431   :  { %v4635_v7 = vrot.slane %v4480_v35, %v4634_v36 }
 0x433   :  { %v4637_v1 = vsel %vm4636_vm9, %v4635_v7, %v4630_v0 }
 0x434   :  { %v4717_v5 = vcombine.low %v4637_v1, %v4716_v12 }
 0x436   :  { %v4724_v42 = vrot.slane %v4717_v5, %v6249_v32 }
 0x438   :  { %v4731_v57 = vrot.slane %v4724_v42, %v6249_v32 }
 0x43a   :  { %4736 = vst.msk [vmem:[#allocation9] sm:$0x3] %vm4734_vm10, %v4731_v57 }
 0x43b   :  { %5091 = shalt.err (!%p5088_p6)
}
 0x43c   :  { %s5092_s15 = scalar_lea.hbm %s6944_s3, 32 }
 0x43d   :  { %p5093_p7 = scmp.ne.s32.totalorder %s6944_s3, %s5092_s15  ;;  %p5096_p8 = scmp.lt.u32.totalorder %s5092_s15, %s6944_s3 }
 0x43f   :  { %p5098_p9 = pnand %p5096_p8, %p5093_p7 }
 0x441   :  { %5101 = shalt.err (!%p5098_p9)
}
 0x442   :  { %4746 = dma.vmem_to_hbm [thread:$0]  %s4744_s11, 32, %s6944_s3, [#allocation6]  }
 0x443   :  { %5106 = dma.done.wait [#allocation6], 32  }
 0x444   :  { %5107 = vsyncadd [#allocation6], 4294967264 }
 0x445   :  { %4750 = vsyncpa [#allocation5], 1 }
 0x446   :  { %4751 = vsyncpa [#allocation8], 1 }
 0x447   :  { %4752 = vsyncpa [#allocation6], 1 }

</bundles_post_ra>
